<compile_context>
chip_gen: v5e
topology: v5e:2x2
jax: 0.10.0
libtpu: 0.0.40
codegen_flags: <defaults>
</compile_context>

<pallas_src>
import jax
import jax.numpy as jnp
from jax import lax
from jax.experimental import pallas as pl
from jax.experimental.pallas import tpu as pltpu


# -----------------------------------------------------------------------------
# geometry constants for the 64x64, 2-layer, 3x3 encoder (OUT_DIM_64[2] == 29)
# -----------------------------------------------------------------------------
H1 = 31                     # conv1 output H/W  ((64-3)//2 + 1)
OUTD = 29                   # conv2 output H/W  (OUT_DIM_64[2])
QLEN = 1024                 # padded conv2 "wide" position count (8 * 128 lanes)
NR = 1152                   # conv1 activation columns (9 * 128), >= QLEN + 64
TAP_OFFS = tuple(di * H1 + dj for di in range(3) for dj in range(3))  # di*31+dj


# -----------------------------------------------------------------------------
# The fused Critic kernel (one grid step == one tile of B_TILE images)
# -----------------------------------------------------------------------------
def _critic_kernel(pt_ref, pa_ref,
                   w1_ref, b1_ref, w2_ref, b2_ref,
                   gt_ref, fcb_ref, lng_ref, lnb_ref,
                   qw1f_ref, qw1pa_ref, qb1_ref, qw2_ref, qb2_ref,
                   qw3_ref, qb3_ref,
                   out_ref, o2_scr):
    f32 = jnp.float32
    bf16 = jnp.bfloat16
    bt = pt_ref.shape[0]          # images in this tile
    nf = b1_ref.shape[0]          # conv filters (8)
    fd = fcb_ref.shape[1]         # encoder feature dim (16)

    w1 = w1_ref[...]              # (nf, 27) bf16, /255 folded in
    b1 = b1_ref[...]              # (nf, 1)  f32
    b2 = b2_ref[...]              # (nf, 1)  f32

    # ---- conv1 + conv2, per image, channel-in-sublane / spatial-in-lane --------
    # a1 column r = i1*31 + j1 (columns >= 961 come from zero patches; they only
    # feed invalid conv2 positions, which gt zeroes out in the fc contraction).
    def conv_body(i, carry):
        patches = pt_ref[i]                                        # (27, NR) bf16
        a1 = jnp.dot(w1, patches, preferred_element_type=f32)      # (nf, NR)
        a1 = jnp.maximum(a1 + b1, 0.0).astype(bf16)
        acc = jnp.zeros((nf, QLEN), f32)
        for t, off in enumerate(TAP_OFFS):                         # 9 static taps
            acc = acc + jnp.dot(w2_ref[t], a1[:, off:off + QLEN],
                                preferred_element_type=f32)
        o2 = jnp.maximum(acc + b2, 0.0).astype(bf16)               # (nf, QLEN)
        o2_scr[i] = o2
        return carry
    lax.fori_loop(0, bt, conv_body, 0)

    # ---- fc: per-channel NT contraction over the whole tile --------------------
    # h[b, f] = sum_c sum_q o2[b, c, q] * gt[c, f, q]  (gt zero on padding q).
    hT = jnp.zeros((bt, fd), f32)
    for c in range(nf):
        o2c = o2_scr[:, c, :]                                      # (bt, QLEN) bf16
        hT = hT + lax.dot_general(o2c, gt_ref[c],
                                  dimension_numbers=(((1,), (1,)), ((), ())),
                                  preferred_element_type=f32)
    hT = hT + fcb_ref[...]                                         # (bt, fd)

    # ---- LayerNorm (biased variance, eps inside rsqrt, no tanh) ----------------
    mu = jnp.mean(hT, axis=1, keepdims=True)
    xc = hT - mu
    var = jnp.mean(xc * xc, axis=1, keepdims=True)
    feat = xc * lax.rsqrt(var + 1e-5) * lng_ref[...] + lnb_ref[...]  # (bt, fd)

    # ---- both Q heads, fused (block-diagonal) weights, row-vector convention ---
    pa = pa_ref[...]                                               # (bt, 9 + A)
    z = (jnp.dot(feat, qw1f_ref[...], preferred_element_type=f32)
         + jnp.dot(pa, qw1pa_ref[...], preferred_element_type=f32)
         + qb1_ref[...])
    z = jnp.maximum(z, 0.0)                                        # (bt, 2*hd)
    z = jnp.maximum(jnp.dot(z, qw2_ref[...], preferred_element_type=f32)
                    + qb2_ref[...], 0.0)                           # (bt, 2*hd)
    q = jnp.dot(z, qw3_ref[...], preferred_element_type=f32) + qb3_ref[...]
    out_ref[...] = q                                               # (bt, 2)


# -----------------------------------------------------------------------------
# Wrapper: im2col glue (bf16, transposed layout) + the single pallas_call
# -----------------------------------------------------------------------------
def _bcast_spec(arr):
    nd = arr.ndim
    return pl.BlockSpec(arr.shape, lambda *_: (0,) * nd)


def _tile_spec(arr):
    nd = arr.ndim
    return pl.BlockSpec((None,) + arr.shape[1:], lambda s: (s,) + (0,) * (nd - 1))


def _choose_tile(batch):
    """images per grid step, number of grid steps (>=2 steps whenever batch>=2)."""
    if batch <= 1:
        return 1, 1
    bt = min(8, (batch + 1) // 2)
    steps = -(-batch // bt)
    return bt, steps


WEIGHT_NAMES = ("w1", "b1", "w2", "b2", "gt", "fcb", "lng", "lnb",
                "qw1f", "qw1pa", "qb1", "qw2", "qb2", "qw3", "qb3")


def critic_forward(params, obs, pose, action):
    """obs: (B, 3, 64, 64) in [0, 255]; pose: (B, 9); action: (B, A)."""
    B = obs.shape[0]
    assert obs.shape[1:] == (3, 64, 64), "kernel is specialized to 3x64x64 obs"
    bt, steps = _choose_tile(B)
    Bp = bt * steps

    # conv1 im2col (the only XLA glue): 9 stride-2 taps of the NHWC image, emitted
    # transposed ((kh,kw,c)-vector in sublanes, wide position r=i1*31+j1 in lanes)
    # and in bf16.  /255 is folded into the conv1 weight at init.
    x = jnp.transpose(obs.astype(jnp.float32), (0, 2, 3, 1))        # NCHW -> NHWC
    taps = [x[:, di:di + 61:2, dj:dj + 61:2, :]
            for di in range(3) for dj in range(3)]
    pt = jnp.stack(taps, axis=1)                                    # (B,9,31,31,3)
    pt = jnp.transpose(pt, (0, 1, 4, 2, 3)).reshape(B, 27, H1 * H1)
    pt = jnp.pad(pt, ((0, Bp - B), (0, 0), (0, NR - H1 * H1)))
    pt = pt.astype(jnp.bfloat16).reshape(steps, bt, 27, NR)

    pa = jnp.concatenate([pose, action], axis=1).astype(jnp.float32)
    pa = jnp.pad(pa, ((0, Bp - B), (0, 0))).reshape(steps, bt, -1)

    weights = [params[k] for k in WEIGHT_NAMES]
    nf = params["b1"].shape[0]

    out = pl.pallas_call(
        _critic_kernel,
        out_shape=jax.ShapeDtypeStruct((steps, bt, 2), jnp.float32),
        grid_spec=pltpu.PrefetchScalarGridSpec(
            num_scalar_prefetch=0,
            grid=(steps,),
            in_specs=[_tile_spec(pt), _tile_spec(pa)]
                     + [_bcast_spec(w) for w in weights],
            out_specs=pl.BlockSpec((None, bt, 2), lambda s: (s, 0, 0)),
            scratch_shapes=[pltpu.VMEM((bt, nf, QLEN), jnp.bfloat16)],
        ),
        compiler_params=pltpu.CompilerParams(
            dimension_semantics=("parallel",)),
    )(pt, pa, *weights)

    out = out.reshape(Bp, 2)[:B]
    return out[:, 0:1], out[:, 1:2]


# -----------------------------------------------------------------------------
# Deterministic synthetic parameters: generated in PyTorch layouts, converted
# ONCE into the kernel layouts (all reshapes/permutes/fusions hoisted here).
# -----------------------------------------------------------------------------
def init_params(key, obs_shape, action_dim, hidden_dim, feature_dim,
                num_layers=2, num_filters=8):
    c, h, w = obs_shape
    assert (h, w) == (64, 64) and num_layers == 2, \
        "kernel is specialized to the 64x64, 2-layer encoder (OUT_DIM_64[2] = 29)"
    nf, fd, hd = num_filters, feature_dim, hidden_dim
    flat_dim = nf * OUTD * OUTD
    bf16 = jnp.bfloat16

    ks = iter(jax.random.split(key, 24))

    def rnd(shape, scale=0.05):
        return scale * jax.random.normal(next(ks), shape, jnp.float32)

    # ---- PyTorch-layout synthetic parameters (kept for the pure-JAX reference) -
    w1_t, b1_t = rnd((nf, c, 3, 3)), rnd((nf,), 0.01)
    w2_t, b2_t = rnd((nf, nf, 3, 3)), rnd((nf,), 0.01)
    fc_t, fcb_t = rnd((fd, flat_dim), 0.02), rnd((fd,), 0.01)
    lng_t, lnb_t = jnp.ones((fd,), jnp.float32), jnp.zeros((fd,), jnp.float32)
    q_t = []
    for _ in range(2):
        q_t.append(dict(l1=rnd((hd, fd + 3 + 6 + action_dim)), b1=rnd((hd,), 0.01),
                        l2=rnd((hd, hd)), b2=rnd((hd,), 0.01),
                        l3=rnd((1, hd)), b3=rnd((1,), 0.01)))
    ref = dict(w1=w1_t, b1=b1_t, w2=w2_t, b2=b2_t, fc=fc_t, fcb=fcb_t,
               lng=lng_t, lnb=lnb_t, q=q_t)

    # ---- kernel layouts ---------------------------------------------------------
    p = {}
    # conv1: (nf, 27) with column k = (kh*3+kw)*3 + c; /255 folded; bf16.
    p["w1"] = (jnp.transpose(w1_t, (0, 2, 3, 1)).reshape(nf, 9 * c)
               / 255.0).astype(bf16)
    p["b1"] = b1_t.reshape(nf, 1)
    # conv2: per-tap (out, in) matrices, tap t = kh*3 + kw; bf16.
    p["w2"] = jnp.transpose(w2_t, (2, 3, 0, 1)).reshape(9, nf, nf).astype(bf16)
    p["b2"] = b2_t.reshape(nf, 1)
    # fc weight -> per-channel slabs (nf, fd, QLEN) in the wide stride-31 layout
    # (zeros on padding / out-of-range conv2 positions); bf16; used as NT matmul RHS.
    q = jnp.arange(QLEN)
    i2, j2 = q // H1, q % H1
    valid = (i2 < OUTD) & (j2 < OUTD)
    src = jnp.where(valid, i2 * OUTD + j2, 0)
    g = fc_t.reshape(fd, nf, OUTD * OUTD)[:, :, src]                # (fd, nf, QLEN)
    g = jnp.where(valid[None, None, :], g, 0.0)
    p["gt"] = jnp.transpose(g, (1, 0, 2)).astype(bf16)              # (nf, fd, QLEN)
    p["fcb"] = fcb_t.reshape(1, fd)
    p["lng"] = lng_t.reshape(1, fd)
    p["lnb"] = lnb_t.reshape(1, fd)
    # Q heads fused: layer-1 split into (feature | pose+action) blocks with the two
    # heads concatenated on the output dim; layers 2/3 block-diagonal.  f32.
    p["qw1f"] = jnp.concatenate([d["l1"][:, :fd].T for d in q_t], axis=1)   # (fd, 2hd)
    p["qw1pa"] = jnp.concatenate([d["l1"][:, fd:].T for d in q_t], axis=1)  # (9+A, 2hd)
    p["qb1"] = jnp.concatenate([d["b1"] for d in q_t]).reshape(1, 2 * hd)
    w2blk = jnp.zeros((2 * hd, 2 * hd), jnp.float32)
    w2blk = w2blk.at[:hd, :hd].set(q_t[0]["l2"].T).at[hd:, hd:].set(q_t[1]["l2"].T)
    p["qw2"] = w2blk
    p["qb2"] = jnp.concatenate([d["b2"] for d in q_t]).reshape(1, 2 * hd)
    w3blk = jnp.zeros((2 * hd, 2), jnp.float32)
    w3blk = w3blk.at[:hd, 0].set(q_t[0]["l3"][0]).at[hd:, 1].set(q_t[1]["l3"][0])
    p["qw3"] = w3blk
    p["qb3"] = jnp.concatenate([d["b3"] for d in q_t]).reshape(1, 2)
    return p, ref


# -----------------------------------------------------------------------------
# Pure-JAX reference (torch semantics) used only to validate the kernel.
# -----------------------------------------------------------------------------
def reference_forward(rp, obs, pose, action):
    hi = jax.lax.Precision.HIGHEST
    x = obs.astype(jnp.float32) / 255.0
    x = jax.lax.conv_general_dilated(x, rp["w1"], (2, 2), "VALID",
                                     dimension_numbers=("NCHW", "OIHW", "NCHW"),
                                     precision=hi)
    x = jnp.maximum(x + rp["b1"][None, :, None, None], 0.0)
    x = jax.lax.conv_general_dilated(x, rp["w2"], (1, 1), "VALID",
                                     dimension_numbers=("NCHW", "OIHW", "NCHW"),
                                     precision=hi)
    x = jnp.maximum(x + rp["b2"][None, :, None, None], 0.0)
    h = x.reshape(x.shape[0], -1)
    h = jnp.dot(h, rp["fc"].T, precision=hi) + rp["fcb"]
    mu = jnp.mean(h, -1, keepdims=True)
    var = jnp.mean((h - mu) ** 2, -1, keepdims=True)
    feat = (h - mu) * jax.lax.rsqrt(var + 1e-5) * rp["lng"] + rp["lnb"]
    outs = []
    for d in rp["q"]:
        z = jnp.concatenate([feat, pose, action], axis=1)
        z = jnp.maximum(jnp.dot(z, d["l1"].T, precision=hi) + d["b1"], 0.0)
        z = jnp.maximum(jnp.dot(z, d["l2"].T, precision=hi) + d["b2"], 0.0)
        outs.append(jnp.dot(z, d["l3"].T, precision=hi) + d["b3"])
    return outs[0], outs[1]


# -----------------------------------------------------------------------------
if __name__ == "__main__":
    key = jax.random.PRNGKey(0)
    kp, ko, kpose, kact = jax.random.split(key, 4)

    obs_shape = (3, 64, 64)
    action_dim, hidden_dim, feature_dim = 4, 32, 16
    batch = 2

    params, ref_params = init_params(kp, obs_shape, action_dim, hidden_dim,
                                     feature_dim, num_layers=2, num_filters=8)

    obs = jax.random.uniform(ko, (batch,) + obs_shape, jnp.float32, 0.0, 255.0)
    pose = jax.random.normal(kpose, (batch, 3 + 6), jnp.float32)
    action = jax.random.normal(kact, (batch, action_dim), jnp.float32)

    fwd = jax.jit(critic_forward)
    q1, q2 = fwd(params, obs, pose, action)
    jax.block_until_ready((q1, q2))

    # validate against the plain-JAX reference
    r1, r2 = jax.jit(reference_forward)(ref_params, obs, pose, action)
    err = max(float(jnp.max(jnp.abs(q1 - r1))), float(jnp.max(jnp.abs(q2 - r2))))

    assert q1.shape == (batch, 1) and q2.shape == (batch, 1)
    assert q1.dtype == jnp.float32 and q2.dtype == jnp.float32
    assert bool(jnp.all(jnp.isfinite(q1))) and bool(jnp.all(jnp.isfinite(q2)))
    assert err < 5e-2, f"kernel vs reference mismatch: {err:.3e}"
    print("KERNEL_OK")
</pallas_src>

<mosaic_0001>
module attributes {stable_mosaic.version = 11 : i64} {
  func.func @_critic_kernel(%arg0: i32, %arg1: memref<1x1x27x1152xbf16, #tpu.memory_space<vmem>>, %arg2: memref<1x1x13xf32, #tpu.memory_space<vmem>>, %arg3: memref<8x27xbf16, #tpu.memory_space<vmem>>, %arg4: memref<8x1xf32, #tpu.memory_space<vmem>>, %arg5: memref<9x8x8xbf16, #tpu.memory_space<vmem>>, %arg6: memref<8x1xf32, #tpu.memory_space<vmem>>, %arg7: memref<8x16x1024xbf16, #tpu.memory_space<vmem>>, %arg8: memref<1x16xf32, #tpu.memory_space<vmem>>, %arg9: memref<1x16xf32, #tpu.memory_space<vmem>>, %arg10: memref<1x16xf32, #tpu.memory_space<vmem>>, %arg11: memref<16x64xf32, #tpu.memory_space<vmem>>, %arg12: memref<13x64xf32, #tpu.memory_space<vmem>>, %arg13: memref<1x64xf32, #tpu.memory_space<vmem>>, %arg14: memref<64x64xf32, #tpu.memory_space<vmem>>, %arg15: memref<1x64xf32, #tpu.memory_space<vmem>>, %arg16: memref<64x2xf32, #tpu.memory_space<vmem>>, %arg17: memref<1x2xf32, #tpu.memory_space<vmem>>, %arg18: memref<1x1x2xf32, #tpu.memory_space<vmem>>, %arg19: memref<1x8x1024xbf16, #tpu.memory_space<vmem>>) attributes {dimension_semantics = [#tpu.dimension_semantics<parallel>], iteration_bounds = array<i64: 2>, scalar_prefetch = 0 : i64, scratch_operands = 1 : i64, tpu.core_type = #tpu.core_type<tc>, window_params = [{transform_indices = @transform_0, window_bounds = array<i64: 1, 1, 27, 1152>}, {transform_indices = @transform_1, window_bounds = array<i64: 1, 1, 13>}, {pipeline_mode = #tpu.pipeline_mode<synchronous>, transform_indices = @transform_2, window_bounds = array<i64: 8, 27>}, {pipeline_mode = #tpu.pipeline_mode<synchronous>, transform_indices = @transform_3, window_bounds = array<i64: 8, 1>}, {pipeline_mode = #tpu.pipeline_mode<synchronous>, transform_indices = @transform_4, window_bounds = array<i64: 9, 8, 8>}, {pipeline_mode = #tpu.pipeline_mode<synchronous>, transform_indices = @transform_5, window_bounds = array<i64: 8, 1>}, {pipeline_mode = #tpu.pipeline_mode<synchronous>, transform_indices = @transform_6, window_bounds = array<i64: 8, 16, 1024>}, {pipeline_mode = #tpu.pipeline_mode<synchronous>, transform_indices = @transform_7, window_bounds = array<i64: 1, 16>}, {pipeline_mode = #tpu.pipeline_mode<synchronous>, transform_indices = @transform_8, window_bounds = array<i64: 1, 16>}, {pipeline_mode = #tpu.pipeline_mode<synchronous>, transform_indices = @transform_9, window_bounds = array<i64: 1, 16>}, {pipeline_mode = #tpu.pipeline_mode<synchronous>, transform_indices = @transform_10, window_bounds = array<i64: 16, 64>}, {pipeline_mode = #tpu.pipeline_mode<synchronous>, transform_indices = @transform_11, window_bounds = array<i64: 13, 64>}, {pipeline_mode = #tpu.pipeline_mode<synchronous>, transform_indices = @transform_12, window_bounds = array<i64: 1, 64>}, {pipeline_mode = #tpu.pipeline_mode<synchronous>, transform_indices = @transform_13, window_bounds = array<i64: 64, 64>}, {pipeline_mode = #tpu.pipeline_mode<synchronous>, transform_indices = @transform_14, window_bounds = array<i64: 1, 64>}, {pipeline_mode = #tpu.pipeline_mode<synchronous>, transform_indices = @transform_15, window_bounds = array<i64: 64, 2>}, {pipeline_mode = #tpu.pipeline_mode<synchronous>, transform_indices = @transform_16, window_bounds = array<i64: 1, 2>}, {transform_indices = @transform_17, window_bounds = array<i64: 1, 1, 2>}]} {
    %c0 = arith.constant 0 : index
    %c0_0 = arith.constant 0 : index
    %0 = vector.load %arg3[%c0, %c0_0] : memref<8x27xbf16, #tpu.memory_space<vmem>>, vector<8x27xbf16>
    %c0_1 = arith.constant 0 : index
    %c0_2 = arith.constant 0 : index
    %1 = vector.load %arg4[%c0_1, %c0_2] : memref<8x1xf32, #tpu.memory_space<vmem>>, vector<8x1xf32>
    %c0_3 = arith.constant 0 : index
    %c0_4 = arith.constant 0 : index
    %2 = vector.load %arg6[%c0_3, %c0_4] : memref<8x1xf32, #tpu.memory_space<vmem>>, vector<8x1xf32>
    %c0_i32 = arith.constant 0 : i32
    %c0_5 = arith.constant 0 : index
    %3 = arith.index_cast %c0_i32 : i32 to index
    %c0_6 = arith.constant 0 : index
    %c0_7 = arith.constant 0 : index
    %4 = vector.load %arg1[%c0_5, %3, %c0_6, %c0_7] : memref<1x1x27x1152xbf16, #tpu.memory_space<vmem>>, vector<1x1x27x1152xbf16>
    %5 = vector.shape_cast %4 : vector<1x1x27x1152xbf16> to vector<27x1152xbf16>
    %cst = arith.constant dense<0.000000e+00> : vector<8x1152xf32>
    %6 = tpu.matmul %0, %5, %cst {dimension_numbers = #tpu.dot_dimension_numbers<[1], [0], [0], [1], [0, 0, 1, 1], [], []>} : vector<8x27xbf16>, vector<27x1152xbf16>, vector<8x1152xf32> -> vector<8x1152xf32>
    %7 = vector.broadcast %1 : vector<8x1xf32> to vector<8x1152xf32>
    %8 = arith.addf %6, %7 : vector<8x1152xf32>
    %cst_8 = arith.constant 0.000000e+00 : f32
    %9 = vector.broadcast %cst_8 : f32 to vector<8x1152xf32>
    %10 = arith.maximumf %8, %9 : vector<8x1152xf32>
    %11 = arith.truncf %10 : vector<8x1152xf32> to vector<8x1152xbf16>
    %cst_9 = arith.constant 0.000000e+00 : f32
    %12 = vector.broadcast %cst_9 : f32 to vector<8x1024xf32>
    %c0_10 = arith.constant 0 : index
    %c0_11 = arith.constant 0 : index
    %c0_12 = arith.constant 0 : index
    %13 = vector.load %arg5[%c0_10, %c0_11, %c0_12] : memref<9x8x8xbf16, #tpu.memory_space<vmem>>, vector<1x8x8xbf16>
    %14 = vector.shape_cast %13 : vector<1x8x8xbf16> to vector<8x8xbf16>
    %15 = vector.extract_strided_slice %11 {offsets = [0, 0], sizes = [8, 1024], strides = [1, 1]} : vector<8x1152xbf16> to vector<8x1024xbf16>
    %cst_13 = arith.constant dense<0.000000e+00> : vector<8x1024xf32>
    %16 = tpu.matmul %14, %15, %cst_13 {dimension_numbers = #tpu.dot_dimension_numbers<[1], [0], [0], [1], [0, 0, 1, 1], [], []>} : vector<8x8xbf16>, vector<8x1024xbf16>, vector<8x1024xf32> -> vector<8x1024xf32>
    %17 = arith.addf %12, %16 : vector<8x1024xf32>
    %c1 = arith.constant 1 : index
    %c0_14 = arith.constant 0 : index
    %c0_15 = arith.constant 0 : index
    %18 = vector.load %arg5[%c1, %c0_14, %c0_15] : memref<9x8x8xbf16, #tpu.memory_space<vmem>>, vector<1x8x8xbf16>
    %19 = vector.shape_cast %18 : vector<1x8x8xbf16> to vector<8x8xbf16>
    %20 = vector.extract_strided_slice %11 {offsets = [0, 1], sizes = [8, 1024], strides = [1, 1]} : vector<8x1152xbf16> to vector<8x1024xbf16>
    %cst_16 = arith.constant dense<0.000000e+00> : vector<8x1024xf32>
    %21 = tpu.matmul %19, %20, %cst_16 {dimension_numbers = #tpu.dot_dimension_numbers<[1], [0], [0], [1], [0, 0, 1, 1], [], []>} : vector<8x8xbf16>, vector<8x1024xbf16>, vector<8x1024xf32> -> vector<8x1024xf32>
    %22 = arith.addf %17, %21 : vector<8x1024xf32>
    %c2 = arith.constant 2 : index
    %c0_17 = arith.constant 0 : index
    %c0_18 = arith.constant 0 : index
    %23 = vector.load %arg5[%c2, %c0_17, %c0_18] : memref<9x8x8xbf16, #tpu.memory_space<vmem>>, vector<1x8x8xbf16>
    %24 = vector.shape_cast %23 : vector<1x8x8xbf16> to vector<8x8xbf16>
    %25 = vector.extract_strided_slice %11 {offsets = [0, 2], sizes = [8, 1024], strides = [1, 1]} : vector<8x1152xbf16> to vector<8x1024xbf16>
    %cst_19 = arith.constant dense<0.000000e+00> : vector<8x1024xf32>
    %26 = tpu.matmul %24, %25, %cst_19 {dimension_numbers = #tpu.dot_dimension_numbers<[1], [0], [0], [1], [0, 0, 1, 1], [], []>} : vector<8x8xbf16>, vector<8x1024xbf16>, vector<8x1024xf32> -> vector<8x1024xf32>
    %27 = arith.addf %22, %26 : vector<8x1024xf32>
    %c3 = arith.constant 3 : index
    %c0_20 = arith.constant 0 : index
    %c0_21 = arith.constant 0 : index
    %28 = vector.load %arg5[%c3, %c0_20, %c0_21] : memref<9x8x8xbf16, #tpu.memory_space<vmem>>, vector<1x8x8xbf16>
    %29 = vector.shape_cast %28 : vector<1x8x8xbf16> to vector<8x8xbf16>
    %30 = vector.extract_strided_slice %11 {offsets = [0, 31], sizes = [8, 1024], strides = [1, 1]} : vector<8x1152xbf16> to vector<8x1024xbf16>
    %cst_22 = arith.constant dense<0.000000e+00> : vector<8x1024xf32>
    %31 = tpu.matmul %29, %30, %cst_22 {dimension_numbers = #tpu.dot_dimension_numbers<[1], [0], [0], [1], [0, 0, 1, 1], [], []>} : vector<8x8xbf16>, vector<8x1024xbf16>, vector<8x1024xf32> -> vector<8x1024xf32>
    %32 = arith.addf %27, %31 : vector<8x1024xf32>
    %c4 = arith.constant 4 : index
    %c0_23 = arith.constant 0 : index
    %c0_24 = arith.constant 0 : index
    %33 = vector.load %arg5[%c4, %c0_23, %c0_24] : memref<9x8x8xbf16, #tpu.memory_space<vmem>>, vector<1x8x8xbf16>
    %34 = vector.shape_cast %33 : vector<1x8x8xbf16> to vector<8x8xbf16>
    %35 = vector.extract_strided_slice %11 {offsets = [0, 32], sizes = [8, 1024], strides = [1, 1]} : vector<8x1152xbf16> to vector<8x1024xbf16>
    %cst_25 = arith.constant dense<0.000000e+00> : vector<8x1024xf32>
    %36 = tpu.matmul %34, %35, %cst_25 {dimension_numbers = #tpu.dot_dimension_numbers<[1], [0], [0], [1], [0, 0, 1, 1], [], []>} : vector<8x8xbf16>, vector<8x1024xbf16>, vector<8x1024xf32> -> vector<8x1024xf32>
    %37 = arith.addf %32, %36 : vector<8x1024xf32>
    %c5 = arith.constant 5 : index
    %c0_26 = arith.constant 0 : index
    %c0_27 = arith.constant 0 : index
    %38 = vector.load %arg5[%c5, %c0_26, %c0_27] : memref<9x8x8xbf16, #tpu.memory_space<vmem>>, vector<1x8x8xbf16>
    %39 = vector.shape_cast %38 : vector<1x8x8xbf16> to vector<8x8xbf16>
    %40 = vector.extract_strided_slice %11 {offsets = [0, 33], sizes = [8, 1024], strides = [1, 1]} : vector<8x1152xbf16> to vector<8x1024xbf16>
    %cst_28 = arith.constant dense<0.000000e+00> : vector<8x1024xf32>
    %41 = tpu.matmul %39, %40, %cst_28 {dimension_numbers = #tpu.dot_dimension_numbers<[1], [0], [0], [1], [0, 0, 1, 1], [], []>} : vector<8x8xbf16>, vector<8x1024xbf16>, vector<8x1024xf32> -> vector<8x1024xf32>
    %42 = arith.addf %37, %41 : vector<8x1024xf32>
    %c6 = arith.constant 6 : index
    %c0_29 = arith.constant 0 : index
    %c0_30 = arith.constant 0 : index
    %43 = vector.load %arg5[%c6, %c0_29, %c0_30] : memref<9x8x8xbf16, #tpu.memory_space<vmem>>, vector<1x8x8xbf16>
    %44 = vector.shape_cast %43 : vector<1x8x8xbf16> to vector<8x8xbf16>
    %45 = vector.extract_strided_slice %11 {offsets = [0, 62], sizes = [8, 1024], strides = [1, 1]} : vector<8x1152xbf16> to vector<8x1024xbf16>
    %cst_31 = arith.constant dense<0.000000e+00> : vector<8x1024xf32>
    %46 = tpu.matmul %44, %45, %cst_31 {dimension_numbers = #tpu.dot_dimension_numbers<[1], [0], [0], [1], [0, 0, 1, 1], [], []>} : vector<8x8xbf16>, vector<8x1024xbf16>, vector<8x1024xf32> -> vector<8x1024xf32>
    %47 = arith.addf %42, %46 : vector<8x1024xf32>
    %c7 = arith.constant 7 : index
    %c0_32 = arith.constant 0 : index
    %c0_33 = arith.constant 0 : index
    %48 = vector.load %arg5[%c7, %c0_32, %c0_33] : memref<9x8x8xbf16, #tpu.memory_space<vmem>>, vector<1x8x8xbf16>
    %49 = vector.shape_cast %48 : vector<1x8x8xbf16> to vector<8x8xbf16>
    %50 = vector.extract_strided_slice %11 {offsets = [0, 63], sizes = [8, 1024], strides = [1, 1]} : vector<8x1152xbf16> to vector<8x1024xbf16>
    %cst_34 = arith.constant dense<0.000000e+00> : vector<8x1024xf32>
    %51 = tpu.matmul %49, %50, %cst_34 {dimension_numbers = #tpu.dot_dimension_numbers<[1], [0], [0], [1], [0, 0, 1, 1], [], []>} : vector<8x8xbf16>, vector<8x1024xbf16>, vector<8x1024xf32> -> vector<8x1024xf32>
    %52 = arith.addf %47, %51 : vector<8x1024xf32>
    %c8 = arith.constant 8 : index
    %c0_35 = arith.constant 0 : index
    %c0_36 = arith.constant 0 : index
    %53 = vector.load %arg5[%c8, %c0_35, %c0_36] : memref<9x8x8xbf16, #tpu.memory_space<vmem>>, vector<1x8x8xbf16>
    %54 = vector.shape_cast %53 : vector<1x8x8xbf16> to vector<8x8xbf16>
    %55 = vector.extract_strided_slice %11 {offsets = [0, 64], sizes = [8, 1024], strides = [1, 1]} : vector<8x1152xbf16> to vector<8x1024xbf16>
    %cst_37 = arith.constant dense<0.000000e+00> : vector<8x1024xf32>
    %56 = tpu.matmul %54, %55, %cst_37 {dimension_numbers = #tpu.dot_dimension_numbers<[1], [0], [0], [1], [0, 0, 1, 1], [], []>} : vector<8x8xbf16>, vector<8x1024xbf16>, vector<8x1024xf32> -> vector<8x1024xf32>
    %57 = arith.addf %52, %56 : vector<8x1024xf32>
    %58 = vector.broadcast %2 : vector<8x1xf32> to vector<8x1024xf32>
    %59 = arith.addf %57, %58 : vector<8x1024xf32>
    %cst_38 = arith.constant 0.000000e+00 : f32
    %60 = vector.broadcast %cst_38 : f32 to vector<8x1024xf32>
    %61 = arith.maximumf %59, %60 : vector<8x1024xf32>
    %62 = arith.truncf %61 : vector<8x1024xf32> to vector<8x1024xbf16>
    %63 = arith.index_cast %c0_i32 : i32 to index
    %c0_39 = arith.constant 0 : index
    %c0_40 = arith.constant 0 : index
    %64 = vector.load %arg19[%63, %c0_39, %c0_40] : memref<1x8x1024xbf16, #tpu.memory_space<vmem>>, vector<1x8x1024xbf16>
    %65 = vector.shape_cast %64 : vector<1x8x1024xbf16> to vector<8x1024xbf16>
    %66 = vector.shape_cast %62 : vector<8x1024xbf16> to vector<1x8x1024xbf16>
    tpu.vector_store %arg19[%63, %c0_39, %c0_40], %66 {strides = array<i32>} : memref<1x8x1024xbf16, #tpu.memory_space<vmem>>, vector<1x8x1024xbf16>,
    %c1_i32 = arith.constant 1 : i32
    %cst_41 = arith.constant 0.000000e+00 : f32
    %67 = vector.broadcast %cst_41 : f32 to vector<1x16xf32>
    %c0_42 = arith.constant 0 : index
    %c0_43 = arith.constant 0 : index
    %c0_44 = arith.constant 0 : index
    %68 = vector.load %arg19[%c0_42, %c0_43, %c0_44] : memref<1x8x1024xbf16, #tpu.memory_space<vmem>>, vector<1x1x1024xbf16>
    %69 = vector.shape_cast %68 : vector<1x1x1024xbf16> to vector<1x1024xbf16>
    %c0_45 = arith.constant 0 : index
    %c0_46 = arith.constant 0 : index
    %c0_47 = arith.constant 0 : index
    %70 = vector.load %arg7[%c0_45, %c0_46, %c0_47] : memref<8x16x1024xbf16, #tpu.memory_space<vmem>>, vector<1x16x1024xbf16>
    %71 = vector.shape_cast %70 : vector<1x16x1024xbf16> to vector<16x1024xbf16>
    %cst_48 = arith.constant dense<0.000000e+00> : vector<1x16xf32>
    %72 = tpu.matmul %69, %71, %cst_48 {dimension_numbers = #tpu.dot_dimension_numbers<[1], [1], [0], [0], [0, 0, 1, 0], [], []>} : vector<1x1024xbf16>, vector<16x1024xbf16>, vector<1x16xf32> -> vector<1x16xf32>
    %73 = arith.addf %67, %72 : vector<1x16xf32>
    %c0_49 = arith.constant 0 : index
    %c1_50 = arith.constant 1 : index
    %c0_51 = arith.constant 0 : index
    %74 = vector.load %arg19[%c0_49, %c1_50, %c0_51] : memref<1x8x1024xbf16, #tpu.memory_space<vmem>>, vector<1x1x1024xbf16>
    %75 = vector.shape_cast %74 : vector<1x1x1024xbf16> to vector<1x1024xbf16>
    %c1_52 = arith.constant 1 : index
    %c0_53 = arith.constant 0 : index
    %c0_54 = arith.constant 0 : index
    %76 = vector.load %arg7[%c1_52, %c0_53, %c0_54] : memref<8x16x1024xbf16, #tpu.memory_space<vmem>>, vector<1x16x1024xbf16>
    %77 = vector.shape_cast %76 : vector<1x16x1024xbf16> to vector<16x1024xbf16>
    %cst_55 = arith.constant dense<0.000000e+00> : vector<1x16xf32>
    %78 = tpu.matmul %75, %77, %cst_55 {dimension_numbers = #tpu.dot_dimension_numbers<[1], [1], [0], [0], [0, 0, 1, 0], [], []>} : vector<1x1024xbf16>, vector<16x1024xbf16>, vector<1x16xf32> -> vector<1x16xf32>
    %79 = arith.addf %73, %78 : vector<1x16xf32>
    %c0_56 = arith.constant 0 : index
    %c2_57 = arith.constant 2 : index
    %c0_58 = arith.constant 0 : index
    %80 = vector.load %arg19[%c0_56, %c2_57, %c0_58] : memref<1x8x1024xbf16, #tpu.memory_space<vmem>>, vector<1x1x1024xbf16>
    %81 = vector.shape_cast %80 : vector<1x1x1024xbf16> to vector<1x1024xbf16>
    %c2_59 = arith.constant 2 : index
    %c0_60 = arith.constant 0 : index
    %c0_61 = arith.constant 0 : index
    %82 = vector.load %arg7[%c2_59, %c0_60, %c0_61] : memref<8x16x1024xbf16, #tpu.memory_space<vmem>>, vector<1x16x1024xbf16>
    %83 = vector.shape_cast %82 : vector<1x16x1024xbf16> to vector<16x1024xbf16>
    %cst_62 = arith.constant dense<0.000000e+00> : vector<1x16xf32>
    %84 = tpu.matmul %81, %83, %cst_62 {dimension_numbers = #tpu.dot_dimension_numbers<[1], [1], [0], [0], [0, 0, 1, 0], [], []>} : vector<1x1024xbf16>, vector<16x1024xbf16>, vector<1x16xf32> -> vector<1x16xf32>
    %85 = arith.addf %79, %84 : vector<1x16xf32>
    %c0_63 = arith.constant 0 : index
    %c3_64 = arith.constant 3 : index
    %c0_65 = arith.constant 0 : index
    %86 = vector.load %arg19[%c0_63, %c3_64, %c0_65] : memref<1x8x1024xbf16, #tpu.memory_space<vmem>>, vector<1x1x1024xbf16>
    %87 = vector.shape_cast %86 : vector<1x1x1024xbf16> to vector<1x1024xbf16>
    %c3_66 = arith.constant 3 : index
    %c0_67 = arith.constant 0 : index
    %c0_68 = arith.constant 0 : index
    %88 = vector.load %arg7[%c3_66, %c0_67, %c0_68] : memref<8x16x1024xbf16, #tpu.memory_space<vmem>>, vector<1x16x1024xbf16>
    %89 = vector.shape_cast %88 : vector<1x16x1024xbf16> to vector<16x1024xbf16>
    %cst_69 = arith.constant dense<0.000000e+00> : vector<1x16xf32>
    %90 = tpu.matmul %87, %89, %cst_69 {dimension_numbers = #tpu.dot_dimension_numbers<[1], [1], [0], [0], [0, 0, 1, 0], [], []>} : vector<1x1024xbf16>, vector<16x1024xbf16>, vector<1x16xf32> -> vector<1x16xf32>
    %91 = arith.addf %85, %90 : vector<1x16xf32>
    %c0_70 = arith.constant 0 : index
    %c4_71 = arith.constant 4 : index
    %c0_72 = arith.constant 0 : index
    %92 = vector.load %arg19[%c0_70, %c4_71, %c0_72] : memref<1x8x1024xbf16, #tpu.memory_space<vmem>>, vector<1x1x1024xbf16>
    %93 = vector.shape_cast %92 : vector<1x1x1024xbf16> to vector<1x1024xbf16>
    %c4_73 = arith.constant 4 : index
    %c0_74 = arith.constant 0 : index
    %c0_75 = arith.constant 0 : index
    %94 = vector.load %arg7[%c4_73, %c0_74, %c0_75] : memref<8x16x1024xbf16, #tpu.memory_space<vmem>>, vector<1x16x1024xbf16>
    %95 = vector.shape_cast %94 : vector<1x16x1024xbf16> to vector<16x1024xbf16>
    %cst_76 = arith.constant dense<0.000000e+00> : vector<1x16xf32>
    %96 = tpu.matmul %93, %95, %cst_76 {dimension_numbers = #tpu.dot_dimension_numbers<[1], [1], [0], [0], [0, 0, 1, 0], [], []>} : vector<1x1024xbf16>, vector<16x1024xbf16>, vector<1x16xf32> -> vector<1x16xf32>
    %97 = arith.addf %91, %96 : vector<1x16xf32>
    %c0_77 = arith.constant 0 : index
    %c5_78 = arith.constant 5 : index
    %c0_79 = arith.constant 0 : index
    %98 = vector.load %arg19[%c0_77, %c5_78, %c0_79] : memref<1x8x1024xbf16, #tpu.memory_space<vmem>>, vector<1x1x1024xbf16>
    %99 = vector.shape_cast %98 : vector<1x1x1024xbf16> to vector<1x1024xbf16>
    %c5_80 = arith.constant 5 : index
    %c0_81 = arith.constant 0 : index
    %c0_82 = arith.constant 0 : index
    %100 = vector.load %arg7[%c5_80, %c0_81, %c0_82] : memref<8x16x1024xbf16, #tpu.memory_space<vmem>>, vector<1x16x1024xbf16>
    %101 = vector.shape_cast %100 : vector<1x16x1024xbf16> to vector<16x1024xbf16>
    %cst_83 = arith.constant dense<0.000000e+00> : vector<1x16xf32>
    %102 = tpu.matmul %99, %101, %cst_83 {dimension_numbers = #tpu.dot_dimension_numbers<[1], [1], [0], [0], [0, 0, 1, 0], [], []>} : vector<1x1024xbf16>, vector<16x1024xbf16>, vector<1x16xf32> -> vector<1x16xf32>
    %103 = arith.addf %97, %102 : vector<1x16xf32>
    %c0_84 = arith.constant 0 : index
    %c6_85 = arith.constant 6 : index
    %c0_86 = arith.constant 0 : index
    %104 = vector.load %arg19[%c0_84, %c6_85, %c0_86] : memref<1x8x1024xbf16, #tpu.memory_space<vmem>>, vector<1x1x1024xbf16>
    %105 = vector.shape_cast %104 : vector<1x1x1024xbf16> to vector<1x1024xbf16>
    %c6_87 = arith.constant 6 : index
    %c0_88 = arith.constant 0 : index
    %c0_89 = arith.constant 0 : index
    %106 = vector.load %arg7[%c6_87, %c0_88, %c0_89] : memref<8x16x1024xbf16, #tpu.memory_space<vmem>>, vector<1x16x1024xbf16>
    %107 = vector.shape_cast %106 : vector<1x16x1024xbf16> to vector<16x1024xbf16>
    %cst_90 = arith.constant dense<0.000000e+00> : vector<1x16xf32>
    %108 = tpu.matmul %105, %107, %cst_90 {dimension_numbers = #tpu.dot_dimension_numbers<[1], [1], [0], [0], [0, 0, 1, 0], [], []>} : vector<1x1024xbf16>, vector<16x1024xbf16>, vector<1x16xf32> -> vector<1x16xf32>
    %109 = arith.addf %103, %108 : vector<1x16xf32>
    %c0_91 = arith.constant 0 : index
    %c7_92 = arith.constant 7 : index
    %c0_93 = arith.constant 0 : index
    %110 = vector.load %arg19[%c0_91, %c7_92, %c0_93] : memref<1x8x1024xbf16, #tpu.memory_space<vmem>>, vector<1x1x1024xbf16>
    %111 = vector.shape_cast %110 : vector<1x1x1024xbf16> to vector<1x1024xbf16>
    %c7_94 = arith.constant 7 : index
    %c0_95 = arith.constant 0 : index
    %c0_96 = arith.constant 0 : index
    %112 = vector.load %arg7[%c7_94, %c0_95, %c0_96] : memref<8x16x1024xbf16, #tpu.memory_space<vmem>>, vector<1x16x1024xbf16>
    %113 = vector.shape_cast %112 : vector<1x16x1024xbf16> to vector<16x1024xbf16>
    %cst_97 = arith.constant dense<0.000000e+00> : vector<1x16xf32>
    %114 = tpu.matmul %111, %113, %cst_97 {dimension_numbers = #tpu.dot_dimension_numbers<[1], [1], [0], [0], [0, 0, 1, 0], [], []>} : vector<1x1024xbf16>, vector<16x1024xbf16>, vector<1x16xf32> -> vector<1x16xf32>
    %115 = arith.addf %109, %114 : vector<1x16xf32>
    %c0_98 = arith.constant 0 : index
    %c0_99 = arith.constant 0 : index
    %116 = vector.load %arg8[%c0_98, %c0_99] : memref<1x16xf32, #tpu.memory_space<vmem>>, vector<1x16xf32>
    %117 = arith.addf %115, %116 : vector<1x16xf32>
    %cst_100 = arith.constant dense<0.000000e+00> : vector<1xf32>
    %118 = vector.multi_reduction <add>, %117, %cst_100 [1] : vector<1x16xf32> to vector<1xf32>
    %119 = vector.shape_cast %118 : vector<1xf32> to vector<1x1xf32>
    %cst_101 = arith.constant 1.600000e+01 : f32
    %120 = vector.broadcast %cst_101 : f32 to vector<1x1xf32>
    %121 = arith.divf %119, %120 : vector<1x1xf32>
    %122 = vector.broadcast %121 : vector<1x1xf32> to vector<1x16xf32>
    %123 = arith.subf %117, %122 : vector<1x16xf32>
    %124 = arith.mulf %123, %123 : vector<1x16xf32>
    %cst_102 = arith.constant dense<0.000000e+00> : vector<1xf32>
    %125 = vector.multi_reduction <add>, %124, %cst_102 [1] : vector<1x16xf32> to vector<1xf32>
    %126 = vector.shape_cast %125 : vector<1xf32> to vector<1x1xf32>
    %cst_103 = arith.constant 1.600000e+01 : f32
    %127 = vector.broadcast %cst_103 : f32 to vector<1x1xf32>
    %128 = arith.divf %126, %127 : vector<1x1xf32>
    %cst_104 = arith.constant 9.99999974E-6 : f32
    %129 = vector.broadcast %cst_104 : f32 to vector<1x1xf32>
    %130 = arith.addf %128, %129 : vector<1x1xf32>
    %131 = math.rsqrt %130 : vector<1x1xf32>
    %132 = vector.broadcast %131 : vector<1x1xf32> to vector<1x16xf32>
    %133 = arith.mulf %123, %132 : vector<1x16xf32>
    %c0_105 = arith.constant 0 : index
    %c0_106 = arith.constant 0 : index
    %134 = vector.load %arg9[%c0_105, %c0_106] : memref<1x16xf32, #tpu.memory_space<vmem>>, vector<1x16xf32>
    %135 = arith.mulf %133, %134 : vector<1x16xf32>
    %c0_107 = arith.constant 0 : index
    %c0_108 = arith.constant 0 : index
    %136 = vector.load %arg10[%c0_107, %c0_108] : memref<1x16xf32, #tpu.memory_space<vmem>>, vector<1x16xf32>
    %137 = arith.addf %135, %136 : vector<1x16xf32>
    %c0_109 = arith.constant 0 : index
    %c0_110 = arith.constant 0 : index
    %c0_111 = arith.constant 0 : index
    %138 = vector.load %arg2[%c0_109, %c0_110, %c0_111] : memref<1x1x13xf32, #tpu.memory_space<vmem>>, vector<1x1x13xf32>
    %139 = vector.shape_cast %138 : vector<1x1x13xf32> to vector<1x13xf32>
    %c0_112 = arith.constant 0 : index
    %c0_113 = arith.constant 0 : index
    %140 = vector.load %arg11[%c0_112, %c0_113] : memref<16x64xf32, #tpu.memory_space<vmem>>, vector<16x64xf32>
    %cst_114 = arith.constant dense<0.000000e+00> : vector<1x64xf32>
    %141 = tpu.matmul %137, %140, %cst_114 {dimension_numbers = #tpu.dot_dimension_numbers<[1], [0], [0], [1], [0, 0, 1, 1], [], []>} : vector<1x16xf32>, vector<16x64xf32>, vector<1x64xf32> -> vector<1x64xf32>
    %c0_115 = arith.constant 0 : index
    %c0_116 = arith.constant 0 : index
    %142 = vector.load %arg12[%c0_115, %c0_116] : memref<13x64xf32, #tpu.memory_space<vmem>>, vector<13x64xf32>
    %cst_117 = arith.constant dense<0.000000e+00> : vector<1x64xf32>
    %143 = tpu.matmul %139, %142, %cst_117 {dimension_numbers = #tpu.dot_dimension_numbers<[1], [0], [0], [1], [0, 0, 1, 1], [], []>} : vector<1x13xf32>, vector<13x64xf32>, vector<1x64xf32> -> vector<1x64xf32>
    %144 = arith.addf %141, %143 : vector<1x64xf32>
    %c0_118 = arith.constant 0 : index
    %c0_119 = arith.constant 0 : index
    %145 = vector.load %arg13[%c0_118, %c0_119] : memref<1x64xf32, #tpu.memory_space<vmem>>, vector<1x64xf32>
    %146 = arith.addf %144, %145 : vector<1x64xf32>
    %cst_120 = arith.constant 0.000000e+00 : f32
    %147 = vector.broadcast %cst_120 : f32 to vector<1x64xf32>
    %148 = arith.maximumf %146, %147 : vector<1x64xf32>
    %c0_121 = arith.constant 0 : index
    %c0_122 = arith.constant 0 : index
    %149 = vector.load %arg14[%c0_121, %c0_122] : memref<64x64xf32, #tpu.memory_space<vmem>>, vector<64x64xf32>
    %cst_123 = arith.constant dense<0.000000e+00> : vector<1x64xf32>
    %150 = tpu.matmul %148, %149, %cst_123 {dimension_numbers = #tpu.dot_dimension_numbers<[1], [0], [0], [1], [0, 0, 1, 1], [], []>} : vector<1x64xf32>, vector<64x64xf32>, vector<1x64xf32> -> vector<1x64xf32>
    %c0_124 = arith.constant 0 : index
    %c0_125 = arith.constant 0 : index
    %151 = vector.load %arg15[%c0_124, %c0_125] : memref<1x64xf32, #tpu.memory_space<vmem>>, vector<1x64xf32>
    %152 = arith.addf %150, %151 : vector<1x64xf32>
    %cst_126 = arith.constant 0.000000e+00 : f32
    %153 = vector.broadcast %cst_126 : f32 to vector<1x64xf32>
    %154 = arith.maximumf %152, %153 : vector<1x64xf32>
    %c0_127 = arith.constant 0 : index
    %c0_128 = arith.constant 0 : index
    %155 = vector.load %arg16[%c0_127, %c0_128] : memref<64x2xf32, #tpu.memory_space<vmem>>, vector<64x2xf32>
    %cst_129 = arith.constant dense<0.000000e+00> : vector<1x2xf32>
    %156 = tpu.matmul %154, %155, %cst_129 {dimension_numbers = #tpu.dot_dimension_numbers<[1], [0], [0], [1], [0, 0, 1, 1], [], []>} : vector<1x64xf32>, vector<64x2xf32>, vector<1x2xf32> -> vector<1x2xf32>
    %c0_130 = arith.constant 0 : index
    %c0_131 = arith.constant 0 : index
    %157 = vector.load %arg17[%c0_130, %c0_131] : memref<1x2xf32, #tpu.memory_space<vmem>>, vector<1x2xf32>
    %158 = arith.addf %156, %157 : vector<1x2xf32>
    %c0_132 = arith.constant 0 : index
    %c0_133 = arith.constant 0 : index
    %c0_134 = arith.constant 0 : index
    %159 = vector.load %arg18[%c0_132, %c0_133, %c0_134] : memref<1x1x2xf32, #tpu.memory_space<vmem>>, vector<1x1x2xf32>
    %160 = vector.shape_cast %159 : vector<1x1x2xf32> to vector<1x2xf32>
    %161 = vector.shape_cast %158 : vector<1x2xf32> to vector<1x1x2xf32>
    tpu.vector_store %arg18[%c0_132, %c0_133, %c0_134], %161 {strides = array<i32>} : memref<1x1x2xf32, #tpu.memory_space<vmem>>, vector<1x1x2xf32>,
    return
  }
  func.func @transform_0(%arg0: i32) -> (i32, i32, i32, i32) {
    %c0_i32 = arith.constant 0 : i32
    %c0_i32_0 = arith.constant 0 : i32
    %c0_i32_1 = arith.constant 0 : i32
    %c0_i32_2 = arith.constant 0 : i32
    return %arg0, %c0_i32, %c0_i32_0, %c0_i32_1 : i32, i32, i32, i32
  }
  func.func @transform_1(%arg0: i32) -> (i32, i32, i32) {
    %c0_i32 = arith.constant 0 : i32
    %c0_i32_0 = arith.constant 0 : i32
    %c0_i32_1 = arith.constant 0 : i32
    return %arg0, %c0_i32, %c0_i32_0 : i32, i32, i32
  }
  func.func @transform_2(%arg0: i32) -> (i32, i32) {
    %c0_i32 = arith.constant 0 : i32
    %c0_i32_0 = arith.constant 0 : i32
    %c0_i32_1 = arith.constant 0 : i32
    return %c0_i32, %c0_i32_0 : i32, i32
  }
  func.func @transform_3(%arg0: i32) -> (i32, i32) {
    %c0_i32 = arith.constant 0 : i32
    %c0_i32_0 = arith.constant 0 : i32
    %c0_i32_1 = arith.constant 0 : i32
    return %c0_i32, %c0_i32_0 : i32, i32
  }
  func.func @transform_4(%arg0: i32) -> (i32, i32, i32) {
    %c0_i32 = arith.constant 0 : i32
    %c0_i32_0 = arith.constant 0 : i32
    %c0_i32_1 = arith.constant 0 : i32
    %c0_i32_2 = arith.constant 0 : i32
    return %c0_i32, %c0_i32_0, %c0_i32_1 : i32, i32, i32
  }
  func.func @transform_5(%arg0: i32) -> (i32, i32) {
    %c0_i32 = arith.constant 0 : i32
    %c0_i32_0 = arith.constant 0 : i32
    %c0_i32_1 = arith.constant 0 : i32
    return %c0_i32, %c0_i32_0 : i32, i32
  }
  func.func @transform_6(%arg0: i32) -> (i32, i32, i32) {
    %c0_i32 = arith.constant 0 : i32
    %c0_i32_0 = arith.constant 0 : i32
    %c0_i32_1 = arith.constant 0 : i32
    %c0_i32_2 = arith.constant 0 : i32
    return %c0_i32, %c0_i32_0, %c0_i32_1 : i32, i32, i32
  }
  func.func @transform_7(%arg0: i32) -> (i32, i32) {
    %c0_i32 = arith.constant 0 : i32
    %c0_i32_0 = arith.constant 0 : i32
    %c0_i32_1 = arith.constant 0 : i32
    return %c0_i32, %c0_i32_0 : i32, i32
  }
  func.func @transform_8(%arg0: i32) -> (i32, i32) {
    %c0_i32 = arith.constant 0 : i32
    %c0_i32_0 = arith.constant 0 : i32
    %c0_i32_1 = arith.constant 0 : i32
    return %c0_i32, %c0_i32_0 : i32, i32
  }
  func.func @transform_9(%arg0: i32) -> (i32, i32) {
    %c0_i32 = arith.constant 0 : i32
    %c0_i32_0 = arith.constant 0 : i32
    %c0_i32_1 = arith.constant 0 : i32
    return %c0_i32, %c0_i32_0 : i32, i32
  }
  func.func @transform_10(%arg0: i32) -> (i32, i32) {
    %c0_i32 = arith.constant 0 : i32
    %c0_i32_0 = arith.constant 0 : i32
    %c0_i32_1 = arith.constant 0 : i32
    return %c0_i32, %c0_i32_0 : i32, i32
  }
  func.func @transform_11(%arg0: i32) -> (i32, i32) {
    %c0_i32 = arith.constant 0 : i32
    %c0_i32_0 = arith.constant 0 : i32
    %c0_i32_1 = arith.constant 0 : i32
    return %c0_i32, %c0_i32_0 : i32, i32
  }
  func.func @transform_12(%arg0: i32) -> (i32, i32) {
    %c0_i32 = arith.constant 0 : i32
    %c0_i32_0 = arith.constant 0 : i32
    %c0_i32_1 = arith.constant 0 : i32
    return %c0_i32, %c0_i32_0 : i32, i32
  }
  func.func @transform_13(%arg0: i32) -> (i32, i32) {
    %c0_i32 = arith.constant 0 : i32
    %c0_i32_0 = arith.constant 0 : i32
    %c0_i32_1 = arith.constant 0 : i32
    return %c0_i32, %c0_i32_0 : i32, i32
  }
  func.func @transform_14(%arg0: i32) -> (i32, i32) {
    %c0_i32 = arith.constant 0 : i32
    %c0_i32_0 = arith.constant 0 : i32
    %c0_i32_1 = arith.constant 0 : i32
    return %c0_i32, %c0_i32_0 : i32, i32
  }
  func.func @transform_15(%arg0: i32) -> (i32, i32) {
    %c0_i32 = arith.constant 0 : i32
    %c0_i32_0 = arith.constant 0 : i32
    %c0_i32_1 = arith.constant 0 : i32
    return %c0_i32, %c0_i32_0 : i32, i32
  }
  func.func @transform_16(%arg0: i32) -> (i32, i32) {
    %c0_i32 = arith.constant 0 : i32
    %c0_i32_0 = arith.constant 0 : i32
    %c0_i32_1 = arith.constant 0 : i32
    return %c0_i32, %c0_i32_0 : i32, i32
  }
  func.func @transform_17(%arg0: i32) -> (i32, i32, i32) {
    %c0_i32 = arith.constant 0 : i32
    %c0_i32_0 = arith.constant 0 : i32
    %c0_i32_1 = arith.constant 0 : i32
    return %arg0, %c0_i32, %c0_i32_0 : i32, i32, i32
  }
}

</mosaic_0001>

<bundles_post_ra>
// kernel: critic_forward.1
= control target key start
LH: loop header
LB: loop body
LE: loop exit
PB: predicated region body
PF: predicated region fallthrough
CT: control target
= control target key end

     0   :  { %s4814_s24 = smov 0   ;;  %s6018_s0 = inlined_call_operand.vmem [shape: bf16[2,1,27,1152], index: 0, kind: input, shape index: {}]   ;;  %s6019_s1 = inlined_call_operand.vmem [shape: f32[2,1,13], index: 1, kind: input, shape index: {}]   ;;  %s6020_s2 = inlined_call_operand.vmem [shape: bf16[8,27], index: 2, kind: input, shape index: {}]   ;;  %s6021_s3 = inlined_call_operand.vmem [shape: f32[8,1], index: 3, kind: input, shape index: {}]   ;;  %s6022_s4 = inlined_call_operand.vmem [shape: bf16[9,8,8], index: 4, kind: input, shape index: {}]   ;;  %s6023_s5 = inlined_call_operand.vmem [shape: f32[8,1], index: 5, kind: input, shape index: {}]   ;;  %s6024_s6 = inlined_call_operand.vmem [shape: bf16[8,16,1024], index: 6, kind: input, shape index: {}]   ;;  %s6025_s7 = inlined_call_operand.vmem [shape: f32[1,16], index: 7, kind: input, shape index: {}]   ;;  %s6026_s8 = inlined_call_operand.vmem [shape: f32[1,16], index: 8, kind: input, shape index: {}]   ;;  %s6027_s9 = inlined_call_operand.vmem [shape: f32[1,16], index: 9, kind: input, shape index: {}]   ;;  %s6028_s10 = inlined_call_operand.vmem [shape: f32[16,64], index: 10, kind: input, shape index: {}]   ;;  %s6029_s11 = inlined_call_operand.vmem [shape: f32[13,64], index: 11, kind: input, shape index: {}]   ;;  %s6030_s12 = inlined_call_operand.vmem [shape: f32[1,64], index: 12, kind: input, shape index: {}]   ;;  %s6031_s13 = inlined_call_operand.vmem [shape: f32[64,64], index: 13, kind: input, shape index: {}]   ;;  %s6032_s14 = inlined_call_operand.vmem [shape: f32[1,64], index: 14, kind: input, shape index: {}]   ;;  %s6033_s15 = inlined_call_operand.vmem [shape: f32[64,2], index: 15, kind: input, shape index: {}]   ;;  %s6034_s16 = inlined_call_operand.vmem [shape: f32[1,2], index: 16, kind: input, shape index: {}]   ;;  %s6035_s17 = inlined_call_operand.vmem [shape: f32[2,1,2], index: 17, kind: output, shape index: {}]  }
   0x1   :  { %6036 = sst [smem:[#allocation3_spill]] %s6018_s0 }
   0x2   :  { %6037 = sst [smem:[#allocation4_spill]] %s6019_s1 }
   0x3 LB: > { %s4111_s25 = sadd.s32 4294967295, %s4711_s24   ;;  %p4115_p0 = scmp.ge.s32.totalorder %s4711_s24, 1  ;;  %s4711_s24 = sphi %s4814_s24, %s27_s24  }
   0x4   : > { %p495_p1 = scmp.lt.s32.totalorder %s4711_s24, 3 }
   0x6   : > { %p496_p2 = pnand %p4115_p0, %p495_p1 }
   0x7   : > { %p548_p3 = scmp.lt.s32.totalorder (!%p496_p2), %s4111_s25, 1  ;;  %s6038_s30 = sld [smem:[#allocation3_spill]] (!%p496_p2) }
   0x8   : > { %499 = sbr.rel (%p496_p2) target bundleno = 1764 (0x6e4), region = 88  ;;  %s4715_s20 = smov (!%p496_p2), 127  }
   0x9   : > { %s4716_s21 = smov (!%p496_p2), 126   ;;  %s4717_s22 = smov (!%p496_p2), 97  }
   0xa   : > { %s4718_s23 = smov (!%p496_p2), 96   ;;  %s4719_s26 = smov (!%p496_p2), 95  }
   0xb   : > { %s4720_s29 = smov (!%p496_p2), 66   ;;  %s4721_s0 = smov (!%p496_p2), 65  }
   0xc   : > { %s4722_s19 = smov (!%p496_p2), 64  }
   0xd   : > { %vm675_vm0 = vcmask 1044480   ;;  %v561_v0 = vld [vmem:[%s6021_s3] sm:$0xff]  ;;  %s6041_s25 = smov (!%p548_p3, %s4111_s25), 1  ;;  %v4713_v1 = vmov 0   ;;  %vm676_vm1 = vcmask 1045504   ;;  %v4714_v2 = vmov 65535  }
   0xe   : > { %4699 = vset.pattern.permute.xlu0 %v4713_v1  ;;  %4700 = vset.pattern.permute.xlu1 %v4713_v1  ;;  %v677_v3 = vsel %vm675_vm0, 4294967295, %v4714_v2  ;;  %s4679_s28 = smul.u32 144, %s6041_s25  ;;  %v560_v43 = vld [vmem:[%s6020_s2] sm:$0xf]  ;;  %vm671_vm2 = vcmask 220160   ;;  %vm881_vm3 = vcmask 1039360  }
   0xf   : > { %585 = vperm.xlu0 %4699, %v561_v0   ;;  %v4834_v4 = vsel %vm676_vm1, %v677_v3, 0  ;;  %vm894_vm4 = vcmask 1043456   ;;  %vm890_vm5 = vcmask 64512   ;;  %vm1174_vm6 = vcmask 1031168  }
  0x10   : > { %s4832_s18 = scalar_lea.vmem %s6038_s30, %s4679_s28  ;;  %vm1342_vm7 = vcmask 793600   ;;  %vm1510_vm8 = vcmask 785408   ;;  %vm1678_vm9 = vcmask 777216   ;;  %vm1846_vm10 = vcmask 539648   ;;  %s6039_s28 = sld [smem:[#allocation4_spill]] }
  0x11   : > { %v4155_v5 = vld [vmem:[%s4832_s18 + $0x48] sm:$0xf]  ;;  %v4610_v6 = vld [vmem:[%s4832_s18 + $0x68] sm:$0x30]  ;;  %v4157_v9 = vld [vmem:[%s4832_s18 + $0x6c] sm:$0x30] }
  0x12   : > { %v4606_v7 = vld [vmem:[%s4832_s18 + $0x4c] sm:$0xf]  ;;  %v4156_v8 = vor.u32 %v4610_v6, %v4155_v5  ;;  %v4163_v10 = vld [vmem:[%s4832_s18 + $0x50] sm:$0xf]  ;;  %v4611_v11 = vld [vmem:[%s4832_s18 + $0x70] sm:$0x30] }
  0x13   : > { %v4160_v12 = vor.u32 %v4606_v7, %v4157_v9  ;;  %v4164_v13 = vor.u32 %v4611_v11, %v4163_v10  ;;  %v4607_v14 = vld [vmem:[%s4832_s18 + $0x54] sm:$0xf]  ;;  %v4165_v15 = vld [vmem:[%s4832_s18 + $0x74] sm:$0x30]  ;;  %v4119_v16 = vld [vmem:[%s4832_s18] sm:$0xf] }
  0x14   : > { %v680_v17 = vand.u32 %v4156_v8, %v4834_v4  ;;  %v4168_v18 = vor.u32 %v4607_v14, %v4165_v15  ;;  %v4601_v19 = vld [vmem:[%s4832_s18 + $0x20] sm:$0xf0]  ;;  %v4121_v21 = vld [vmem:[%s4832_s18 + $0x24] sm:$0xf0]  ;;  %v4602_v25 = vld [vmem:[%s4832_s18 + $0x28] sm:$0xf0] }
  0x15   : > { %v4597_v20 = vld [vmem:[%s4832_s18 + $0x4] sm:$0xf]  ;;  %v683_v22 = vand.u32 %v4160_v12, %v4834_v4  ;;  %v686_v23 = vand.u32 %v4164_v13, %v4834_v4  ;;  %v4127_v24 = vld [vmem:[%s4832_s18 + $0x8] sm:$0xf]  ;;  %v4598_v26 = vld [vmem:[%s4832_s18 + $0xc] sm:$0xf]  ;;  %v4120_v28 = vor.u32 %v4601_v19, %v4119_v16 }
  0x16   : > { %712 = vmatpush.bf16.msra.mxu0 %v680_v17  ;;  %v689_v27 = vand.u32 %v4168_v18, %v4834_v4  ;;  %v4129_v29 = vld [vmem:[%s4832_s18 + $0x2c] sm:$0xf0]  ;;  %v4171_v30 = vld [vmem:[%s4832_s18 + $0x58] sm:$0xf]  ;;  %v4612_v31 = vld [vmem:[%s4832_s18 + $0x78] sm:$0x30]  ;;  %v4124_v32 = vor.u32 %v4597_v20, %v4121_v21  ;;  %v4128_v33 = vor.u32 %v4602_v25, %v4127_v24 }
  0x17   : > { %725 = vmatpush.bf16.msra.mxu1 %v683_v22  ;;  %738 = vmatpush.bf16.msra.mxu2 %v686_v23  ;;  %v4172_v34 = vor.u32 %v4612_v31, %v4171_v30  ;;  %v4608_v35 = vld [vmem:[%s4832_s18 + $0x5c] sm:$0xf]  ;;  %v4173_v36 = vld [vmem:[%s4832_s18 + $0x7c] sm:$0x30]  ;;  %v4132_v38 = vor.u32 %v4598_v26, %v4129_v29  ;;  %v4613_v40 = vld [vmem:[%s4832_s18 + $0x80] sm:$0x30] }
  0x18   : > { %v4179_v37 = vld [vmem:[%s4832_s18 + $0x60] sm:$0xf]  ;;  %751 = vmatpush.bf16.msra.mxu3 %v689_v27  ;;  %v4176_v39 = vor.u32 %v4608_v35, %v4173_v36  ;;  %v4609_v41 = vld [vmem:[%s4832_s18 + $0x64] sm:$0xf]  ;;  %v4181_v42 = vld [vmem:[%s4832_s18 + $0x84] sm:$0x30] }
  0x19   : > { %v692_v44 = vand.u32 %v4172_v34, %v4834_v4  ;;  %v4180_v45 = vor.u32 %v4613_v40, %v4179_v37  ;;  %v4184_v46 = vor.u32 %v4609_v41, %v4181_v42  ;;  %v4135_v47 = vld [vmem:[%s4832_s18 + $0x10] sm:$0xf]  ;;  %v4603_v48 = vld [vmem:[%s4832_s18 + $0x30] sm:$0xf0]  ;;  %v4137_v51 = vld [vmem:[%s4832_s18 + $0x34] sm:$0xf0] }
  0x1a   : > { %713 = vmatpush.bf16.msra.mxu0 %v4120_v28  ;;  %v695_v49 = vand.u32 %v4176_v39, %v4834_v4  ;;  %v4599_v50 = vld [vmem:[%s4832_s18 + $0x14] sm:$0xf]  ;;  %v4187_v53 = vld [vmem:[%s4832_s18 + $0x68] sm:$0xf]  ;;  %v4136_v55 = vor.u32 %v4603_v48, %v4135_v47  ;;  %v4143_v56 = vld [vmem:[%s4832_s18 + $0x18] sm:$0xf] }
  0x1b   : > { %726 = vmatpush.bf16.msra.mxu1 %v4124_v32  ;;  %739 = vmatpush.bf16.msra.mxu2 %v4128_v33  ;;  %v698_v52 = vand.u32 %v4180_v45, %v4834_v4  ;;  %v701_v54 = vand.u32 %v4184_v46, %v4834_v4  ;;  %v4604_v57 = vld [vmem:[%s4832_s18 + $0x38] sm:$0xf0]  ;;  %v4614_v58 = vld [vmem:[%s4832_s18 + $0x88] sm:$0x30]  ;;  %v4140_v59 = vor.u32 %v4599_v50, %v4137_v51  ;;  %v4145_v61 = vld [vmem:[%s4832_s18 + $0x3c] sm:$0xf0] }
  0x1c   : > { %752 = vmatpush.bf16.msra.mxu3 %v4132_v38  ;;  %v4600_v60 = vld [vmem:[%s4832_s18 + $0x1c] sm:$0xf]  ;;  %v4188_v62 = vor.u32 %v4614_v58, %v4187_v53  ;;  %v4151_v63 = vld [vmem:[%s4832_s18 + $0x20] sm:$0xf]  ;;  %v4605_v0 = vld [vmem:[%s4832_s18 + $0x40] sm:$0xf0]  ;;  %v4144_v1 = vor.u32 %v4604_v57, %v4143_v56 }
  0x1d   : > { %4189 = vmatmul.msk.bf16.vlgmr.msra.gmra.mxu0 %vm671_vm2, %v560_v43  ;;  %v4148_v3 = vor.u32 %v4600_v60, %v4145_v61  ;;  %v4152_v5 = vor.u32 %v4605_v0, %v4151_v63  ;;  %vm2014_vm11 = vcmask 531456   ;;  %vm2182_vm12 = vcmask 523264  }
  0x1e   : > { %764 = vmatpush.bf16.msrb.mxu0 %v692_v44  ;;  %4190 = vmatmul.msk.bf16.vlgmr.msra.gmra.mxu1 %vm671_vm2, %v560_v43  ;;  %v704_v2 = vand.u32 %v4188_v62, %v4834_v4  ;;  %vm3894_vm13 = vcmask 122880   ;;  %vm3933_vm15 = vcmask 105472  }
  0x1f   : > { %777 = vmatpush.bf16.msrb.mxu1 %v695_v49  ;;  %4191 = vmatmul.msk.bf16.vlgmr.msra.gmra.mxu2 %vm671_vm2, %v560_v43 }
  0x20   : > { %4192 = vmatmul.msk.bf16.vlgmr.msra.gmra.mxu3 %vm671_vm2, %v560_v43  ;;  %790 = vmatpush.bf16.msrb.mxu2 %v698_v52 }
  0x21   : > { %803 = vmatpush.bf16.msrb.mxu3 %v701_v54 }
  0x22   : > { %765 = vmatpush.bf16.msrb.mxu0 %v4136_v55 }
  0x23   : > { %778 = vmatpush.bf16.msrb.mxu1 %v4140_v59 }
  0x24   : > { %791 = vmatpush.bf16.msrb.mxu2 %v4144_v1 }
  0x25   : > { %804 = vmatpush.bf16.msrb.mxu3 %v4148_v3 }
  0x26   : > { %816 = vmatpush.bf16.msra.mxu0 %v704_v2 }
  0x2a   : > { %817 = vmatpush.bf16.msra.mxu0 %v4152_v5 }
  0x2d   : > { %4193 = vmatmul.msk.bf16.vlgmr.msrb.gmra.mxu0 %vm671_vm2, %v560_v43 }
  0x2e   : > { %4194 = vmatmul.msk.bf16.vlgmr.msrb.gmra.mxu1 %vm671_vm2, %v560_v43 }
  0x2f   : > { %4195 = vmatmul.msk.bf16.vlgmr.msrb.gmra.mxu2 %vm671_vm2, %v560_v43 }
  0x30   : > { %4196 = vmatmul.msk.bf16.vlgmr.msrb.gmra.mxu3 %vm671_vm2, %v560_v43 }
  0x3d   : > { %4197 = vmatmul.msk.bf16.vlgmr.msra.gmra.mxu0 %vm671_vm2, %v560_v43 }
  0x81   : > { %v586_v4 = vpop.permute.xlu0 %585 }
  0x9a   : > { %v715_v6 = vpop.f32.mrf.mxu0 }
  0x9b   : > { %v716_v7 = vadd.f32 %v715_v6, %v586_v4  ;;  %v728_v8 = vpop.f32.mrf.mxu1 }
  0x9c   : > { %v729_v9 = vadd.f32 %v728_v8, %v586_v4 }
  0x9d   : > { %v823_v10 = vmax.f32 %v716_v7, 0.0 }
  0x9e   : > { %v824_v11 = vmax.f32 %v729_v9, 0.0 }
  0xa0   : > { %v832_v12 = vpack.c.bf16 %v824_v11, %v823_v10 }
  0xa2   : > { %v741_v13 = vpop.f32.mrf.mxu2  ;;  %v845_v14 = vunpack.c.l.b16 %v832_v12  ;;  %v846_v15 = vunpack.c.h.b16 %v832_v12  ;;  %v717_v18 = vpop.f32.mrf.mxu0 }
  0xa3   : > { %v742_v16 = vadd.f32 %v741_v13, %v586_v4  ;;  %v754_v17 = vpop.f32.mrf.mxu3  ;;  %v730_v20 = vpop.f32.mrf.mxu1 }
  0xa4   : > { %v755_v19 = vadd.f32 %v754_v17, %v586_v4  ;;  %v4893_v21 = vpack.c.b16 %v845_v14, %v845_v14  ;;  %v4895_v22 = vpack.c.b16 %v846_v15, %v846_v15 }
  0xa5   : > { %v825_v23 = vmax.f32 %v742_v16, 0.0 }
  0xa6   : > { %v826_v24 = vmax.f32 %v755_v19, 0.0  ;;  %865 = vrot.lane.b32.xlu0 %v4895_v22, %s4715_s20  ;;  %863 = vrot.lane.b32.xlu2 %v4893_v21, %s4715_s20  ;;  %v1027_v18 = vsel %vm894_vm4, %v4893_v21, 0 }
  0xa8   : > { %v833_v25 = vpack.c.bf16 %v826_v24, %v825_v23 }
  0xaa   : > { %v847_v26 = vunpack.c.l.b16 %v833_v25  ;;  %v743_v27 = vpop.f32.mrf.mxu2  ;;  %v767_v29 = vpop.f32.mrf.mxu0  ;;  %v848_v36 = vunpack.c.h.b16 %v833_v25 }
  0xab   : > { %v756_v28 = vpop.f32.mrf.mxu3  ;;  %v768_v31 = vadd.f32 %v767_v29, %v586_v4  ;;  %v780_v32 = vpop.f32.mrf.mxu1 }
  0xac   : > { %v4901_v30 = vpack.c.b16 %v847_v26, %v847_v26  ;;  %v781_v33 = vadd.f32 %v780_v32, %v586_v4  ;;  %v4905_v44 = vpack.c.b16 %v848_v36, %v848_v36  ;;  %v1030_v28 = vsel %vm894_vm4, %v4895_v22, 0 }
  0xad   : > { %v827_v34 = vmax.f32 %v768_v31, 0.0 }
  0xae   : > { %867 = vrot.lane.b32.xlu1 %v4901_v30, %s4715_s20  ;;  %v828_v35 = vmax.f32 %v781_v33, 0.0  ;;  %v1033_v29 = vsel %vm894_vm4, %v4901_v30, 0  ;;  %v1036_v36 = vsel %vm894_vm4, %v4905_v44, 0 }
  0xb0   : > { %v834_v37 = vpack.c.bf16 %v828_v35, %v827_v34 }
  0xb2   : > { %v793_v38 = vpop.f32.mrf.mxu2  ;;  %v849_v39 = vunpack.c.l.b16 %v834_v37  ;;  %v850_v40 = vunpack.c.h.b16 %v834_v37  ;;  %v769_v43 = vpop.f32.mrf.mxu0 }
  0xb3   : > { %v794_v41 = vadd.f32 %v793_v38, %v586_v4  ;;  %v806_v42 = vpop.f32.mrf.mxu3  ;;  %v782_v46 = vpop.f32.mrf.mxu1  ;;  %v5035_v38 = vld [vmem:[%s6022_s4] sm:$0xf] }
  0xb4   : > { %v807_v45 = vadd.f32 %v806_v42, %v586_v4  ;;  %v4907_v47 = vpack.c.b16 %v849_v39, %v849_v39  ;;  %v4909_v48 = vpack.c.b16 %v850_v40, %v850_v40 }
  0xb5   : > { %v829_v49 = vmax.f32 %v794_v41, 0.0 }
  0xb6   : > { %v830_v50 = vmax.f32 %v807_v45, 0.0  ;;  %869 = vrot.lane.b32.xlu1 %v4905_v44, %s4715_s20  ;;  %873 = vrot.lane.b32.xlu0 %v4909_v48, %s4715_s20  ;;  %v1039_v23 = vsel %vm894_vm4, %v4907_v47, 0  ;;  %v1042_v31 = vsel %vm894_vm4, %v4909_v48, 0 }
  0xb7   : > { %871 = vrot.lane.b32.xlu2 %v4907_v47, %s4715_s20 }
  0xb8   : > { %v835_v51 = vpack.c.bf16 %v830_v50, %v829_v49 }
  0xba   : > { %v851_v52 = vunpack.c.l.b16 %v835_v51  ;;  %v852_v53 = vunpack.c.h.b16 %v835_v51  ;;  %v795_v54 = vpop.f32.mrf.mxu2  ;;  %v819_v56 = vpop.f32.mrf.mxu0 }
  0xbb   : > { %v808_v55 = vpop.f32.mrf.mxu3  ;;  %v820_v58 = vadd.f32 %v819_v56, %v586_v4  ;;  %v4966_v4 = vld [vmem:[%s6022_s4 + $0x4] sm:$0xf] }
  0xbc   : > { %v4917_v57 = vpack.c.b16 %v851_v52, %v851_v52  ;;  %v4919_v59 = vpack.c.b16 %v852_v53, %v852_v53 }
  0xbd   : > { %v831_v60 = vmax.f32 %v820_v58, 0.0 }
  0xbe   : > { %875 = vrot.lane.b32.xlu1 %v4917_v57, %s4715_s20  ;;  %v1045_v37 = vsel %vm894_vm4, %v4917_v57, 0  ;;  %v1048_v40 = vsel %vm894_vm4, %v4919_v59, 0 }
  0xbf   : > { %877 = vrot.lane.b32.xlu2 %v4919_v59, %s4715_s20  ;;  %v836_v61 = vpack.c.bf16 %v831_v60, %v831_v60 }
  0xc1   : > { %v853_v62 = vunpack.c.l.b16 %v836_v61 }
  0xc2   : > { %v821_v63 = vpop.f32.mrf.mxu0 }
  0xc3   : > { %v4925_v0 = vpack.c.b16 %v853_v62, %v853_v62 }
  0xc5   : > { %879 = vrot.lane.b32.xlu0 %v4925_v0, %s4715_s20 }
  0xc6   : > { %1158 = vrot.lane.b32.xlu1 %v4895_v22, %s4716_s21 }
  0xc7   : > { %1160 = vrot.lane.b32.xlu2 %v4901_v30, %s4716_s21 }
  0xcd   : > { %1162 = vrot.lane.b32.xlu0 %v4905_v44, %s4716_s21 }
  0xce   : > { %1156 = vrot.lane.b32.xlu1 %v4893_v21, %s4716_s21 }
  0xcf   : > { %1164 = vrot.lane.b32.xlu2 %v4907_v47, %s4716_s21 }
  0xd5   : > { %1166 = vrot.lane.b32.xlu0 %v4909_v48, %s4716_s21 }
  0xd6   : > { %1168 = vrot.lane.b32.xlu1 %v4917_v57, %s4716_s21 }
  0xd7   : > { %1170 = vrot.lane.b32.xlu2 %v4919_v59, %s4716_s21 }
  0xdd   : > { %1172 = vrot.lane.b32.xlu0 %v4925_v0, %s4716_s21 }
  0xde   : > { %1326 = vrot.lane.b32.xlu1 %v4895_v22, %s4717_s22 }
  0xdf   : > { %1328 = vrot.lane.b32.xlu2 %v4901_v30, %s4717_s22 }
  0xe5   : > { %1330 = vrot.lane.b32.xlu0 %v4905_v44, %s4717_s22 }
  0xe6   : > { %1324 = vrot.lane.b32.xlu1 %v4893_v21, %s4717_s22 }
  0xe7   : > { %1332 = vrot.lane.b32.xlu2 %v4907_v47, %s4717_s22 }
  0xed   : > { %1334 = vrot.lane.b32.xlu0 %v4909_v48, %s4717_s22 }
  0xee   : > { %1336 = vrot.lane.b32.xlu1 %v4917_v57, %s4717_s22 }
  0xef   : > { %1338 = vrot.lane.b32.xlu2 %v4919_v59, %s4717_s22 }
  0xf5   : > { %1340 = vrot.lane.b32.xlu0 %v4925_v0, %s4717_s22 }
  0xf6   : > { %1494 = vrot.lane.b32.xlu1 %v4895_v22, %s4718_s23 }
  0xf7   : > { %1496 = vrot.lane.b32.xlu2 %v4901_v30, %s4718_s23 }
  0xfd   : > { %1498 = vrot.lane.b32.xlu0 %v4905_v44, %s4718_s23 }
  0xfe   : > { %1492 = vrot.lane.b32.xlu1 %v4893_v21, %s4718_s23 }
  0xff   : > { %1500 = vrot.lane.b32.xlu2 %v4907_v47, %s4718_s23 }
 0x100   : > { %v864_v1 = vpop.permute.xlu2 %863 }
 0x105   : > { %1502 = vrot.lane.b32.xlu0 %v4909_v48, %s4718_s23 }
 0x106   : > { %1504 = vrot.lane.b32.xlu1 %v4917_v57, %s4718_s23 }
 0x107   : > { %1506 = vrot.lane.b32.xlu2 %v4919_v59, %s4718_s23 }
 0x10d   : > { %1508 = vrot.lane.b32.xlu0 %v4925_v0, %s4718_s23 }
 0x10e   : > { %1662 = vrot.lane.b32.xlu1 %v4895_v22, %s4719_s26 }
 0x10f   : > { %1664 = vrot.lane.b32.xlu2 %v4901_v30, %s4719_s26 }
 0x111   : > { %v872_v9 = vpop.permute.xlu2 %871 }
 0x115   : > { %1666 = vrot.lane.b32.xlu0 %v4905_v44, %s4719_s26 }
 0x116   : > { %1660 = vrot.lane.b32.xlu1 %v4893_v21, %s4719_s26 }
 0x117   : > { %1668 = vrot.lane.b32.xlu2 %v4907_v47, %s4719_s26 }
 0x118   : > { %v866_v2 = vpop.permute.xlu0 %865 }
 0x119   : > { %v882_v3 = vsel %vm881_vm3, %v864_v1, %v866_v2  ;;  %v878_v19 = vpop.permute.xlu2 %877 }
 0x11a   : > { %v896_v5 = vsel %vm894_vm4, %v882_v3, 0 }
 0x11b   : > { %926 = vmatpush.bf16.msra.mxu1 %v896_v5 }
 0x11d   : > { %1670 = vrot.lane.b32.xlu0 %v4909_v48, %s4719_s26 }
 0x11e   : > { %1672 = vrot.lane.b32.xlu1 %v4917_v57, %s4719_s26  ;;  %4199 = vmatmul.msk.bf16.vlgmr.msra.gmra.mxu1 %vm890_vm5, %v4966_v4 }
 0x11f   : > { %1674 = vrot.lane.b32.xlu2 %v4919_v59, %s4719_s26 }
 0x120   : > { %v868_v6 = vpop.permute.xlu1 %867 }
 0x121   : > { %v883_v7 = vsel %vm881_vm3, %v866_v2, %v868_v6  ;;  %v1161_v43 = vpop.permute.xlu2 %1160 }
 0x122   : > { %v899_v8 = vsel %vm894_vm4, %v883_v7, 0 }
 0x123   : > { %939 = vmatpush.bf16.msra.mxu2 %v899_v8 }
 0x125   : > { %1676 = vrot.lane.b32.xlu0 %v4925_v0, %s4719_s26  ;;  %s558_s26 = scalar_lea.vmem %s6035_s17, %s6041_s25 }
 0x126   : > { %4200 = vmatmul.msk.bf16.vlgmr.msra.gmra.mxu2 %vm890_vm5, %v4966_v4  ;;  %1830 = vrot.lane.b32.xlu1 %v4895_v22, %s4720_s29 }
 0x127   : > { %1832 = vrot.lane.b32.xlu2 %v4901_v30, %s4720_s29 }
 0x128   : > { %v870_v10 = vpop.permute.xlu1 %869  ;;  %v874_v13 = vpop.permute.xlu0 %873 }
 0x129   : > { %v884_v11 = vsel %vm881_vm3, %v868_v6, %v870_v10  ;;  %v885_v12 = vsel %vm881_vm3, %v870_v10, %v872_v9  ;;  %v886_v16 = vsel %vm881_vm3, %v872_v9, %v874_v13  ;;  %v1165_v53 = vpop.permute.xlu2 %1164 }
 0x12a   : > { %v902_v14 = vsel %vm894_vm4, %v884_v11, 0  ;;  %v905_v15 = vsel %vm894_vm4, %v885_v12, 0  ;;  %v908_v17 = vsel %vm894_vm4, %v886_v16, 0 }
 0x12b   : > { %952 = vmatpush.bf16.msra.mxu3 %v902_v14  ;;  %965 = vmatpush.bf16.msrb.mxu0 %v905_v15 }
 0x12c   : > { %978 = vmatpush.bf16.msrb.mxu1 %v908_v17 }
 0x12d   : > { %1834 = vrot.lane.b32.xlu0 %v4905_v44, %s4720_s29 }
 0x12e   : > { %4201 = vmatmul.msk.bf16.vlgmr.msra.gmra.mxu3 %vm890_vm5, %v4966_v4  ;;  %1828 = vrot.lane.b32.xlu1 %v4893_v21, %s4720_s29 }
 0x12f   : > { %1836 = vrot.lane.b32.xlu2 %v4907_v47, %s4720_s29  ;;  %4202 = vmatmul.msk.bf16.vlgmr.msrb.gmra.mxu0 %vm890_vm5, %v4966_v4 }
 0x130   : > { %1057 = vmatpush.bf16.msra.mxu1 %v1027_v18  ;;  %v876_v20 = vpop.permute.xlu1 %875 }
 0x131   : > { %4203 = vmatmul.msk.bf16.vlgmr.msrb.gmra.mxu1 %vm890_vm5, %v4966_v4  ;;  %v887_v24 = vsel %vm881_vm3, %v874_v13, %v876_v20  ;;  %v888_v25 = vsel %vm881_vm3, %v876_v20, %v878_v19  ;;  %v1171_v2 = vpop.permute.xlu2 %1170 }
 0x132   : > { %v911_v26 = vsel %vm894_vm4, %v887_v24, 0  ;;  %v914_v27 = vsel %vm894_vm4, %v888_v25, 0 }
 0x133   : > { %991 = vmatpush.bf16.msrb.mxu2 %v911_v26  ;;  %1004 = vmatpush.bf16.msrb.mxu3 %v914_v27  ;;  %v4224_v27 = vld [vmem:[%s6022_s4 + $0xc] sm:$0xf] }
 0x134   : > { %1109 = vmatpush.bf16.msrb.mxu1 %v1039_v23 }
 0x135   : > { %1838 = vrot.lane.b32.xlu0 %v4909_v48, %s4720_s29 }
 0x136   : > { %4204 = vmatmul.msk.bf16.vlgmr.msrb.gmra.mxu2 %vm890_vm5, %v4966_v4  ;;  %1840 = vrot.lane.b32.xlu1 %v4917_v57, %s4720_s29 }
 0x137   : > { %1070 = vmatpush.bf16.msra.mxu2 %v1030_v28  ;;  %1083 = vmatpush.bf16.msra.mxu3 %v1033_v29  ;;  %v880_v33 = vpop.permute.xlu0 %879 }
 0x138   : > { %v1159_v32 = vpop.permute.xlu1 %1158  ;;  %1842 = vrot.lane.b32.xlu2 %v4919_v59, %s4720_s29  ;;  %v889_v34 = vsel %vm881_vm3, %v878_v19, %v880_v33  ;;  %vm3960_vm3 = vcmask 130048  }
 0x139   : > { %v917_v35 = vsel %vm894_vm4, %v889_v34, 0  ;;  %v1176_v46 = vsel %vm1174_vm6, %v1159_v32, %v1161_v43  ;;  %v1329_v9 = vpop.permute.xlu2 %1328 }
 0x13a   : > { %1017 = vmatpush.bf16.msra.mxu0 %v917_v35  ;;  %v1190_v49 = vsel %vm894_vm4, %v1176_v46, 0 }
 0x13b   : > { %1122 = vmatpush.bf16.msrb.mxu2 %v1042_v31 }
 0x13d   : > { %1844 = vrot.lane.b32.xlu0 %v4925_v0, %s4720_s29  ;;  %s555_s29 = scalar_lea.vmem %s6039_s28, %s6041_s25 }
 0x13e   : > { %1096 = vmatpush.bf16.msrb.mxu0 %v1036_v36  ;;  %1998 = vrot.lane.b32.xlu1 %v4895_v22, %s4721_s0 }
 0x13f   : > { %4205 = vmatmul.msk.bf16.vlgmr.msrb.gmra.mxu3 %vm890_vm5, %v4966_v4  ;;  %4206 = vmatmul.msk.bf16.vlgmr.msra.gmra.mxu0 %vm890_vm5, %v4966_v4  ;;  %v1163_v42 = vpop.permute.xlu0 %1162 }
 0x140   : > { %1135 = vmatpush.bf16.msrb.mxu3 %v1045_v37  ;;  %v1157_v39 = vpop.permute.xlu1 %1156  ;;  %2000 = vrot.lane.b32.xlu2 %v4901_v30, %s4721_s0  ;;  %v1177_v51 = vsel %vm1174_vm6, %v1161_v43, %v1163_v42  ;;  %v1178_v54 = vsel %vm1174_vm6, %v1163_v42, %v1165_v53 }
 0x141   : > { %v1175_v41 = vsel %vm1174_vm6, %v1157_v39, %v1159_v32  ;;  %4207 = vmatmul.msk.bf16.vlgmr.msra.gmra.mxu1 %vm890_vm5, %v5035_v38  ;;  %v1193_v55 = vsel %vm894_vm4, %v1177_v51, 0  ;;  %v1196_v58 = vsel %vm894_vm4, %v1178_v54, 0  ;;  %v1333_v13 = vpop.permute.xlu2 %1332 }
 0x142   : > { %1148 = vmatpush.bf16.msra.mxu0 %v1048_v40  ;;  %v1187_v45 = vsel %vm894_vm4, %v1175_v41, 0 }
 0x143   : > { %1217 = vmatpush.bf16.msra.mxu1 %v1187_v45 }
 0x145   : > { %2002 = vrot.lane.b32.xlu0 %v4905_v44, %s4721_s0 }
 0x146   : > { %4208 = vmatmul.msk.bf16.vlgmr.msra.gmra.mxu2 %vm890_vm5, %v5035_v38  ;;  %1996 = vrot.lane.b32.xlu1 %v4893_v21, %s4721_s0 }
 0x147   : > { %1230 = vmatpush.bf16.msra.mxu2 %v1190_v49  ;;  %v1167_v52 = vpop.permute.xlu0 %1166 }
 0x148   : > { %v1169_v50 = vpop.permute.xlu1 %1168  ;;  %2004 = vrot.lane.b32.xlu2 %v4907_v47, %s4721_s0  ;;  %v1179_v56 = vsel %vm1174_vm6, %v1165_v53, %v1167_v52 }
 0x149   : > { %v1199_v60 = vsel %vm894_vm4, %v1179_v56, 0  ;;  %v1180_v62 = vsel %vm1174_vm6, %v1167_v52, %v1169_v50  ;;  %v1181_v3 = vsel %vm1174_vm6, %v1169_v50, %v1171_v2 }
 0x14a   : > { %v1202_v63 = vsel %vm894_vm4, %v1180_v62, 0  ;;  %v1205_v6 = vsel %vm894_vm4, %v1181_v3, 0 }
 0x14d   : > { %2006 = vrot.lane.b32.xlu0 %v4909_v48, %s4721_s0 }
 0x14e   : > { %2008 = vrot.lane.b32.xlu1 %v4917_v57, %s4721_s0 }
 0x14f   : > { %4209 = vmatmul.msk.bf16.vlgmr.msra.gmra.mxu3 %vm890_vm5, %v5035_v38  ;;  %4210 = vmatmul.msk.bf16.vlgmr.msrb.gmra.mxu0 %vm890_vm5, %v5035_v38  ;;  %v1173_v1 = vpop.permute.xlu0 %1172 }
 0x150   : > { %1243 = vmatpush.bf16.msra.mxu3 %v1193_v55  ;;  %2010 = vrot.lane.b32.xlu2 %v4919_v59, %s4721_s0  ;;  %v1327_v61 = vpop.permute.xlu1 %1326  ;;  %v1182_v4 = vsel %vm1174_vm6, %v1171_v2, %v1173_v1 }
 0x151   : > { %4211 = vmatmul.msk.bf16.vlgmr.msrb.gmra.mxu1 %vm890_vm5, %v5035_v38  ;;  %1256 = vmatpush.bf16.msrb.mxu0 %v1196_v58  ;;  %v1344_v10 = vsel %vm1342_vm7, %v1327_v61, %v1329_v9 }
 0x152   : > { %1269 = vmatpush.bf16.msrb.mxu1 %v1199_v60  ;;  %v4233_v60 = vld [vmem:[%s6022_s4 + $0x10] sm:$0xf] }
 0x155   : > { %2012 = vrot.lane.b32.xlu0 %v4925_v0, %s4721_s0 }
 0x156   : > { %4212 = vmatmul.msk.bf16.vlgmr.msrb.gmra.mxu2 %vm890_vm5, %v5035_v38  ;;  %2166 = vrot.lane.b32.xlu1 %v4895_v22, %s4722_s19  ;;  %v4215_v22 = vld [vmem:[%s6022_s4 + $0x8] sm:$0xf] }
 0x157   : > { %1282 = vmatpush.bf16.msrb.mxu2 %v1202_v63  ;;  %v1331_v8 = vpop.permute.xlu0 %1330 }
 0x158   : > { %2168 = vrot.lane.b32.xlu2 %v4901_v30, %s4722_s19  ;;  %v1325_v5 = vpop.permute.xlu1 %1324  ;;  %v1208_v30 = vsel %vm894_vm4, %v1182_v4, 0  ;;  %v1345_v11 = vsel %vm1342_vm7, %v1329_v9, %v1331_v8  ;;  %v1346_v14 = vsel %vm1342_vm7, %v1331_v8, %v1333_v13 }
 0x159   : > { %v1343_v7 = vsel %vm1342_vm7, %v1325_v5, %v1327_v61  ;;  %v1361_v15 = vsel %vm894_vm4, %v1345_v11, 0 }
 0x15d   : > { %2170 = vrot.lane.b32.xlu0 %v4905_v44, %s4722_s19  ;;  %v1358_v44 = vsel %vm894_vm4, %v1344_v10, 0 }
 0x15e   : > { %2164 = vrot.lane.b32.xlu1 %v4893_v21, %s4722_s19  ;;  %v1355_v21 = vsel %vm894_vm4, %v1343_v7, 0 }
 0x15f   : > { %4213 = vmatmul.msk.bf16.vlgmr.msrb.gmra.mxu3 %vm890_vm5, %v5035_v38  ;;  %4214 = vmatmul.msk.bf16.vlgmr.msra.gmra.mxu0 %vm890_vm5, %v5035_v38  ;;  %v1335_v12 = vpop.permute.xlu0 %1334 }
 0x160   : > { %1295 = vmatpush.bf16.msrb.mxu3 %v1205_v6  ;;  %2172 = vrot.lane.b32.xlu2 %v4907_v47, %s4722_s19  ;;  %v1337_v47 = vpop.permute.xlu1 %1336 }
 0x161   : > { %4216 = vmatmul.msk.bf16.vlgmr.msra.gmra.mxu1 %vm890_vm5, %v4215_v22  ;;  %1308 = vmatpush.bf16.msra.mxu0 %v1208_v30  ;;  %v1348_v17 = vsel %vm1342_vm7, %v1335_v12, %v1337_v47 }
 0x162   : > { %1385 = vmatpush.bf16.msra.mxu1 %v1355_v21  ;;  %v1370_v18 = vsel %vm894_vm4, %v1348_v17, 0 }
 0x165   : > { %2174 = vrot.lane.b32.xlu0 %v4909_v48, %s4722_s19  ;;  %v1364_v48 = vsel %vm894_vm4, %v1346_v14, 0 }
 0x166   : > { %2176 = vrot.lane.b32.xlu1 %v4917_v57, %s4722_s19  ;;  %4217 = vmatmul.msk.bf16.vlgmr.msra.gmra.mxu2 %vm890_vm5, %v4215_v22  ;;  %v1347_v57 = vsel %vm1342_vm7, %v1333_v13, %v1335_v12 }
 0x167   : > { %1398 = vmatpush.bf16.msra.mxu2 %v1358_v44  ;;  %v1341_v19 = vpop.permute.xlu0 %1340 }
 0x168   : > { %2178 = vrot.lane.b32.xlu2 %v4919_v59, %s4722_s19  ;;  %v1367_v59 = vsel %vm894_vm4, %v1347_v57, 0  ;;  %v1495_v16 = vpop.permute.xlu1 %1494 }
 0x16d   : > { %2180 = vrot.lane.b32.xlu0 %v4925_v0, %s4722_s19  ;;  %v1339_v0 = vpop.permute.xlu2 %1338 }
 0x16e   : > { %v1349_v20 = vsel %vm1342_vm7, %v1337_v47, %v1339_v0  ;;  %v1350_v24 = vsel %vm1342_vm7, %v1339_v0, %v1341_v19 }
 0x16f   : > { %4218 = vmatmul.msk.bf16.vlgmr.msra.gmra.mxu3 %vm890_vm5, %v4215_v22  ;;  %4219 = vmatmul.msk.bf16.vlgmr.msrb.gmra.mxu0 %vm890_vm5, %v4215_v22  ;;  %v1373_v25 = vsel %vm894_vm4, %v1349_v20, 0  ;;  %v1376_v28 = vsel %vm894_vm4, %v1350_v24, 0  ;;  %v1499_v31 = vpop.permute.xlu0 %1498 }
 0x170   : > { %1411 = vmatpush.bf16.msra.mxu3 %v1361_v15  ;;  %1424 = vmatpush.bf16.msrb.mxu0 %v1364_v48  ;;  %v1493_v23 = vpop.permute.xlu1 %1492 }
 0x171   : > { %4220 = vmatmul.msk.bf16.vlgmr.msrb.gmra.mxu1 %vm890_vm5, %v4215_v22  ;;  %v1511_v26 = vsel %vm1510_vm8, %v1493_v23, %v1495_v16 }
 0x172   : > { %1437 = vmatpush.bf16.msrb.mxu1 %v1367_v59  ;;  %v1523_v29 = vsel %vm894_vm4, %v1511_v26, 0 }
 0x175   : > { %v1497_v32 = vpop.permute.xlu2 %1496 }
 0x176   : > { %4221 = vmatmul.msk.bf16.vlgmr.msrb.gmra.mxu2 %vm890_vm5, %v4215_v22  ;;  %v1512_v33 = vsel %vm1510_vm8, %v1495_v16, %v1497_v32  ;;  %v1513_v36 = vsel %vm1510_vm8, %v1497_v32, %v1499_v31 }
 0x177   : > { %1450 = vmatpush.bf16.msrb.mxu2 %v1370_v18  ;;  %v1526_v34 = vsel %vm894_vm4, %v1512_v33, 0  ;;  %v1503_v37 = vpop.permute.xlu0 %1502  ;;  %v1529_v40 = vsel %vm894_vm4, %v1513_v36, 0 }
 0x178   : > { %v1505_v35 = vpop.permute.xlu1 %1504 }
 0x179   : > { %v1516_v46 = vsel %vm1510_vm8, %v1503_v37, %v1505_v35 }
 0x17a   : > { %v1538_v49 = vsel %vm894_vm4, %v1516_v46, 0 }
 0x17d   : > { %v1501_v38 = vpop.permute.xlu2 %1500 }
 0x17e   : > { %v1514_v39 = vsel %vm1510_vm8, %v1499_v31, %v1501_v38  ;;  %v1515_v41 = vsel %vm1510_vm8, %v1501_v38, %v1503_v37 }
 0x17f   : > { %4222 = vmatmul.msk.bf16.vlgmr.msrb.gmra.mxu3 %vm890_vm5, %v4215_v22  ;;  %4223 = vmatmul.msk.bf16.vlgmr.msra.gmra.mxu0 %vm890_vm5, %v4215_v22  ;;  %v1532_v42 = vsel %vm894_vm4, %v1514_v39, 0  ;;  %v1535_v43 = vsel %vm894_vm4, %v1515_v41, 0  ;;  %v1509_v50 = vpop.permute.xlu0 %1508 }
 0x180   : > { %1463 = vmatpush.bf16.msrb.mxu3 %v1373_v25  ;;  %1476 = vmatpush.bf16.msra.mxu0 %v1376_v28  ;;  %v1663_v45 = vpop.permute.xlu1 %1662  ;;  %v5202_v28 = vld [vmem:[%s6022_s4 + $0x14] sm:$0xf] }
 0x181   : > { %4225 = vmatmul.msk.bf16.vlgmr.msra.gmra.mxu1 %vm890_vm5, %v4224_v27 }
 0x182   : > { %1553 = vmatpush.bf16.msra.mxu1 %v1523_v29 }
 0x185   : > { %v1507_v51 = vpop.permute.xlu2 %1506 }
 0x186   : > { %4226 = vmatmul.msk.bf16.vlgmr.msra.gmra.mxu2 %vm890_vm5, %v4224_v27  ;;  %v1517_v52 = vsel %vm1510_vm8, %v1505_v35, %v1507_v51  ;;  %v1518_v55 = vsel %vm1510_vm8, %v1507_v51, %v1509_v50 }
 0x187   : > { %1566 = vmatpush.bf16.msra.mxu2 %v1526_v34  ;;  %v1541_v56 = vsel %vm894_vm4, %v1517_v52, 0  ;;  %v1544_v61 = vsel %vm894_vm4, %v1518_v55, 0  ;;  %v1667_v63 = vpop.permute.xlu0 %1666 }
 0x188   : > { %v1661_v53 = vpop.permute.xlu1 %1660 }
 0x189   : > { %v1679_v58 = vsel %vm1678_vm9, %v1661_v53, %v1663_v45 }
 0x18a   : > { %v1691_v62 = vsel %vm894_vm4, %v1679_v58, 0 }
 0x18d   : > { %v1665_v1 = vpop.permute.xlu2 %1664 }
 0x18e   : > { %v1680_v2 = vsel %vm1678_vm9, %v1663_v45, %v1665_v1  ;;  %v1681_v7 = vsel %vm1678_vm9, %v1665_v1, %v1667_v63 }
 0x18f   : > { %4227 = vmatmul.msk.bf16.vlgmr.msra.gmra.mxu3 %vm890_vm5, %v4224_v27  ;;  %4228 = vmatmul.msk.bf16.vlgmr.msrb.gmra.mxu0 %vm890_vm5, %v4224_v27  ;;  %v1694_v5 = vsel %vm894_vm4, %v1680_v2, 0  ;;  %v1671_v22 = vpop.permute.xlu0 %1670  ;;  %v1697_v10 = vsel %vm894_vm4, %v1681_v7, 0 }
 0x190   : > { %1579 = vmatpush.bf16.msra.mxu3 %v1529_v40  ;;  %1592 = vmatpush.bf16.msrb.mxu0 %v1532_v42  ;;  %v1673_v4 = vpop.permute.xlu1 %1672 }
 0x191   : > { %4229 = vmatmul.msk.bf16.vlgmr.msrb.gmra.mxu1 %vm890_vm5, %v4224_v27  ;;  %v1684_v15 = vsel %vm1678_vm9, %v1671_v22, %v1673_v4 }
 0x192   : > { %1605 = vmatpush.bf16.msrb.mxu1 %v1535_v43  ;;  %v1706_v59 = vsel %vm894_vm4, %v1684_v15, 0  ;;  %v5259_v15 = vld [vmem:[%s6022_s4 + $0x18] sm:$0xf] }
 0x195   : > { %v1669_v30 = vpop.permute.xlu2 %1668 }
 0x196   : > { %4230 = vmatmul.msk.bf16.vlgmr.msrb.gmra.mxu2 %vm890_vm5, %v4224_v27  ;;  %v1682_v21 = vsel %vm1678_vm9, %v1667_v63, %v1669_v30  ;;  %v1683_v44 = vsel %vm1678_vm9, %v1669_v30, %v1671_v22 }
 0x197   : > { %1618 = vmatpush.bf16.msrb.mxu2 %v1538_v49  ;;  %v1700_v47 = vsel %vm894_vm4, %v1682_v21, 0  ;;  %v1703_v12 = vsel %vm894_vm4, %v1683_v44, 0  ;;  %v1677_v16 = vpop.permute.xlu0 %1676 }
 0x198   : > { %v1831_v11 = vpop.permute.xlu1 %1830 }
 0x19b   : > { %v928_v54 = vpop.f32.mrf.mxu1 }
 0x19d   : > { %v1675_v17 = vpop.permute.xlu2 %1674 }
 0x19e   : > { %v1685_v0 = vsel %vm1678_vm9, %v1673_v4, %v1675_v17  ;;  %v1686_v23 = vsel %vm1678_vm9, %v1675_v17, %v1677_v16 }
 0x19f   : > { %4231 = vmatmul.msk.bf16.vlgmr.msrb.gmra.mxu3 %vm890_vm5, %v4224_v27  ;;  %4232 = vmatmul.msk.bf16.vlgmr.msra.gmra.mxu0 %vm890_vm5, %v4224_v27  ;;  %v1709_v25 = vsel %vm894_vm4, %v1685_v0, 0  ;;  %v1712_v31 = vsel %vm894_vm4, %v1686_v23, 0  ;;  %v1835_v32 = vpop.permute.xlu0 %1834 }
 0x1a0   : > { %1631 = vmatpush.bf16.msrb.mxu3 %v1541_v56  ;;  %1644 = vmatpush.bf16.msra.mxu0 %v1544_v61  ;;  %v1829_v20 = vpop.permute.xlu1 %1828 }
 0x1a1   : > { %4234 = vmatmul.msk.bf16.vlgmr.msra.gmra.mxu1 %vm890_vm5, %v4233_v60  ;;  %v1847_v26 = vsel %vm1846_vm10, %v1829_v20, %v1831_v11 }
 0x1a2   : > { %1721 = vmatpush.bf16.msra.mxu1 %v1691_v62  ;;  %v1859_v33 = vsel %vm894_vm4, %v1847_v26, 0 }
 0x1a3   : > { %v930_v3 = vpop.f32.mrf.mxu1 }
 0x1a5   : > { %v1833_v36 = vpop.permute.xlu2 %1832 }
 0x1a6   : > { %4235 = vmatmul.msk.bf16.vlgmr.msra.gmra.mxu2 %vm890_vm5, %v4233_v60  ;;  %v1848_v37 = vsel %vm1846_vm10, %v1831_v11, %v1833_v36  ;;  %v1849_v46 = vsel %vm1846_vm10, %v1833_v36, %v1835_v32 }
 0x1a7   : > { %1734 = vmatpush.bf16.msra.mxu2 %v1694_v5  ;;  %v1862_v39 = vsel %vm894_vm4, %v1848_v37, 0  ;;  %v1839_v49 = vpop.permute.xlu0 %1838  ;;  %v1865_v53 = vsel %vm894_vm4, %v1849_v46, 0 }
 0x1a8   : > { %v1841_v40 = vpop.permute.xlu1 %1840 }
 0x1a9   : > { %v941_v6 = vpop.f32.mrf.mxu2  ;;  %v1852_v3 = vsel %vm1846_vm10, %v1839_v49, %v1841_v40 }
 0x1aa   : > { %v1874_v4 = vsel %vm894_vm4, %v1852_v3, 0 }
 0x1ac   : > { %v5174_v8 = vpop.f32.mrf.mxu0 }
 0x1ad   : > { %v1837_v50 = vpop.permute.xlu2 %1836 }
 0x1ae   : > { %v5176_v9 = vpop.f32.mrf.mxu1  ;;  %v1850_v51 = vsel %vm1846_vm10, %v1835_v32, %v1837_v50 }
 0x1af   : > { %4236 = vmatmul.msk.bf16.vlgmr.msra.gmra.mxu3 %vm890_vm5, %v4233_v60  ;;  %4237 = vmatmul.msk.bf16.vlgmr.msrb.gmra.mxu0 %vm890_vm5, %v4233_v60 }
 0x1b0   : > { %1747 = vmatpush.bf16.msra.mxu3 %v1697_v10  ;;  %1760 = vmatpush.bf16.msrb.mxu0 %v1700_v47  ;;  %v1999_v61 = vpop.permute.xlu1 %1998 }
 0x1b1   : > { %4238 = vmatmul.msk.bf16.vlgmr.msrb.gmra.mxu1 %vm890_vm5, %v4233_v60  ;;  %v943_v13 = vpop.f32.mrf.mxu2  ;;  %v5185_v14 = vpop.f32.mrf.mxu3 }
 0x1b2   : > { %1773 = vmatpush.bf16.msrb.mxu1 %v1703_v12 }
 0x1b4   : > { %v969_v57 = vpop.f32.mrf.mxu0 }
 0x1b5   : > { %v1843_v22 = vpop.permute.xlu2 %1842 }
 0x1b6   : > { %v982_v48 = vpop.f32.mrf.mxu1  ;;  %4239 = vmatmul.msk.bf16.vlgmr.msrb.gmra.mxu2 %vm890_vm5, %v4233_v60 }
 0x1b7   : > { %1786 = vmatpush.bf16.msrb.mxu2 %v1706_v59 }
 0x1b8   : > { %v1997_v10 = vpop.permute.xlu1 %1996 }
 0x1b9   : > { %v956_v18 = vpop.f32.mrf.mxu3  ;;  %v5190_v19 = vpop.f32.mrf.mxu2  ;;  %v2015_v12 = vsel %vm2014_vm11, %v1997_v10, %v1999_v61 }
 0x1ba   : > { %v2027_v16 = vsel %vm894_vm4, %v2015_v12, 0 }
 0x1bc   : > { %v5194_v24 = vpop.f32.mrf.mxu0 }
 0x1be   : > { %v1059_v27 = vpop.f32.mrf.mxu1 }
 0x1bf   : > { %4240 = vmatmul.msk.bf16.vlgmr.msrb.gmra.mxu3 %vm890_vm5, %v4233_v60  ;;  %v5204_v29 = vadd.f32 %v1059_v27, %v928_v54  ;;  %4241 = vmatmul.msk.bf16.vlgmr.msra.gmra.mxu0 %vm890_vm5, %v4233_v60  ;;  %v1851_v54 = vsel %vm1846_vm10, %v1837_v50, %v1839_v49  ;;  %v1868_v60 = vsel %vm894_vm4, %v1850_v51, 0 }
 0x1c0   : > { %1799 = vmatpush.bf16.msrb.mxu3 %v1709_v25  ;;  %1812 = vmatpush.bf16.msra.mxu0 %v1712_v31  ;;  %v1871_v62 = vsel %vm894_vm4, %v1851_v54, 0  ;;  %v2009_v25 = vpop.permute.xlu1 %2008 }
 0x1c1   : > { %4243 = vmatmul.msk.bf16.vlgmr.msra.gmra.mxu1 %vm890_vm5, %v5202_v28  ;;  %v995_v34 = vpop.f32.mrf.mxu2 }
 0x1c2   : > { %v5211_v35 = vpop.f32.mrf.mxu3  ;;  %1889 = vmatpush.bf16.msra.mxu1 %v1859_v33 }
 0x1c4   : > { %v1021_v38 = vpop.f32.mrf.mxu0 }
 0x1c6   : > { %v1061_v41 = vpop.f32.mrf.mxu1  ;;  %4244 = vmatmul.msk.bf16.vlgmr.msra.gmra.mxu2 %vm890_vm5, %v5202_v28 }
 0x1c7   : > { %1902 = vmatpush.bf16.msra.mxu2 %v1862_v39 }
 0x1c9   : > { %v1072_v43 = vpop.f32.mrf.mxu2 }
 0x1ca   : > { %v1008_v42 = vpop.f32.mrf.mxu3  ;;  %v5217_v45 = vadd.f32 %v1072_v43, %v941_v6  ;;  %v1845_v6 = vpop.permute.xlu0 %1844 }
 0x1cb   : > { %v1854_v44 = vsel %vm1846_vm10, %v1843_v22, %v1845_v6  ;;  %v2167_v42 = vpop.permute.xlu1 %2166  ;;  %v5320_v6 = vld [vmem:[%s6022_s4 + $0x1c] sm:$0xf] }
 0x1cc   : > { %v1098_v52 = vpop.f32.mrf.mxu0  ;;  %v1880_v48 = vsel %vm894_vm4, %v1854_v44, 0 }
 0x1cd   : > { %v5224_v55 = vadd.f32 %v1098_v52, %v5174_v8 }
 0x1ce   : > { %v1111_v56 = vpop.f32.mrf.mxu1 }
 0x1cf   : > { %4245 = vmatmul.msk.bf16.vlgmr.msra.gmra.mxu3 %vm890_vm5, %v5202_v28  ;;  %v5229_v58 = vadd.f32 %v1111_v56, %v5176_v9  ;;  %4246 = vmatmul.msk.bf16.vlgmr.msrb.gmra.mxu0 %vm890_vm5, %v5202_v28  ;;  %v1853_v9 = vsel %vm1846_vm10, %v1841_v40, %v1843_v22 }
 0x1d0   : > { %1915 = vmatpush.bf16.msra.mxu3 %v1865_v53  ;;  %1928 = vmatpush.bf16.msrb.mxu0 %v1868_v60  ;;  %v1877_v11 = vsel %vm894_vm4, %v1853_v9, 0 }
 0x1d1   : > { %4247 = vmatmul.msk.bf16.vlgmr.msrb.gmra.mxu1 %vm890_vm5, %v5202_v28  ;;  %v1074_v63 = vpop.f32.mrf.mxu2 }
 0x1d2   : > { %v1085_v1 = vpop.f32.mrf.mxu3  ;;  %1941 = vmatpush.bf16.msrb.mxu1 %v1871_v62  ;;  %v2003_v59 = vpop.permute.xlu0 %2002 }
 0x1d3   : > { %v5238_v2 = vadd.f32 %v1085_v1, %v5185_v14  ;;  %v2165_v62 = vpop.permute.xlu1 %2164 }
 0x1d4   : > { %v1100_v5 = vpop.f32.mrf.mxu0  ;;  %v2183_v3 = vsel %vm2182_vm12, %v2165_v62, %v2167_v42 }
 0x1d6   : > { %v1113_v7 = vpop.f32.mrf.mxu1  ;;  %4248 = vmatmul.msk.bf16.vlgmr.msrb.gmra.mxu2 %vm890_vm5, %v5202_v28 }
 0x1d7   : > { %1954 = vmatpush.bf16.msrb.mxu2 %v1874_v4 }
 0x1d9   : > { %v1124_v21 = vpop.f32.mrf.mxu2 }
 0x1da   : > { %v1087_v30 = vpop.f32.mrf.mxu3  ;;  %v5245_v8 = vadd.f32 %v1124_v21, %v5190_v19  ;;  %v2001_v19 = vpop.permute.xlu2 %2000  ;;  %v2195_v21 = vsel %vm894_vm4, %v2183_v3, 0 }
 0x1db   : > { %v2016_v20 = vsel %vm2014_vm11, %v1999_v61, %v2001_v19  ;;  %v2017_v31 = vsel %vm2014_vm11, %v2001_v19, %v2003_v59  ;;  %v2007_v32 = vpop.permute.xlu0 %2006 }
 0x1dc   : > { %v1150_v47 = vpop.f32.mrf.mxu0  ;;  %v2033_v36 = vsel %vm894_vm4, %v2017_v31, 0  ;;  %v2020_v50 = vsel %vm2014_vm11, %v2007_v32, %v2009_v25  ;;  %v2177_v31 = vpop.permute.xlu1 %2176 }
 0x1dd   : > { %v5252_v13 = vadd.f32 %v1150_v47, %v5194_v24  ;;  %v2030_v24 = vsel %vm894_vm4, %v2016_v20, 0  ;;  %v2042_v52 = vsel %vm894_vm4, %v2020_v50, 0 }
 0x1de   : > { %v1219_v14 = vpop.f32.mrf.mxu1 }
 0x1df   : > { %4249 = vmatmul.msk.bf16.vlgmr.msrb.gmra.mxu3 %vm890_vm5, %v5202_v28  ;;  %v5262_v57 = vadd.f32 %v1219_v14, %v5204_v29  ;;  %4250 = vmatmul.msk.bf16.vlgmr.msra.gmra.mxu0 %vm890_vm5, %v5202_v28 }
 0x1e0   : > { %1967 = vmatpush.bf16.msrb.mxu3 %v1877_v11  ;;  %1980 = vmatpush.bf16.msra.mxu0 %v1880_v48  ;;  %v562_v48 = vld [vmem:[%s6023_s5] sm:$0xff] }
 0x1e1   : > { %4252 = vmatmul.msk.bf16.vlgmr.msra.gmra.mxu1 %vm890_vm5, %v5259_v15  ;;  %v1126_v17 = vpop.f32.mrf.mxu2  ;;  %2332 = vperm.xlu1 %4700, %v562_v48  }
 0x1e2   : > { %v1137_v18 = vpop.f32.mrf.mxu3  ;;  %2057 = vmatpush.bf16.msra.mxu1 %v2027_v16  ;;  %v2005_v33 = vpop.permute.xlu2 %2004 }
 0x1e3   : > { %v5271_v0 = vadd.f32 %v1137_v18, %v5211_v35  ;;  %v2018_v34 = vsel %vm2014_vm11, %v2003_v59, %v2005_v33  ;;  %v2019_v37 = vsel %vm2014_vm11, %v2005_v33, %v2007_v32  ;;  %v2013_v53 = vpop.permute.xlu0 %2012 }
 0x1e4   : > { %v1152_v23 = vpop.f32.mrf.mxu0  ;;  %v2036_v41 = vsel %vm894_vm4, %v2018_v34, 0  ;;  %v2039_v43 = vsel %vm894_vm4, %v2019_v37, 0 }
 0x1e6   : > { %v1221_v26 = vpop.f32.mrf.mxu1  ;;  %4253 = vmatmul.msk.bf16.vlgmr.msra.gmra.mxu2 %vm890_vm5, %v5259_v15 }
 0x1e7   : > { %2070 = vmatpush.bf16.msra.mxu2 %v2030_v24 }
 0x1e9   : > { %v1232_v28 = vpop.f32.mrf.mxu2 }
 0x1ea   : > { %v1139_v27 = vpop.f32.mrf.mxu3  ;;  %v5278_v29 = vadd.f32 %v1232_v28, %v5217_v45 }
 0x1eb   : > { %v2171_v30 = vpop.permute.xlu0 %2170 }
 0x1ec   : > { %v1258_v35 = vpop.f32.mrf.mxu0 }
 0x1ed   : > { %v5285_v38 = vadd.f32 %v1258_v35, %v5224_v55  ;;  %v2011_v55 = vpop.permute.xlu2 %2010 }
 0x1ee   : > { %v1271_v39 = vpop.f32.mrf.mxu1  ;;  %v2021_v61 = vsel %vm2014_vm11, %v2009_v25, %v2011_v55  ;;  %v2022_v63 = vsel %vm2014_vm11, %v2011_v55, %v2013_v53 }
 0x1ef   : > { %4254 = vmatmul.msk.bf16.vlgmr.msra.gmra.mxu3 %vm890_vm5, %v5259_v15  ;;  %v5290_v40 = vadd.f32 %v1271_v39, %v5229_v58  ;;  %4255 = vmatmul.msk.bf16.vlgmr.msrb.gmra.mxu0 %vm890_vm5, %v5259_v15  ;;  %v2048_v22 = vsel %vm894_vm4, %v2022_v63, 0 }
 0x1f0   : > { %2083 = vmatpush.bf16.msra.mxu3 %v2033_v36  ;;  %2096 = vmatpush.bf16.msrb.mxu0 %v2036_v41 }
 0x1f1   : > { %4256 = vmatmul.msk.bf16.vlgmr.msrb.gmra.mxu1 %vm890_vm5, %v5259_v15  ;;  %v1234_v45 = vpop.f32.mrf.mxu2 }
 0x1f2   : > { %v1245_v46 = vpop.f32.mrf.mxu3  ;;  %2109 = vmatpush.bf16.msrb.mxu1 %v2039_v43 }
 0x1f3   : > { %v5299_v49 = vadd.f32 %v1245_v46, %v5238_v2  ;;  %v2045_v2 = vsel %vm894_vm4, %v2021_v61, 0  ;;  %v2175_v16 = vpop.permute.xlu0 %2174 }
 0x1f4   : > { %v1260_v51 = vpop.f32.mrf.mxu0  ;;  %v2188_v33 = vsel %vm2182_vm12, %v2175_v16, %v2177_v31 }
 0x1f5   : > { %v2169_v10 = vpop.permute.xlu2 %2168  ;;  %v2210_v35 = vsel %vm894_vm4, %v2188_v33, 0  ;;  %v4269_v51 = vld [vmem:[%s6022_s4 + $0x20] sm:$0xf] }
 0x1f6   : > { %v1273_v54 = vpop.f32.mrf.mxu1  ;;  %4257 = vmatmul.msk.bf16.vlgmr.msrb.gmra.mxu2 %vm890_vm5, %v5259_v15  ;;  %v2184_v47 = vsel %vm2182_vm12, %v2167_v42, %v2169_v10  ;;  %v2185_v59 = vsel %vm2182_vm12, %v2169_v10, %v2171_v30 }
 0x1f7   : > { %2122 = vmatpush.bf16.msrb.mxu2 %v2042_v52  ;;  %v2198_v12 = vsel %vm894_vm4, %v2184_v47, 0 }
 0x1f9   : > { %v1284_v58 = vpop.f32.mrf.mxu2 }
 0x1fa   : > { %v1247_v56 = vpop.f32.mrf.mxu3  ;;  %v5306_v60 = vadd.f32 %v1284_v58, %v5245_v8 }
 0x1fc   : > { %v1310_v1 = vpop.f32.mrf.mxu0 }
 0x1fd   : > { %v5313_v5 = vadd.f32 %v1310_v1, %v5252_v13  ;;  %v2173_v17 = vpop.permute.xlu2 %2172 }
 0x1fe   : > { %v1387_v4 = vpop.f32.mrf.mxu1  ;;  %v2186_v18 = vsel %vm2182_vm12, %v2171_v30, %v2173_v17  ;;  %v2187_v20 = vsel %vm2182_vm12, %v2173_v17, %v2175_v16 }
 0x1ff   : > { %4258 = vmatmul.msk.bf16.vlgmr.msrb.gmra.mxu3 %vm890_vm5, %v5259_v15  ;;  %v5323_v7 = vadd.f32 %v1387_v4, %v5262_v57  ;;  %4259 = vmatmul.msk.bf16.vlgmr.msra.gmra.mxu0 %vm890_vm5, %v5259_v15  ;;  %v2204_v26 = vsel %vm894_vm4, %v2186_v18, 0  ;;  %v2207_v27 = vsel %vm894_vm4, %v2187_v20, 0 }
 0x200   : > { %2135 = vmatpush.bf16.msrb.mxu3 %v2045_v2  ;;  %2148 = vmatpush.bf16.msra.mxu0 %v2048_v22 }
 0x201   : > { %4261 = vmatmul.msk.bf16.vlgmr.msra.gmra.mxu1 %vm890_vm5, %v5320_v6  ;;  %v1286_v8 = vpop.f32.mrf.mxu2 }
 0x202   : > { %v1297_v9 = vpop.f32.mrf.mxu3  ;;  %2225 = vmatpush.bf16.msra.mxu1 %v2195_v21 }
 0x203   : > { %v1320_v44 = vadd.f32 %v1297_v9, %v5271_v0  ;;  %v2201_v0 = vsel %vm894_vm4, %v2185_v59, 0 }
 0x204   : > { %v1312_v11 = vpop.f32.mrf.mxu0 }
 0x205   : > { %v2179_v39 = vpop.permute.xlu2 %2178 }
 0x206   : > { %v1389_v13 = vpop.f32.mrf.mxu1  ;;  %4262 = vmatmul.msk.bf16.vlgmr.msra.gmra.mxu2 %vm890_vm5, %v5320_v6  ;;  %v2189_v42 = vsel %vm2182_vm12, %v2177_v31, %v2179_v39 }
 0x207   : > { %2238 = vmatpush.bf16.msra.mxu2 %v2198_v12  ;;  %v2213_v46 = vsel %vm894_vm4, %v2189_v42, 0 }
 0x209   : > { %v1400_v15 = vpop.f32.mrf.mxu2 }
 0x20a   : > { %v1299_v14 = vpop.f32.mrf.mxu3  ;;  %v1483_v57 = vadd.f32 %v1400_v15, %v5278_v29 }
 0x20c   : > { %v1426_v19 = vpop.f32.mrf.mxu0 }
 0x20d   : > { %v1485_v23 = vadd.f32 %v1426_v19, %v5285_v38 }
 0x20e   : > { %v1439_v24 = vpop.f32.mrf.mxu1 }
 0x20f   : > { %4263 = vmatmul.msk.bf16.vlgmr.msra.gmra.mxu3 %vm890_vm5, %v5320_v6  ;;  %v1486_v25 = vadd.f32 %v1439_v24, %v5290_v40  ;;  %4264 = vmatmul.msk.bf16.vlgmr.msrb.gmra.mxu0 %vm890_vm5, %v5320_v6  ;;  %v2181_v40 = vpop.permute.xlu0 %2180 }
 0x210   : > { %2251 = vmatpush.bf16.msra.mxu3 %v2201_v0  ;;  %2264 = vmatpush.bf16.msrb.mxu0 %v2204_v26  ;;  %v2190_v43 = vsel %vm2182_vm12, %v2179_v39, %v2181_v40 }
 0x211   : > { %4265 = vmatmul.msk.bf16.vlgmr.msrb.gmra.mxu1 %vm890_vm5, %v5320_v6  ;;  %v1402_v28 = vpop.f32.mrf.mxu2  ;;  %v2216_v53 = vsel %vm894_vm4, %v2190_v43, 0  ;;  %vm4053_vm4 = vcmask 8192  }
 0x212   : > { %v1413_v29 = vpop.f32.mrf.mxu3  ;;  %2277 = vmatpush.bf16.msrb.mxu1 %v2207_v27 }
 0x213   : > { %v1484_v32 = vadd.f32 %v1413_v29, %v5299_v49 }
 0x214   : > { %v1428_v34 = vpop.f32.mrf.mxu0 }
 0x216   : > { %v1441_v36 = vpop.f32.mrf.mxu1  ;;  %4266 = vmatmul.msk.bf16.vlgmr.msrb.gmra.mxu2 %vm890_vm5, %v5320_v6 }
 0x217   : > { %2290 = vmatpush.bf16.msrb.mxu2 %v2210_v35 }
 0x219   : > { %v1452_v38 = vpop.f32.mrf.mxu2 }
 0x21a   : > { %v1415_v37 = vpop.f32.mrf.mxu3  ;;  %v1487_v41 = vadd.f32 %v1452_v38, %v5306_v60 }
 0x21c   : > { %v1478_v45 = vpop.f32.mrf.mxu0 }
 0x21d   : > { %v1489_v49 = vadd.f32 %v1478_v45, %v5313_v5 }
 0x21e   : > { %v1555_v50 = vpop.f32.mrf.mxu1 }
 0x21f   : > { %4267 = vmatmul.msk.bf16.vlgmr.msrb.gmra.mxu3 %vm890_vm5, %v5320_v6  ;;  %v1650_v52 = vadd.f32 %v1555_v50, %v5323_v7  ;;  %4268 = vmatmul.msk.bf16.vlgmr.msra.gmra.mxu0 %vm890_vm5, %v5320_v6 }
 0x220   : > { %2303 = vmatpush.bf16.msrb.mxu3 %v2213_v46  ;;  %2316 = vmatpush.bf16.msra.mxu0 %v2216_v53 }
 0x221   : > { %4270 = vmatmul.msk.bf16.vlgmr.msra.gmra.mxu1 %vm890_vm5, %v4269_v51  ;;  %v1454_v54 = vpop.f32.mrf.mxu2 }
 0x222   : > { %v1465_v55 = vpop.f32.mrf.mxu3 }
 0x223   : > { %v1488_v56 = vadd.f32 %v1465_v55, %v1320_v44 }
 0x224   : > { %v1480_v58 = vpop.f32.mrf.mxu0 }
 0x226   : > { %v1557_v60 = vpop.f32.mrf.mxu1  ;;  %4271 = vmatmul.msk.bf16.vlgmr.msra.gmra.mxu2 %vm890_vm5, %v4269_v51 }
 0x229   : > { %v1568_v62 = vpop.f32.mrf.mxu2 }
 0x22a   : > { %v1467_v61 = vpop.f32.mrf.mxu3  ;;  %v1651_v63 = vadd.f32 %v1568_v62, %v1483_v57 }
 0x22c   : > { %v1594_v1 = vpop.f32.mrf.mxu0 }
 0x22d   : > { %v1653_v2 = vadd.f32 %v1594_v1, %v1485_v23 }
 0x22e   : > { %v1607_v3 = vpop.f32.mrf.mxu1 }
 0x22f   : > { %4272 = vmatmul.msk.bf16.vlgmr.msra.gmra.mxu3 %vm890_vm5, %v4269_v51  ;;  %v1654_v5 = vadd.f32 %v1607_v3, %v1486_v25  ;;  %4273 = vmatmul.msk.bf16.vlgmr.msrb.gmra.mxu0 %vm890_vm5, %v4269_v51 }
 0x231   : > { %4274 = vmatmul.msk.bf16.vlgmr.msrb.gmra.mxu1 %vm890_vm5, %v4269_v51  ;;  %v1570_v4 = vpop.f32.mrf.mxu2 }
 0x232   : > { %v1581_v6 = vpop.f32.mrf.mxu3 }
 0x233   : > { %v1652_v7 = vadd.f32 %v1581_v6, %v1484_v32 }
 0x234   : > { %v1596_v22 = vpop.f32.mrf.mxu0 }
 0x236   : > { %v1609_v30 = vpop.f32.mrf.mxu1  ;;  %4275 = vmatmul.msk.bf16.vlgmr.msrb.gmra.mxu2 %vm890_vm5, %v4269_v51 }
 0x237   : > { %v4288_v30 = vld [vmem:[%s6024_s6 + $0x40] sm:$0xf] }
 0x239   : > { %v1620_v8 = vpop.f32.mrf.mxu2 }
 0x23a   : > { %v1583_v21 = vpop.f32.mrf.mxu3  ;;  %v1655_v9 = vadd.f32 %v1620_v8, %v1487_v41  ;;  %v4623_v8 = vld [vmem:[%s6024_s6 + $0x44] sm:$0xf] }
 0x23b   : > { %v4627_v21 = vld [vmem:[%s6024_s6 + $0x5c] sm:$0xf0] }
 0x23c   : > { %v1646_v10 = vpop.f32.mrf.mxu0 }
 0x23d   : > { %v1657_v44 = vadd.f32 %v1646_v10, %v1489_v49 }
 0x23e   : > { %v1723_v47 = vpop.f32.mrf.mxu1 }
 0x23f   : > { %4276 = vmatmul.msk.bf16.vlgmr.msrb.gmra.mxu3 %vm890_vm5, %v4269_v51  ;;  %v1818_v11 = vadd.f32 %v1723_v47, %v1650_v52  ;;  %4277 = vmatmul.msk.bf16.vlgmr.msra.gmra.mxu0 %vm890_vm5, %v4269_v51  ;;  %v4290_v47 = vld [vmem:[%s6024_s6 + $0x60] sm:$0xf0] }
 0x241   : > { %v1622_v12 = vpop.f32.mrf.mxu2 }
 0x242   : > { %v1633_v13 = vpop.f32.mrf.mxu3 }
 0x243   : > { %v1656_v14 = vadd.f32 %v1633_v13, %v1488_v56 }
 0x244   : > { %v1648_v15 = vpop.f32.mrf.mxu0 }
 0x245   : > { %v4628_v15 = vld [vmem:[%s6024_s6 + $0x64] sm:$0xf0] }
 0x246   : > { %v1725_v57 = vpop.f32.mrf.mxu1 }
 0x247   : > { %v4624_v57 = vld [vmem:[%s6024_s6 + $0x4c] sm:$0xf] }
 0x249   : > { %v1736_v59 = vpop.f32.mrf.mxu2 }
 0x24a   : > { %v1635_v48 = vpop.f32.mrf.mxu3  ;;  %v5381_v16 = vadd.f32 %v1736_v59, %v1651_v63 }
 0x24c   : > { %v1762_v17 = vpop.f32.mrf.mxu0 }
 0x24d   : > { %v1821_v18 = vadd.f32 %v1762_v17, %v1653_v2 }
 0x24e   : > { %v1775_v19 = vpop.f32.mrf.mxu1 }
 0x24f   : > { %v1822_v0 = vadd.f32 %v1775_v19, %v1654_v5 }
 0x251   : > { %v1738_v20 = vpop.f32.mrf.mxu2 }
 0x252   : > { %v1749_v23 = vpop.f32.mrf.mxu3 }
 0x253   : > { %v5383_v24 = vadd.f32 %v1749_v23, %v1652_v7 }
 0x254   : > { %v1764_v25 = vpop.f32.mrf.mxu0 }
 0x256   : > { %v1777_v26 = vpop.f32.mrf.mxu1 }
 0x259   : > { %v1788_v28 = vpop.f32.mrf.mxu2 }
 0x25a   : > { %v1751_v27 = vpop.f32.mrf.mxu3  ;;  %v5385_v29 = vadd.f32 %v1788_v28, %v1655_v9 }
 0x25b   : > { %v5434_v27 = vpop.permute.xlu1 %2332 }
 0x25c   : > { %v1814_v31 = vpop.f32.mrf.mxu0 }
 0x25d   : > { %v1825_v32 = vadd.f32 %v1814_v31, %v1657_v44  ;;  %v4289_v44 = vor.u32 %v4627_v21, %v4288_v30  ;;  %v4304_v31 = vld [vmem:[%s6024_s6 + $0x50] sm:$0xf] }
 0x25e   : > { %v1891_v33 = vpop.f32.mrf.mxu1 }
 0x25f   : > { %v1986_v34 = vadd.f32 %v1891_v33, %v1818_v11  ;;  %v4293_v11 = vor.u32 %v4623_v8, %v4290_v47  ;;  %2479 = vmatpush.bf16.xpose.msra.mxu1 %v4289_v44  ;;  %v4625_v33 = vld [vmem:[%s6024_s6 + $0x54] sm:$0xf] }
 0x261   : > { %v1790_v35 = vpop.f32.mrf.mxu2  ;;  %2492 = vmatpush.bf16.xpose.msra.mxu2 %v4293_v11 }
 0x262   : > { %v1801_v36 = vpop.f32.mrf.mxu3 }
 0x263   : > { %v5387_v37 = vadd.f32 %v1801_v36, %v1656_v14  ;;  %v4296_v14 = vld [vmem:[%s6024_s6 + $0x48] sm:$0xf]  ;;  %v4306_v36 = vld [vmem:[%s6024_s6 + $0x70] sm:$0xf0] }
 0x264   : > { %v1816_v38 = vpop.f32.mrf.mxu0  ;;  %v4297_v17 = vor.u32 %v4628_v15, %v4296_v14 }
 0x266   : > { %v1893_v39 = vpop.f32.mrf.mxu1  ;;  %2505 = vmatpush.bf16.xpose.msra.mxu3 %v4297_v17 }
 0x269   : > { %v1904_v41 = vpop.f32.mrf.mxu2 }
 0x26a   : > { %v1803_v40 = vpop.f32.mrf.mxu3  ;;  %v1987_v23 = vadd.f32 %v1904_v41, %v5381_v16 }
 0x26b   : > { %v4309_v40 = vor.u32 %v4625_v33, %v4306_v36 }
 0x26c   : > { %v1930_v42 = vpop.f32.mrf.mxu0 }
 0x26d   : > { %v5389_v43 = vadd.f32 %v1930_v42, %v1821_v18  ;;  %v4298_v18 = vld [vmem:[%s6024_s6 + $0x68] sm:$0xf0]  ;;  %2544 = vmatpush.bf16.xpose.msrb.mxu2 %v4309_v40 }
 0x26e   : > { %v1943_v45 = vpop.f32.mrf.mxu1  ;;  %v4301_v19 = vor.u32 %v4624_v57, %v4298_v18  ;;  %v4322_v18 = vld [vmem:[%s6024_s6 + $0x20] sm:$0xf0] }
 0x26f   : > { %v5391_v46 = vadd.f32 %v1943_v45, %v1822_v0 }
 0x270   : > { %2518 = vmatpush.bf16.xpose.msrb.mxu0 %v4301_v19 }
 0x271   : > { %v1906_v49 = vpop.f32.mrf.mxu2 }
 0x272   : > { %v5393_v50 = vpop.f32.mrf.mxu3 }
 0x273   : > { %v1988_v49 = vadd.f32 %v5393_v50, %v5383_v24 }
 0x274   : > { %v1932_v51 = vpop.f32.mrf.mxu0 }
 0x276   : > { %v1945_v52 = vpop.f32.mrf.mxu1 }
 0x279   : > { %v5395_v54 = vpop.f32.mrf.mxu2 }
 0x27a   : > { %v1919_v53 = vpop.f32.mrf.mxu3  ;;  %v1991_v8 = vadd.f32 %v5395_v54, %v5385_v29 }
 0x27c   : > { %v1982_v55 = vpop.f32.mrf.mxu0 }
 0x27d   : > { %v5397_v56 = vadd.f32 %v1982_v55, %v1825_v32  ;;  %v4629_v32 = vld [vmem:[%s6024_s6 + $0x6c] sm:$0xf0] }
 0x27e   : > { %v2059_v58 = vpop.f32.mrf.mxu1  ;;  %v4305_v16 = vor.u32 %v4629_v32, %v4304_v31 }
 0x27f   : > { %v2154_v0 = vadd.f32 %v2059_v58, %v1986_v34 }
 0x280   : > { %2531 = vmatpush.bf16.xpose.msrb.mxu1 %v4305_v16 }
 0x281   : > { %v1958_v60 = vpop.f32.mrf.mxu2 }
 0x282   : > { %v5399_v61 = vpop.f32.mrf.mxu3 }
 0x284   : > { %v1984_v62 = vpop.f32.mrf.mxu0 }
 0x285   : > { %v4312_v62 = vld [vmem:[%s6024_s6 + $0x58] sm:$0xf] }
 0x286   : > { %v2061_v63 = vpop.f32.mrf.mxu1 }
 0x287   : > { %v4626_v63 = vld [vmem:[%s6024_s6 + $0x5c] sm:$0xf] }
 0x289   : > { %v2072_v2 = vpop.f32.mrf.mxu2 }
 0x28a   : > { %v1971_v1 = vpop.f32.mrf.mxu3  ;;  %v2155_v28 = vadd.f32 %v2072_v2, %v1987_v23  ;;  %v4314_v2 = vld [vmem:[%s6024_s6 + $0x78] sm:$0xf0] }
 0x28c   : > { %v2098_v3 = vpop.f32.mrf.mxu0 }
 0x28d   : > { %v2157_v41 = vadd.f32 %v2098_v3, %v5389_v43  ;;  %v4630_v43 = vld [vmem:[%s6024_s6 + $0x74] sm:$0xf0] }
 0x28e   : > { %v5401_v5 = vpop.f32.mrf.mxu1  ;;  %v4313_v50 = vor.u32 %v4630_v43, %v4312_v62 }
 0x290   : > { %2557 = vmatpush.bf16.xpose.msrb.mxu3 %v4313_v50 }
 0x291   : > { %v2074_v4 = vpop.f32.mrf.mxu2 }
 0x292   : > { %v2085_v6 = vpop.f32.mrf.mxu3 }
 0x293   : > { %v2156_v58 = vadd.f32 %v2085_v6, %v1988_v49  ;;  %v4317_v6 = vor.u32 %v4626_v63, %v4314_v2  ;;  %v4330_v49 = vld [vmem:[%s6024_s6 + $0x28] sm:$0xf0] }
 0x294   : > { %v2100_v7 = vpop.f32.mrf.mxu0 }
 0x295   : > { %v2158_v7 = vadd.f32 %v5401_v5, %v5391_v46  ;;  %2570 = vmatpush.bf16.xpose.msra.mxu0 %v4317_v6  ;;  %v4320_v5 = vld [vmem:[%s6024_s6] sm:$0xf] }
 0x296   : > { %v2113_v22 = vpop.f32.mrf.mxu1 }
 0x299   : > { %v5412_v10 = vpop.f32.mrf.mxu2 }
 0x29a   : > { %v2087_v9 = vpop.f32.mrf.mxu3  ;;  %v2159_v11 = vadd.f32 %v5412_v10, %v1991_v8  ;;  %v4615_v10 = vld [vmem:[%s6024_s6 + $0x4] sm:$0xf] }
 0x29b   : > { %v4325_v32 = vor.u32 %v4615_v10, %v4322_v18 }
 0x29c   : > { %v5417_v12 = vpop.f32.mrf.mxu0 }
 0x29d   : > { %v2161_v19 = vadd.f32 %v5417_v12, %v5397_v56 }
 0x29e   : > { %v2227_v13 = vpop.f32.mrf.mxu1 }
 0x29f   : > { %v2322_v25 = vadd.f32 %v2227_v13, %v2154_v0 }
 0x2a1   : > { %v2126_v48 = vpop.f32.mrf.mxu2  ;;  %v2335_v39 = vadd.f32 %v5434_v27, %v2322_v25  ;;  %v1992_v25 = vadd.f32 %v5399_v61, %v5387_v37  ;;  %v4328_v37 = vld [vmem:[%s6024_s6 + $0x8] sm:$0xf] }
 0x2a2   : > { %v5428_v59 = vpop.f32.mrf.mxu3  ;;  %v4619_v48 = vld [vmem:[%s6024_s6 + $0x1c] sm:$0xf0]  ;;  %v4620_v61 = vld [vmem:[%s6024_s6 + $0x24] sm:$0xf0] }
 0x2a3   : > { %v2343_v51 = vmax.f32 %v2335_v39, 0.0  ;;  %v4321_v31 = vor.u32 %v4619_v48, %v4320_v5  ;;  %v2160_v56 = vadd.f32 %v5428_v59, %v1992_v25  ;;  %v4346_v5 = vld [vmem:[%s6024_s6 + $0x38] sm:$0xf0]  ;;  %v4631_v25 = vld [vmem:[%s6024_s6 + $0x84] sm:$0xf] }
 0x2a4   : > { %v2152_v20 = vpop.f32.mrf.mxu0 }
 0x2a6   : > { %v2229_v26 = vpop.f32.mrf.mxu1 }
 0x2a9   : > { %v2240_v35 = vpop.f32.mrf.mxu2 }
 0x2aa   : > { %v2139_v34 = vpop.f32.mrf.mxu3  ;;  %v2323_v38 = vadd.f32 %v2240_v35, %v2155_v28 }
 0x2ac   : > { %v2336_v42 = vadd.f32 %v5434_v27, %v2323_v38  ;;  %v2266_v45 = vpop.f32.mrf.mxu0 }
 0x2ad   : > { %v2325_v53 = vadd.f32 %v2266_v45, %v2157_v41  ;;  %v4616_v45 = vld [vmem:[%s6024_s6 + $0xc] sm:$0xf] }
 0x2ae   : > { %v2344_v52 = vmax.f32 %v2336_v42, 0.0  ;;  %v2279_v55 = vpop.f32.mrf.mxu1 }
 0x2af   : > { %v2338_v3 = vadd.f32 %v5434_v27, %v2325_v53  ;;  %v2326_v30 = vadd.f32 %v2279_v55, %v2158_v7  ;;  %v4617_v7 = vld [vmem:[%s6024_s6 + $0x14] sm:$0xf] }
 0x2b0   : > { %v2351_v60 = vpack.c.bf16 %v2344_v52, %v2343_v51 }
 0x2b1   : > { %v2242_v1 = vpop.f32.mrf.mxu2  ;;  %v2346_v9 = vmax.f32 %v2338_v3, 0.0  ;;  %v2339_v14 = vadd.f32 %v5434_v27, %v2326_v30  ;;  %v4621_v3 = vld [vmem:[%s6024_s6 + $0x2c] sm:$0xf0] }
 0x2b2   : > { %v2253_v24 = vpop.f32.mrf.mxu3  ;;  %2355 = vst [vmem:[#allocation2 + $0x10] sm:$0xff] %v2351_v60  ;;  %v4333_v60 = vor.u32 %v4616_v45, %v4330_v49 }
 0x2b3   : > { %v2324_v4 = vadd.f32 %v2253_v24, %v2156_v58  ;;  %v2347_v26 = vmax.f32 %v2339_v14, 0.0  ;;  %v4329_v58 = vor.u32 %v4620_v61, %v4328_v37  ;;  %v4384_v37 = vld [vmem:[%s6024_s6 + $0x98] sm:$0xf] }
 0x2b4   : > { %v2268_v21 = vpop.f32.mrf.mxu0  ;;  %v4638_v61 = vld [vmem:[%s6024_s6 + $0xb4] sm:$0xf0] }
 0x2b5   : > { %v2337_v22 = vadd.f32 %v5434_v27, %v2324_v4 }
 0x2b6   : > { %v2281_v47 = vpop.f32.mrf.mxu1 }
 0x2b7   : > { %v2345_v44 = vmax.f32 %v2337_v22, 0.0  ;;  %v4338_v22 = vld [vmem:[%s6024_s6 + $0x30] sm:$0xf0] }
 0x2b9   : > { %v2352_v13 = vpack.c.bf16 %v2346_v9, %v2345_v44  ;;  %v2292_v57 = vpop.f32.mrf.mxu2  ;;  %v2359_v46 = vld [vmem:[#allocation2 + $0x10] sm:$0x11]  ;;  %v4341_v9 = vor.u32 %v4617_v7, %v4338_v22  ;;  %v4644_v7 = vld [vmem:[%s6024_s6 + $0xe4] sm:$0xf0]  ;;  %v4640_v22 = vld [vmem:[%s6024_s6 + $0xcc] sm:$0xf] }
 0x2ba   : > { %v2255_v15 = vpop.f32.mrf.mxu3  ;;  %v2327_v29 = vadd.f32 %v2292_v57, %v2159_v11  ;;  %v2384_v54 = vunpack.c.l.b16 %v2359_v46  ;;  %v2385_v17 = vunpack.c.h.b16 %v2359_v46  ;;  %v4622_v57 = vld [vmem:[%s6024_s6 + $0x34] sm:$0xf0]  ;;  %v4618_v46 = vld [vmem:[%s6024_s6 + $0x1c] sm:$0xf] }
 0x2bb   : > { %2356 = vst [vmem:[#allocation2] sm:$0xff] %v2352_v13  ;;  %v4344_v13 = vld [vmem:[%s6024_s6 + $0x18] sm:$0xf] }
 0x2bc   : > { %v2340_v0 = vadd.f32 %v5434_v27, %v2327_v29  ;;  %v5488_v20 = vpack.c.b16 %v2384_v54, %v2384_v54  ;;  %v5490_v23 = vpack.c.b16 %v2385_v17, %v2385_v17  ;;  %v2318_v28 = vpop.f32.mrf.mxu0  ;;  %v4345_v54 = vor.u32 %v4622_v57, %v4344_v13 }
 0x2bd   : > { %v2329_v34 = vadd.f32 %v2318_v28, %v2161_v19  ;;  %v4349_v17 = vor.u32 %v4618_v46, %v4346_v5  ;;  %v4360_v19 = vld [vmem:[%s6024_s6 + $0x80] sm:$0xf]  ;;  %v4645_v46 = vld [vmem:[%s6024_s6 + $0xec] sm:$0xf0]  ;;  %v4641_v5 = vld [vmem:[%s6024_s6 + $0xd4] sm:$0xf] }
 0x2be   : > { %v2348_v33 = vmax.f32 %v2340_v0, 0.0  ;;  %v2401_v35 = vshrl.u32 %v5488_v20, 16  ;;  %v2404_v16 = vshrl.u32 %v5490_v23, 16  ;;  %v4635_v0 = vld [vmem:[%s6024_s6 + $0x9c] sm:$0xf0] }
 0x2bf   : > { %v2342_v40 = vadd.f32 %v5434_v27, %v2329_v34  ;;  %v4361_v28 = vor.u32 %v4635_v0, %v4360_v19  ;;  %v4632_v34 = vld [vmem:[%s6024_s6 + $0x8c] sm:$0xf] }
 0x2c0   : > { %v2353_v12 = vpack.c.bf16 %v2348_v33, %v2347_v26  ;;  %2480 = vmatmul.bf16.vlgmr.msra.gmra.mxu1 %v2401_v35  ;;  %2493 = vmatmul.bf16.vlgmr.msra.gmra.mxu2 %v2404_v16  ;;  %v4362_v26 = vld [vmem:[%s6024_s6 + $0xa0] sm:$0xf0]  ;;  %v4636_v33 = vld [vmem:[%s6024_s6 + $0xa4] sm:$0xf0]  ;;  %v4376_v16 = vld [vmem:[%s6024_s6 + $0x90] sm:$0xf] }
 0x2c1   : > { %v2294_v39 = vpop.f32.mrf.mxu2  ;;  %2631 = vmatpush.bf16.xpose.msra.mxu1 %v4321_v31  ;;  %2644 = vmatpush.bf16.xpose.msra.mxu2 %v4325_v32  ;;  %v2350_v62 = vmax.f32 %v2342_v40, 0.0  ;;  %v4365_v31 = vor.u32 %v4631_v25, %v4362_v26  ;;  %v4368_v32 = vld [vmem:[%s6024_s6 + $0x88] sm:$0xf]  ;;  %v4634_v40 = vld [vmem:[%s6024_s6 + $0x9c] sm:$0xf] }
 0x2c2   : > { %v2305_v36 = vpop.f32.mrf.mxu3  ;;  %v2360_v38 = vld [vmem:[#allocation2] sm:$0x11]  ;;  %2357 = vst [vmem:[#allocation2 + $0x18] sm:$0xff] %v2353_v12  ;;  %v4369_v35 = vor.u32 %v4636_v33, %v4368_v32  ;;  %v4633_v12 = vld [vmem:[%s6024_s6 + $0x94] sm:$0xf] }
 0x2c3   : > { %v2328_v59 = vadd.f32 %v2305_v36, %v2160_v56  ;;  %v2386_v41 = vunpack.c.l.b16 %v2360_v38  ;;  %v2387_v42 = vunpack.c.h.b16 %v2360_v38  ;;  %v4637_v56 = vld [vmem:[%s6024_s6 + $0xac] sm:$0xf0]  ;;  %v4378_v36 = vld [vmem:[%s6024_s6 + $0xb0] sm:$0xf0]  ;;  %v4424_v25 = vld [vmem:[%s6024_s6 + $0xd8] sm:$0xf] }
 0x2c4   : > { %v2320_v55 = vpop.f32.mrf.mxu0  ;;  %v4377_v38 = vor.u32 %v4637_v56, %v4376_v16  ;;  %v4381_v39 = vor.u32 %v4633_v12, %v4378_v36  ;;  %v4642_v32 = vld [vmem:[%s6024_s6 + $0xdc] sm:$0xf]  ;;  %v4440_v12 = vld [vmem:[%s6024_s6 + $0x100] sm:$0xf] }
 0x2c5   : > { %v2341_v51 = vadd.f32 %v5434_v27, %v2328_v59  ;;  %v5511_v52 = vpack.c.b16 %v2386_v41, %v2386_v41  ;;  %v5513_v53 = vpack.c.b16 %v2387_v42, %v2387_v42  ;;  %v4336_v27 = vld [vmem:[%s6024_s6 + $0x10] sm:$0xf]  ;;  %v4386_v59 = vld [vmem:[%s6024_s6 + $0xb8] sm:$0xf0]  ;;  %v4385_v42 = vor.u32 %v4638_v61, %v4384_v37  ;;  %v4651_v36 = vld [vmem:[%s6024_s6 + $0x11c] sm:$0xf0] }
 0x2c6   : > { %v4337_v8 = vor.u32 %v4621_v3, %v4336_v27  ;;  %v2728_v41 = vld [vmem:[#allocation2 + $0x10] sm:$0x22]  ;;  %v4389_v45 = vor.u32 %v4634_v40, %v4386_v59  ;;  %v4408_v3 = vld [vmem:[%s6024_s6 + $0xc8] sm:$0xf]  ;;  %v4426_v33 = vld [vmem:[%s6024_s6 + $0xf8] sm:$0xf0]  ;;  %v4441_v37 = vor.u32 %v4651_v36, %v4440_v12 }
 0x2c7   : > { %v2349_v43 = vmax.f32 %v2341_v51, 0.0  ;;  %v2407_v63 = vshrl.u32 %v5511_v52, 16  ;;  %v2410_v1 = vshrl.u32 %v5513_v53, 16  ;;  %v2745_v49 = vunpack.c.l.b16 %v2728_v41 }
 0x2c8   : > { %v2746_v51 = vunpack.c.h.b16 %v2728_v41 }
 0x2c9   : > { %v2354_v24 = vpack.c.bf16 %v2350_v62, %v2349_v43  ;;  %2506 = vmatmul.bf16.vlgmr.msra.gmra.mxu3 %v2407_v63  ;;  %2519 = vmatmul.bf16.vlgmr.msrb.gmra.mxu0 %v2410_v1  ;;  %v2361_v2 = vld [vmem:[#allocation2 + $0x18] sm:$0x11]  ;;  %v4402_v62 = vld [vmem:[%s6024_s6 + $0xe0] sm:$0xf0] }
 0x2ca   : > { %v2307_v50 = vpop.f32.mrf.mxu3  ;;  %2657 = vmatpush.bf16.xpose.msra.mxu3 %v4329_v58  ;;  %2670 = vmatpush.bf16.xpose.msrb.mxu0 %v4333_v60  ;;  %v2388_v4 = vunpack.c.l.b16 %v2361_v2  ;;  %v2389_v6 = vunpack.c.h.b16 %v2361_v2  ;;  %v5598_v55 = vpack.c.b16 %v2746_v51, %v2746_v51  ;;  %v4643_v58 = vld [vmem:[%s6024_s6 + $0xdc] sm:$0xf0]  ;;  %v4639_v60 = vld [vmem:[%s6024_s6 + $0xc4] sm:$0xf]  ;;  %v4648_v51 = vld [vmem:[%s6024_s6 + $0x10c] sm:$0xf] }
 0x2cb   : > { %2358 = vst [vmem:[#allocation2 + $0x8] sm:$0xff] %v2354_v24  ;;  %v2729_v43 = vld [vmem:[#allocation2] sm:$0x22]  ;;  %v4405_v1 = vor.u32 %v4639_v60, %v4402_v62 }
 0x2cc   : > { %v2396_v30 = vpack.c.b16 %v2388_v4, %v2388_v4  ;;  %v2397_v21 = vpack.c.b16 %v2389_v6, %v2389_v6  ;;  %v2762_v50 = vrot.slane %v5598_v55, 1  ;;  %v2747_v2 = vunpack.c.l.b16 %v2729_v43 }
 0x2cd   : > { %v2748_v27 = vunpack.c.h.b16 %v2729_v43  ;;  %v2936_v56 = vshrl.u32 %v5598_v55, 16 }
 0x2ce   : > { %v2413_v44 = vshrl.u32 %v2396_v30, 16  ;;  %v2416_v47 = vshrl.u32 %v2397_v21, 16  ;;  %v5614_v4 = vpack.c.b16 %v2747_v2, %v2747_v2 }
 0x2cf   : > { %v5616_v6 = vpack.c.b16 %v2748_v27, %v2748_v27  ;;  %v2938_v59 = vrot.slane %v2936_v56, 1 }
 0x2d0   : > { %2532 = vmatmul.bf16.vlgmr.msrb.gmra.mxu1 %v2413_v44  ;;  %2545 = vmatmul.bf16.vlgmr.msrb.gmra.mxu2 %v2416_v47  ;;  %v2763_v44 = vrot.slane %v5614_v4, 1  ;;  %v2940_v41 = vshrl.u32 %v5614_v4, 16 }
 0x2d1   : > { %2683 = vmatpush.bf16.xpose.msrb.mxu1 %v4337_v8  ;;  %2696 = vmatpush.bf16.xpose.msrb.mxu2 %v4341_v9  ;;  %v4409_v8 = vor.u32 %v4644_v7, %v4408_v3  ;;  %v2764_v47 = vrot.slane %v5616_v6, 1 }
 0x2d2   : > { %v2362_v11 = vld [vmem:[#allocation2 + $0x8] sm:$0x11] }
 0x2d3   : > { %v2390_v14 = vunpack.c.l.b16 %v2362_v11  ;;  %v2391_v15 = vunpack.c.h.b16 %v2362_v11 }
 0x2d5   : > { %v2398_v48 = vpack.c.b16 %v2390_v14, %v2390_v14  ;;  %v2399_v29 = vpack.c.b16 %v2391_v15, %v2391_v15  ;;  %v4416_v14 = vld [vmem:[%s6024_s6 + $0xd0] sm:$0xf] }
 0x2d7   : > { %v2419_v10 = vshrl.u32 %v2398_v48, 16  ;;  %v2422_v18 = vshrl.u32 %v2399_v29, 16 }
 0x2d9   : > { %2558 = vmatmul.bf16.vlgmr.msrb.gmra.mxu3 %v2419_v10  ;;  %2571 = vmatmul.bf16.vlgmr.msra.gmra.mxu0 %v2422_v18 }
 0x2da   : > { %2709 = vmatpush.bf16.xpose.msrb.mxu3 %v4345_v54  ;;  %2722 = vmatpush.bf16.xpose.msra.mxu0 %v4349_v17  ;;  %v4417_v54 = vor.u32 %v4645_v46, %v4416_v14 }
 0x2e0   : > { %2632 = vmatmul.bf16.vlgmr.msra.gmra.mxu1 %v5488_v20  ;;  %2645 = vmatmul.bf16.vlgmr.msra.gmra.mxu2 %v5490_v23  ;;  %v4370_v20 = vld [vmem:[%s6024_s6 + $0xa8] sm:$0xf0] }
 0x2e1   : > { %2824 = vmatpush.bf16.xpose.msra.mxu1 %v4361_v28  ;;  %2837 = vmatpush.bf16.xpose.msra.mxu2 %v4365_v31  ;;  %v4373_v23 = vor.u32 %v4632_v34, %v4370_v20  ;;  %v4646_v31 = vld [vmem:[%s6024_s6 + $0xf4] sm:$0xf0]  ;;  %v4429_v20 = vor.u32 %v4642_v32, %v4426_v33  ;;  %v4488_v32 = vld [vmem:[%s6024_s6 + $0x148] sm:$0xf] }
 0x2e2   : > { %v4425_v34 = vor.u32 %v4646_v31, %v4424_v25  ;;  %v3118_v31 = vld [vmem:[#allocation2 + $0x18] sm:$0x44] }
 0x2e9   : > { %2658 = vmatmul.bf16.vlgmr.msra.gmra.mxu3 %v5511_v52  ;;  %2671 = vmatmul.bf16.vlgmr.msrb.gmra.mxu0 %v5513_v53  ;;  %v4400_v52 = vld [vmem:[%s6024_s6 + $0xc0] sm:$0xf]  ;;  %v5596_v53 = vpack.c.b16 %v2745_v49, %v2745_v49  ;;  %v4652_v49 = vld [vmem:[%s6024_s6 + $0x124] sm:$0xf0] }
 0x2ea   : > { %2850 = vmatpush.bf16.xpose.msra.mxu3 %v4369_v35  ;;  %2863 = vmatpush.bf16.xpose.msrb.mxu0 %v4373_v23  ;;  %v4401_v63 = vor.u32 %v4643_v58, %v4400_v52  ;;  %v4450_v52 = vld [vmem:[%s6024_s6 + $0x128] sm:$0xf0]  ;;  %v2942_v58 = vrot.slane %v2940_v41, 1 }
 0x2eb   : > { %v2761_v24 = vrot.slane %v5596_v53, 1  ;;  %v2932_v16 = vshrl.u32 %v5596_v53, 16  ;;  %v4453_v55 = vor.u32 %v4648_v51, %v4450_v52  ;;  %v4657_v51 = vld [vmem:[%s6024_s6 + $0x154] sm:$0xf] }
 0x2ec   : > { %v4498_v52 = vld [vmem:[%s6024_s6 + $0x170] sm:$0xf0] }
 0x2ed   : > { %v2934_v40 = vrot.slane %v2932_v16, 1 }
 0x2f0   : > { %2684 = vmatmul.bf16.vlgmr.msrb.gmra.mxu1 %v2396_v30  ;;  %2697 = vmatmul.bf16.vlgmr.msrb.gmra.mxu2 %v2397_v21  ;;  %v4410_v30 = vld [vmem:[%s6024_s6 + $0xe8] sm:$0xf0]  ;;  %v2730_v21 = vld [vmem:[#allocation2 + $0x18] sm:$0x22] }
 0x2f1   : > { %2876 = vmatpush.bf16.xpose.msrb.mxu1 %v4377_v38  ;;  %2889 = vmatpush.bf16.xpose.msrb.mxu2 %v4381_v39  ;;  %v4413_v9 = vor.u32 %v4640_v22, %v4410_v30  ;;  %v2749_v11 = vunpack.c.l.b16 %v2730_v21  ;;  %v2750_v13 = vunpack.c.h.b16 %v2730_v21  ;;  %v4647_v38 = vld [vmem:[%s6024_s6 + $0x104] sm:$0xf]  ;;  %v4464_v22 = vld [vmem:[%s6024_s6 + $0x118] sm:$0xf]  ;;  %v4650_v21 = vld [vmem:[%s6024_s6 + $0x11c] sm:$0xf] }
 0x2f2   : > { %v4442_v39 = vld [vmem:[%s6024_s6 + $0x120] sm:$0xf0]  ;;  %v4654_v30 = vld [vmem:[%s6024_s6 + $0x134] sm:$0xf0] }
 0x2f3   : > { %v5632_v15 = vpack.c.b16 %v2749_v11, %v2749_v11  ;;  %v5634_v57 = vpack.c.b16 %v2750_v13, %v2750_v13  ;;  %v4445_v61 = vor.u32 %v4647_v38, %v4442_v39  ;;  %v3137_v38 = vunpack.c.l.b16 %v3118_v31 }
 0x2f5   : > { %v2765_v10 = vrot.slane %v5632_v15, 1  ;;  %v2766_v18 = vrot.slane %v5634_v57, 1  ;;  %v2948_v62 = vshrl.u32 %v5632_v15, 16  ;;  %v2952_v43 = vshrl.u32 %v5634_v57, 16  ;;  %v4480_v57 = vld [vmem:[%s6024_s6 + $0x140] sm:$0xf] }
 0x2f6   : > { %v5757_v41 = vpack.c.b16 %v3137_v38, %v3137_v38  ;;  %v4664_v38 = vld [vmem:[%s6024_s6 + $0x18c] sm:$0xf] }
 0x2f7   : > { %v2950_v3 = vrot.slane %v2948_v62, 1  ;;  %v2954_v4 = vrot.slane %v2952_v43, 1 }
 0x2f9   : > { %2710 = vmatmul.bf16.vlgmr.msrb.gmra.mxu3 %v2398_v48  ;;  %2723 = vmatmul.bf16.vlgmr.msra.gmra.mxu0 %v2399_v29  ;;  %v4418_v48 = vld [vmem:[%s6024_s6 + $0xf0] sm:$0xf0]  ;;  %v2731_v29 = vld [vmem:[#allocation2 + $0x8] sm:$0x22] }
 0x2fa   : > { %2902 = vmatpush.bf16.xpose.msrb.mxu3 %v4385_v42  ;;  %2915 = vmatpush.bf16.xpose.msra.mxu0 %v4389_v45  ;;  %v4421_v17 = vor.u32 %v4641_v5, %v4418_v48  ;;  %v2751_v19 = vunpack.c.l.b16 %v2731_v29  ;;  %v2752_v0 = vunpack.c.h.b16 %v2731_v29  ;;  %v2944_v42 = vshrl.u32 %v5616_v6, 16  ;;  %v4448_v45 = vld [vmem:[%s6024_s6 + $0x108] sm:$0xf]  ;;  %v4659_v48 = vld [vmem:[%s6024_s6 + $0x15c] sm:$0xf0] }
 0x2fb   : > { %v4449_v53 = vor.u32 %v4652_v49, %v4448_v45  ;;  %v4655_v29 = vld [vmem:[%s6024_s6 + $0x144] sm:$0xf]  ;;  %v4661_v49 = vld [vmem:[%s6024_s6 + $0x16c] sm:$0xf0] }
 0x2fc   : > { %v5650_v26 = vpack.c.b16 %v2751_v19, %v2751_v19  ;;  %v5652_v28 = vpack.c.b16 %v2752_v0, %v2752_v0  ;;  %v2946_v60 = vrot.slane %v2944_v42, 1  ;;  %v4496_v42 = vld [vmem:[%s6024_s6 + $0x150] sm:$0xf] }
 0x2fe   : > { %v2767_v35 = vrot.slane %v5650_v26, 1  ;;  %v2768_v23 = vrot.slane %v5652_v28, 1  ;;  %v2956_v6 = vshrl.u32 %v5650_v26, 16  ;;  %v2960_v7 = vshrl.u32 %v5652_v28, 16 }
 0x300   : > { %2825 = vmatmul.bf16.vlgmr.msra.gmra.mxu1 %v2761_v24  ;;  %2838 = vmatmul.bf16.vlgmr.msra.gmra.mxu2 %v2762_v50  ;;  %v4649_v24 = vld [vmem:[%s6024_s6 + $0x114] sm:$0xf]  ;;  %v2958_v11 = vrot.slane %v2956_v6, 1  ;;  %v2962_v13 = vrot.slane %v2960_v7, 1  ;;  %v4504_v6 = vld [vmem:[%s6024_s6 + $0x158] sm:$0xf] }
 0x301   : > { %3018 = vmatpush.bf16.xpose.msra.mxu1 %v4401_v63  ;;  %3031 = vmatpush.bf16.xpose.msra.mxu2 %v4405_v1  ;;  %v4456_v63 = vld [vmem:[%s6024_s6 + $0x110] sm:$0xf]  ;;  %v4458_v50 = vld [vmem:[%s6024_s6 + $0x130] sm:$0xf0] }
 0x302   : > { %v4653_v1 = vld [vmem:[%s6024_s6 + $0x12c] sm:$0xf0]  ;;  %v4461_v27 = vor.u32 %v4649_v24, %v4458_v50  ;;  %v4501_v24 = vor.u32 %v4657_v51, %v4498_v52  ;;  %v3336_v52 = vshrl.u32 %v5757_v41, 16 }
 0x303   : > { %v4457_v2 = vor.u32 %v4653_v1, %v4456_v63  ;;  %v3153_v63 = vrot.slane %v5757_v41, 2  ;;  %v4497_v1 = vor.u32 %v4661_v49, %v4496_v42  ;;  %v4538_v41 = vld [vmem:[%s6024_s6 + $0x1b0] sm:$0xf0] }
 0x309   : > { %2851 = vmatmul.bf16.vlgmr.msra.gmra.mxu3 %v2763_v44  ;;  %2864 = vmatmul.bf16.vlgmr.msrb.gmra.mxu0 %v2764_v47  ;;  %v4465_v44 = vor.u32 %v4654_v30, %v4464_v22  ;;  %v4662_v30 = vld [vmem:[%s6024_s6 + $0x174] sm:$0xf0] }
 0x30a   : > { %3044 = vmatpush.bf16.xpose.msra.mxu3 %v4409_v8  ;;  %3057 = vmatpush.bf16.xpose.msrb.mxu0 %v4413_v9  ;;  %v4466_v8 = vld [vmem:[%s6024_s6 + $0x138] sm:$0xf0]  ;;  %v3116_v9 = vld [vmem:[#allocation2 + $0x10] sm:$0x44] }
 0x30b   : > { %v4469_v47 = vor.u32 %v4650_v21, %v4466_v8  ;;  %v3133_v14 = vunpack.c.l.b16 %v3116_v9  ;;  %v3134_v15 = vunpack.c.h.b16 %v3116_v9  ;;  %v4658_v21 = vld [vmem:[%s6024_s6 + $0x15c] sm:$0xf] }
 0x30c   : > { %v4506_v8 = vld [vmem:[%s6024_s6 + $0x178] sm:$0xf0] }
 0x30d   : > { %v5724_v46 = vpack.c.b16 %v3133_v14, %v3133_v14  ;;  %v5726_v5 = vpack.c.b16 %v3134_v15, %v3134_v15  ;;  %v4505_v14 = vor.u32 %v4662_v30, %v4504_v6  ;;  %v4509_v15 = vor.u32 %v4658_v21, %v4506_v8  ;;  %v4544_v21 = vld [vmem:[%s6024_s6 + $0x198] sm:$0xf] }
 0x30e   : > { %v4670_v8 = vld [vmem:[%s6024_s6 + $0x1b4] sm:$0xf0] }
 0x30f   : > { %v3149_v0 = vrot.slane %v5724_v46, 2  ;;  %v3150_v25 = vrot.slane %v5726_v5, 2 }
 0x310   : > { %2877 = vmatmul.bf16.vlgmr.msrb.gmra.mxu1 %v2765_v10  ;;  %2890 = vmatmul.bf16.vlgmr.msrb.gmra.mxu2 %v2766_v18  ;;  %v4481_v18 = vor.u32 %v4659_v48, %v4480_v57 }
 0x311   : > { %3070 = vmatpush.bf16.xpose.msrb.mxu1 %v4417_v54  ;;  %3083 = vmatpush.bf16.xpose.msrb.mxu2 %v4421_v17  ;;  %v4482_v54 = vld [vmem:[%s6024_s6 + $0x160] sm:$0xf0] }
 0x312   : > { %v3117_v17 = vld [vmem:[#allocation2] sm:$0x44]  ;;  %v4485_v19 = vor.u32 %v4655_v29, %v4482_v54  ;;  %v3320_v29 = vshrl.u32 %v5724_v46, 16  ;;  %v3324_v54 = vshrl.u32 %v5726_v5, 16 }
 0x313   : > { %v3135_v26 = vunpack.c.l.b16 %v3117_v17  ;;  %v3136_v28 = vunpack.c.h.b16 %v3117_v17  ;;  %v4520_v17 = vld [vmem:[%s6024_s6 + $0x180] sm:$0xf]  ;;  %v4522_v46 = vld [vmem:[%s6024_s6 + $0x1a0] sm:$0xf0] }
 0x315   : > { %v5742_v33 = vpack.c.b16 %v3135_v26, %v3135_v26 }
 0x319   : > { %2903 = vmatmul.bf16.vlgmr.msrb.gmra.mxu3 %v2767_v35  ;;  %2916 = vmatmul.bf16.vlgmr.msra.gmra.mxu0 %v2768_v23  ;;  %v4656_v35 = vld [vmem:[%s6024_s6 + $0x14c] sm:$0xf] }
 0x31a   : > { %3096 = vmatpush.bf16.xpose.msrb.mxu3 %v4425_v34  ;;  %3109 = vmatpush.bf16.xpose.msra.mxu0 %v4429_v20  ;;  %v5744_v34 = vpack.c.b16 %v3136_v28, %v3136_v28  ;;  %v4660_v20 = vld [vmem:[%s6024_s6 + $0x164] sm:$0xf0]  ;;  %v4490_v23 = vld [vmem:[%s6024_s6 + $0x168] sm:$0xf0] }
 0x31b   : > { %v4489_v39 = vor.u32 %v4660_v20, %v4488_v32  ;;  %v3322_v20 = vrot.slane %v3320_v29, 2 }
 0x320   : > { %3019 = vmatmul.bf16.vlgmr.msra.gmra.mxu1 %v2934_v40  ;;  %3032 = vmatmul.bf16.vlgmr.msra.gmra.mxu2 %v2938_v59  ;;  %v3152_v40 = vrot.slane %v5744_v34, 2  ;;  %v3138_v59 = vunpack.c.h.b16 %v3118_v31 }
 0x321   : > { %3212 = vmatpush.bf16.xpose.msra.mxu1 %v4441_v37  ;;  %3225 = vmatpush.bf16.xpose.msra.mxu2 %v4445_v61  ;;  %v4493_v37 = vor.u32 %v4656_v35, %v4490_v23  ;;  %v3151_v61 = vrot.slane %v5742_v33, 2  ;;  %v3326_v35 = vrot.slane %v3324_v54, 2 }
 0x322   : > { %v5762_v45 = vpack.c.b16 %v3138_v59, %v3138_v59 }
 0x329   : > { %3045 = vmatmul.bf16.vlgmr.msra.gmra.mxu3 %v2942_v58  ;;  %3058 = vmatmul.bf16.vlgmr.msrb.gmra.mxu0 %v2946_v60  ;;  %v3119_v58 = vld [vmem:[#allocation2 + $0x8] sm:$0x44] }
 0x32a   : > { %3238 = vmatpush.bf16.xpose.msra.mxu3 %v4449_v53  ;;  %3251 = vmatpush.bf16.xpose.msrb.mxu0 %v4453_v55 }
 0x330   : > { %3071 = vmatmul.bf16.vlgmr.msrb.gmra.mxu1 %v2950_v3  ;;  %3084 = vmatmul.bf16.vlgmr.msrb.gmra.mxu2 %v2954_v4  ;;  %v3140_v3 = vunpack.c.h.b16 %v3119_v58 }
 0x331   : > { %3264 = vmatpush.bf16.xpose.msrb.mxu1 %v4457_v2  ;;  %3277 = vmatpush.bf16.xpose.msrb.mxu2 %v4461_v27  ;;  %v3154_v2 = vrot.slane %v5762_v45, 2  ;;  %v3139_v27 = vunpack.c.l.b16 %v3119_v58  ;;  %v4669_v58 = vld [vmem:[%s6024_s6 + $0x1ac] sm:$0xf0] }
 0x332   : > { %v5780_v22 = vpack.c.b16 %v3140_v3, %v3140_v3 }
 0x333   : > { %v5778_v7 = vpack.c.b16 %v3139_v27, %v3139_v27  ;;  %v3338_v27 = vrot.slane %v3336_v52, 2 }
 0x334   : > { %v3156_v48 = vrot.slane %v5780_v22, 2  ;;  %v3348_v30 = vshrl.u32 %v5780_v22, 16 }
 0x335   : > { %v3155_v57 = vrot.slane %v5778_v7, 2  ;;  %v3344_v6 = vshrl.u32 %v5778_v7, 16  ;;  %v4546_v7 = vld [vmem:[%s6024_s6 + $0x1b8] sm:$0xf0] }
 0x336   : > { %v3350_v29 = vrot.slane %v3348_v30, 2 }
 0x339   : > { %3097 = vmatmul.bf16.vlgmr.msrb.gmra.mxu3 %v2958_v11  ;;  %3110 = vmatmul.bf16.vlgmr.msra.gmra.mxu0 %v2962_v13 }
 0x33a   : > { %3290 = vmatpush.bf16.xpose.msrb.mxu3 %v4465_v44  ;;  %3303 = vmatpush.bf16.xpose.msra.mxu0 %v4469_v47 }
 0x33d   : > { %v2481_v10 = vpop.f32.mrf.mxu1 }
 0x340   : > { %3213 = vmatmul.bf16.vlgmr.msra.gmra.mxu1 %v3149_v0  ;;  %3226 = vmatmul.bf16.vlgmr.msra.gmra.mxu2 %v3150_v25 }
 0x341   : > { %3406 = vmatpush.bf16.xpose.msra.mxu1 %v4481_v18  ;;  %3419 = vmatpush.bf16.xpose.msra.mxu2 %v4485_v19  ;;  %v4663_v18 = vld [vmem:[%s6024_s6 + $0x184] sm:$0xf] }
 0x342   : > { %v4525_v31 = vor.u32 %v4663_v18, %v4522_v46  ;;  %v4560_v18 = vld [vmem:[%s6024_s6 + $0x1c0] sm:$0xf] }
 0x343   : > { %v2494_v16 = vpop.f32.mrf.mxu2 }
 0x344   : > { %v2495_v56 = vadd.f32 %v2494_v16, %v2481_v10  ;;  %v4667_v10 = vld [vmem:[%s6024_s6 + $0x19c] sm:$0xf0]  ;;  %v3328_v16 = vshrl.u32 %v5742_v33, 16  ;;  %v4530_v33 = vld [vmem:[%s6024_s6 + $0x1a8] sm:$0xf0] }
 0x345   : > { %v2483_v12 = vpop.f32.mrf.mxu1  ;;  %v4521_v28 = vor.u32 %v4667_v10, %v4520_v17  ;;  %v4533_v42 = vor.u32 %v4664_v38, %v4530_v33  ;;  %v3505_v10 = vld [vmem:[#allocation2] sm:$0x88]  ;;  %v4568_v33 = vld [vmem:[%s6024_s6 + $0x1c8] sm:$0xf] }
 0x346   : > { %v2520_v36 = vpop.f32.mrf.mxu0  ;;  %v4528_v12 = vld [vmem:[%s6024_s6 + $0x188] sm:$0xf]  ;;  %v3330_v49 = vrot.slane %v3328_v16, 2  ;;  %v3524_v38 = vunpack.c.h.b16 %v3505_v10 }
 0x349   : > { %3239 = vmatmul.bf16.vlgmr.msra.gmra.mxu3 %v3151_v61  ;;  %3252 = vmatmul.bf16.vlgmr.msrb.gmra.mxu0 %v3152_v40 }
 0x34a   : > { %3432 = vmatpush.bf16.xpose.msra.mxu3 %v4489_v39  ;;  %3445 = vmatpush.bf16.xpose.msrb.mxu0 %v4493_v37 }
 0x34b   : > { %v2496_v53 = vpop.f32.mrf.mxu2 }
 0x34c   : > { %v2507_v55 = vpop.f32.mrf.mxu3  ;;  %v3340_v53 = vshrl.u32 %v5762_v45, 16 }
 0x34d   : > { %v2508_v60 = vadd.f32 %v2507_v55, %v2495_v56  ;;  %v2533_v43 = vpop.f32.mrf.mxu1  ;;  %v3332_v56 = vshrl.u32 %v5744_v34, 16  ;;  %v4536_v55 = vld [vmem:[%s6024_s6 + $0x190] sm:$0xf] }
 0x34e   : > { %v2522_v62 = vpop.f32.mrf.mxu0  ;;  %v3342_v3 = vrot.slane %v3340_v53, 2 }
 0x34f   : > { %v2521_v50 = vadd.f32 %v2520_v36, %v2508_v60  ;;  %v4668_v36 = vld [vmem:[%s6024_s6 + $0x1a4] sm:$0xf0]  ;;  %v3334_v51 = vrot.slane %v3332_v56, 2  ;;  %v4665_v60 = vld [vmem:[%s6024_s6 + $0x194] sm:$0xf] }
 0x350   : > { %3265 = vmatmul.bf16.vlgmr.msrb.gmra.mxu1 %v3153_v63  ;;  %3278 = vmatmul.bf16.vlgmr.msrb.gmra.mxu2 %v3154_v2  ;;  %v4529_v59 = vor.u32 %v4668_v36, %v4528_v12 }
 0x351   : > { %v2534_v4 = vadd.f32 %v2533_v43, %v2521_v50  ;;  %3458 = vmatpush.bf16.xpose.msrb.mxu1 %v4497_v1  ;;  %3471 = vmatpush.bf16.xpose.msrb.mxu2 %v4501_v24  ;;  %v4537_v24 = vor.u32 %v4669_v58, %v4536_v55  ;;  %v4541_v50 = vor.u32 %v4665_v60, %v4538_v41 }
 0x353   : > { %v2546_v44 = vpop.f32.mrf.mxu2 }
 0x354   : > { %v2509_v9 = vpop.f32.mrf.mxu3  ;;  %v2547_v47 = vadd.f32 %v2546_v44, %v2534_v4 }
 0x355   : > { %v2535_v11 = vpop.f32.mrf.mxu1  ;;  %v4666_v9 = vld [vmem:[%s6024_s6 + $0x19c] sm:$0xf] }
 0x356   : > { %v2572_v13 = vpop.f32.mrf.mxu0 }
 0x359   : > { %3291 = vmatmul.bf16.vlgmr.msrb.gmra.mxu3 %v3155_v57  ;;  %3304 = vmatmul.bf16.vlgmr.msra.gmra.mxu0 %v3156_v48  ;;  %v4549_v57 = vor.u32 %v4666_v9, %v4546_v7  ;;  %v3346_v48 = vrot.slane %v3344_v6, 2 }
 0x35a   : > { %3484 = vmatpush.bf16.xpose.msrb.mxu3 %v4505_v14  ;;  %3497 = vmatpush.bf16.xpose.msra.mxu0 %v4509_v15  ;;  %v4545_v15 = vor.u32 %v4670_v8, %v4544_v21 }
 0x35b   : > { %v2548_v19 = vpop.f32.mrf.mxu2 }
 0x35c   : > { %v2559_v5 = vpop.f32.mrf.mxu3 }
 0x35d   : > { %v2560_v0 = vadd.f32 %v2559_v5, %v2547_v47  ;;  %v2633_v26 = vpop.f32.mrf.mxu1  ;;  %v3504_v47 = vld [vmem:[#allocation2 + $0x10] sm:$0x88]  ;;  %v4675_v5 = vld [vmem:[%s6024_s6 + $0x1dc] sm:$0xf0] }
 0x35e   : > { %v2574_v25 = vpop.f32.mrf.mxu0  ;;  %v3521_v54 = vunpack.c.l.b16 %v3504_v47  ;;  %v3522_v17 = vunpack.c.h.b16 %v3504_v47 }
 0x35f   : > { %v2573_v32 = vadd.f32 %v2572_v13, %v2560_v0  ;;  %v4671_v0 = vld [vmem:[%s6024_s6 + $0x1c4] sm:$0xf] }
 0x360   : > { %3407 = vmatmul.bf16.vlgmr.msra.gmra.mxu1 %v3322_v20  ;;  %3420 = vmatmul.bf16.vlgmr.msra.gmra.mxu2 %v3326_v35  ;;  %v5852_v46 = vpack.c.b16 %v3521_v54, %v3521_v54  ;;  %v5854_v19 = vpack.c.b16 %v3522_v17, %v3522_v17  ;;  %v4562_v25 = vld [vmem:[%s6024_s6 + $0x1e0] sm:$0xf0]  ;;  %v3523_v35 = vunpack.c.l.b16 %v3505_v10  ;;  %v4586_v54 = vld [vmem:[%s6024_s6 + $0x1f8] sm:$0xf0] }
 0x361   : > { %v2634_v23 = vadd.f32 %v2633_v26, %v2573_v32  ;;  %3600 = vmatpush.bf16.xpose.msra.mxu1 %v4521_v28  ;;  %3613 = vmatpush.bf16.xpose.msra.mxu2 %v4525_v31  ;;  %v4565_v16 = vor.u32 %v4671_v0, %v4562_v25 }
 0x362   : > { %v3537_v12 = vrot.slane %v5852_v46, 3  ;;  %v3538_v36 = vrot.slane %v5854_v19, 3 }
 0x363   : > { %v2646_v34 = vpop.f32.mrf.mxu2 }
 0x364   : > { %v2561_v39 = vpop.f32.mrf.mxu3  ;;  %v2647_v37 = vadd.f32 %v2646_v34, %v2634_v23  ;;  %v4561_v23 = vor.u32 %v4675_v5, %v4560_v18  ;;  %v5874_v34 = vpack.c.b16 %v3524_v38, %v3524_v38 }
 0x365   : > { %v2635_v61 = vpop.f32.mrf.mxu1  ;;  %v5872_v39 = vpack.c.b16 %v3523_v35, %v3523_v35 }
 0x366   : > { %v2672_v40 = vpop.f32.mrf.mxu0  ;;  %v4672_v61 = vld [vmem:[%s6024_s6 + $0x1cc] sm:$0xf]  ;;  %v3540_v60 = vrot.slane %v5874_v34, 3 }
 0x367   : > { %v3539_v58 = vrot.slane %v5872_v39, 3 }
 0x369   : > { %3433 = vmatmul.bf16.vlgmr.msra.gmra.mxu3 %v3330_v49  ;;  %3446 = vmatmul.bf16.vlgmr.msrb.gmra.mxu0 %v3334_v51  ;;  %v3506_v49 = vld [vmem:[#allocation2 + $0x18] sm:$0x88] }
 0x36a   : > { %3626 = vmatpush.bf16.xpose.msra.mxu3 %v4529_v59  ;;  %3639 = vmatpush.bf16.xpose.msrb.mxu0 %v4533_v42  ;;  %v3525_v41 = vunpack.c.l.b16 %v3506_v49 }
 0x36b   : > { %v2648_v62 = vpop.f32.mrf.mxu2 }
 0x36c   : > { %v2659_v45 = vpop.f32.mrf.mxu3  ;;  %v3526_v62 = vunpack.c.h.b16 %v3506_v49 }
 0x36d   : > { %v2660_v43 = vadd.f32 %v2659_v45, %v2647_v37  ;;  %v2685_v1 = vpop.f32.mrf.mxu1  ;;  %v4676_v37 = vld [vmem:[%s6024_s6 + $0x1e4] sm:$0xf0] }
 0x36e   : > { %v2674_v63 = vpop.f32.mrf.mxu0  ;;  %v4569_v53 = vor.u32 %v4676_v37, %v4568_v33  ;;  %v3507_v45 = vld [vmem:[#allocation2 + $0x8] sm:$0x88] }
 0x36f   : > { %v2673_v2 = vadd.f32 %v2672_v40, %v2660_v43  ;;  %v4570_v40 = vld [vmem:[%s6024_s6 + $0x1e8] sm:$0xf0]  ;;  %v4576_v43 = vld [vmem:[%s6024_s6 + $0x1d0] sm:$0xf]  ;;  %v3527_v8 = vunpack.c.l.b16 %v3507_v45 }
 0x370   : > { %3459 = vmatmul.bf16.vlgmr.msrb.gmra.mxu1 %v3338_v27  ;;  %3472 = vmatmul.bf16.vlgmr.msrb.gmra.mxu2 %v3342_v3  ;;  %v4573_v55 = vor.u32 %v4672_v61, %v4570_v40  ;;  %v4578_v27 = vld [vmem:[%s6024_s6 + $0x1f0] sm:$0xf0]  ;;  %v3716_v40 = vshrl.u32 %v5872_v39, 16 }
 0x371   : > { %v2686_v4 = vadd.f32 %v2685_v1, %v2673_v2  ;;  %3652 = vmatpush.bf16.xpose.msrb.mxu1 %v4537_v24  ;;  %3665 = vmatpush.bf16.xpose.msrb.mxu2 %v4541_v50  ;;  %v5890_v1 = vpack.c.b16 %v3525_v41, %v3525_v41  ;;  %v5892_v24 = vpack.c.b16 %v3526_v62, %v3526_v62  ;;  %v4677_v50 = vld [vmem:[%s6024_s6 + $0x1ec] sm:$0xf0]  ;;  %v4673_v2 = vld [vmem:[%s6024_s6 + $0x1d4] sm:$0xf] }
 0x372   : > { %v4577_v9 = vor.u32 %v4677_v50, %v4576_v43  ;;  %v4581_v7 = vor.u32 %v4673_v2, %v4578_v27 }
 0x373   : > { %v2698_v22 = vpop.f32.mrf.mxu2  ;;  %v3542_v47 = vrot.slane %v5892_v24, 3 }
 0x374   : > { %v2661_v44 = vpop.f32.mrf.mxu3  ;;  %v2699_v11 = vadd.f32 %v2698_v22, %v2686_v4  ;;  %v3541_v22 = vrot.slane %v5890_v1, 3 }
 0x375   : > { %v2687_v13 = vpop.f32.mrf.mxu1 }
 0x376   : > { %v2724_v14 = vpop.f32.mrf.mxu0  ;;  %v4584_v13 = vld [vmem:[%s6024_s6 + $0x1d8] sm:$0xf] }
 0x379   : > { %3485 = vmatmul.bf16.vlgmr.msrb.gmra.mxu3 %v3346_v48  ;;  %3498 = vmatmul.bf16.vlgmr.msra.gmra.mxu0 %v3350_v29  ;;  %v4678_v48 = vld [vmem:[%s6024_s6 + $0x1f4] sm:$0xf0]  ;;  %v4674_v29 = vld [vmem:[%s6024_s6 + $0x1dc] sm:$0xf] }
 0x37a   : > { %3678 = vmatpush.bf16.xpose.msrb.mxu3 %v4545_v15  ;;  %3691 = vmatpush.bf16.xpose.msra.mxu0 %v4549_v57  ;;  %v3535_v15 = vpack.c.b16 %v3527_v8, %v3527_v8  ;;  %v4585_v25 = vor.u32 %v4678_v48, %v4584_v13 }
 0x37b   : > { %v2700_v26 = vpop.f32.mrf.mxu2 }
 0x37c   : > { %v2711_v28 = vpop.f32.mrf.mxu3  ;;  %v4589_v26 = vor.u32 %v4674_v29, %v4586_v54  ;;  %v3732_v50 = vshrl.u32 %v3535_v15, 16 }
 0x37d   : > { %v2712_v31 = vadd.f32 %v2711_v28, %v2699_v11  ;;  %v2826_v20 = vpop.f32.mrf.mxu1  ;;  %v3528_v11 = vunpack.c.h.b16 %v3507_v45  ;;  %v3543_v28 = vrot.slane %v3535_v15, 3 }
 0x37e   : > { %v2726_v32 = vpop.f32.mrf.mxu0 }
 0x37f   : > { %v5865_v56 = vadd.f32 %v2724_v14, %v2712_v31  ;;  %v3536_v57 = vpack.c.b16 %v3528_v11, %v3528_v11  ;;  %v3708_v32 = vshrl.u32 %v5852_v46, 16 }
 0x380   : > { %3601 = vmatmul.bf16.vlgmr.msra.gmra.mxu1 %v3537_v12  ;;  %3614 = vmatmul.bf16.vlgmr.msra.gmra.mxu2 %v3538_v36 }
 0x381   : > { %3794 = vmatpush.bf16.xpose.msra.mxu1 %v4561_v23  ;;  %3807 = vmatpush.bf16.xpose.msra.mxu2 %v4565_v16  ;;  %v3544_v31 = vrot.slane %v3536_v57, 3  ;;  %v3710_v33 = vrot.slane %v3708_v32, 3  ;;  %v3736_v2 = vshrl.u32 %v3536_v57, 16 }
 0x383   : > { %v2839_v42 = vpop.f32.mrf.mxu2 }
 0x384   : > { %v2713_v59 = vpop.f32.mrf.mxu3  ;;  %v2840_v63 = vadd.f32 %v2839_v42, %v2826_v20  ;;  %v3712_v20 = vshrl.u32 %v5854_v19, 16 }
 0x385   : > { %v2828_v51 = vpop.f32.mrf.mxu1  ;;  %v3720_v59 = vshrl.u32 %v5874_v34, 16 }
 0x386   : > { %v2865_v52 = vpop.f32.mrf.mxu0  ;;  %v3714_v37 = vrot.slane %v3712_v20, 3 }
 0x389   : > { %3627 = vmatmul.bf16.vlgmr.msra.gmra.mxu3 %v3539_v58  ;;  %3640 = vmatmul.bf16.vlgmr.msrb.gmra.mxu0 %v3540_v60  ;;  %v3728_v58 = vshrl.u32 %v5892_v24, 16  ;;  %v3738_v24 = vrot.slane %v3736_v2, 3 }
 0x38a   : > { %3820 = vmatpush.bf16.xpose.msra.mxu3 %v4569_v53  ;;  %3833 = vmatpush.bf16.xpose.msrb.mxu0 %v4573_v55  ;;  %v3722_v53 = vrot.slane %v3720_v59, 3  ;;  %v3724_v55 = vshrl.u32 %v5890_v1, 16 }
 0x38b   : > { %v2841_v3 = vpop.f32.mrf.mxu2  ;;  %v3730_v43 = vrot.slane %v3728_v58, 3 }
 0x38c   : > { %v2852_v4 = vpop.f32.mrf.mxu3  ;;  %v3726_v34 = vrot.slane %v3724_v55, 3 }
 0x38d   : > { %v2853_v6 = vadd.f32 %v2852_v4, %v2840_v63  ;;  %v2878_v21 = vpop.f32.mrf.mxu1 }
 0x38e   : > { %v2867_v30 = vpop.f32.mrf.mxu0 }
 0x38f   : > { %v2866_v44 = vadd.f32 %v2865_v52, %v2853_v6  ;;  %v3718_v52 = vrot.slane %v3716_v40, 3  ;;  %v3734_v30 = vrot.slane %v3732_v50, 3 }
 0x390   : > { %3653 = vmatmul.bf16.vlgmr.msrb.gmra.mxu1 %v3541_v22  ;;  %3666 = vmatmul.bf16.vlgmr.msrb.gmra.mxu2 %v3542_v47 }
 0x391   : > { %3846 = vmatpush.bf16.xpose.msrb.mxu1 %v4577_v9  ;;  %3859 = vmatpush.bf16.xpose.msrb.mxu2 %v4581_v7  ;;  %v2879_v14 = vadd.f32 %v2878_v21, %v2866_v44 }
 0x393   : > { %v2891_v10 = vpop.f32.mrf.mxu2 }
 0x394   : > { %v2854_v17 = vpop.f32.mrf.mxu3  ;;  %v2892_v18 = vadd.f32 %v2891_v10, %v2879_v14 }
 0x395   : > { %v2880_v5 = vpop.f32.mrf.mxu1 }
 0x396   : > { %v2917_v0 = vpop.f32.mrf.mxu0 }
 0x399   : > { %3679 = vmatmul.bf16.vlgmr.msrb.gmra.mxu3 %v3543_v28  ;;  %3692 = vmatmul.bf16.vlgmr.msra.gmra.mxu0 %v3544_v31 }
 0x39a   : > { %3872 = vmatpush.bf16.xpose.msrb.mxu3 %v4585_v25  ;;  %3885 = vmatpush.bf16.xpose.msra.mxu0 %v4589_v26 }
 0x39b   : > { %v2893_v35 = vpop.f32.mrf.mxu2 }
 0x39c   : > { %v2904_v23 = vpop.f32.mrf.mxu3 }
 0x39d   : > { %v2905_v16 = vadd.f32 %v2904_v23, %v2892_v18  ;;  %v3020_v36 = vpop.f32.mrf.mxu1 }
 0x39e   : > { %v2919_v12 = vpop.f32.mrf.mxu0 }
 0x39f   : > { %v2918_v38 = vadd.f32 %v2917_v0, %v2905_v16 }
 0x3a0   : > { %3795 = vmatmul.bf16.vlgmr.msra.gmra.mxu1 %v3710_v33  ;;  %3808 = vmatmul.bf16.vlgmr.msra.gmra.mxu2 %v3714_v37 }
 0x3a1   : > { %v2921_v61 = vadd.f32 %v2918_v38, %v5865_v56 }
 0x3a3   : > { %v3033_v46 = vpop.f32.mrf.mxu2 }
 0x3a4   : > { %v2906_v42 = vpop.f32.mrf.mxu3  ;;  %v3034_v49 = vadd.f32 %v3033_v46, %v3020_v36 }
 0x3a5   : > { %v3022_v19 = vpop.f32.mrf.mxu1 }
 0x3a6   : > { %v3059_v51 = vpop.f32.mrf.mxu0 }
 0x3a9   : > { %3821 = vmatmul.bf16.vlgmr.msra.gmra.mxu3 %v3718_v52  ;;  %3834 = vmatmul.bf16.vlgmr.msrb.gmra.mxu0 %v3722_v53 }
 0x3ab   : > { %v3035_v56 = vpop.f32.mrf.mxu2 }
 0x3ac   : > { %v3046_v60 = vpop.f32.mrf.mxu3 }
 0x3ad   : > { %v3047_v41 = vadd.f32 %v3046_v60, %v3034_v49  ;;  %v3072_v39 = vpop.f32.mrf.mxu1 }
 0x3ae   : > { %v3061_v62 = vpop.f32.mrf.mxu0 }
 0x3af   : > { %v3060_v45 = vadd.f32 %v3059_v51, %v3047_v41 }
 0x3b0   : > { %3847 = vmatmul.bf16.vlgmr.msrb.gmra.mxu1 %v3726_v34  ;;  %3860 = vmatmul.bf16.vlgmr.msrb.gmra.mxu2 %v3730_v43 }
 0x3b1   : > { %v3073_v63 = vadd.f32 %v3072_v39, %v3060_v45 }
 0x3b3   : > { %v3085_v3 = vpop.f32.mrf.mxu2 }
 0x3b4   : > { %v3048_v27 = vpop.f32.mrf.mxu3  ;;  %v3086_v4 = vadd.f32 %v3085_v3, %v3073_v63 }
 0x3b5   : > { %v3074_v6 = vpop.f32.mrf.mxu1 }
 0x3b6   : > { %v3111_v1 = vpop.f32.mrf.mxu0 }
 0x3b9   : > { %3873 = vmatmul.bf16.vlgmr.msrb.gmra.mxu3 %v3734_v30  ;;  %3886 = vmatmul.bf16.vlgmr.msra.gmra.mxu0 %v3738_v24 }
 0x3bb   : > { %v3087_v21 = vpop.f32.mrf.mxu2 }
 0x3bc   : > { %v3098_v8 = vpop.f32.mrf.mxu3 }
 0x3bd   : > { %v3099_v9 = vadd.f32 %v3098_v8, %v3086_v4  ;;  %v3214_v44 = vpop.f32.mrf.mxu1 }
 0x3be   : > { %v3113_v7 = vpop.f32.mrf.mxu0 }
 0x3bf   : > { %v3112_v22 = vadd.f32 %v3111_v1, %v3099_v9 }
 0x3c1   : > { %v3115_v47 = vadd.f32 %v3112_v22, %v2921_v61 }
 0x3c3   : > { %v3227_v13 = vpop.f32.mrf.mxu2 }
 0x3c4   : > { %v3100_v11 = vpop.f32.mrf.mxu3  ;;  %v3228_v14 = vadd.f32 %v3227_v13, %v3214_v44 }
 0x3c5   : > { %v3216_v15 = vpop.f32.mrf.mxu1 }
 0x3c6   : > { %v3253_v57 = vpop.f32.mrf.mxu0 }
 0x3cb   : > { %v3229_v48 = vpop.f32.mrf.mxu2 }
 0x3cc   : > { %v3240_v29 = vpop.f32.mrf.mxu3 }
 0x3cd   : > { %v3241_v54 = vadd.f32 %v3240_v29, %v3228_v14  ;;  %v3266_v10 = vpop.f32.mrf.mxu1 }
 0x3ce   : > { %v3255_v17 = vpop.f32.mrf.mxu0 }
 0x3cf   : > { %v3254_v18 = vadd.f32 %v3253_v57, %v3241_v54 }
 0x3d1   : > { %v3267_v5 = vadd.f32 %v3266_v10, %v3254_v18 }
 0x3d3   : > { %v3279_v25 = vpop.f32.mrf.mxu2 }
 0x3d4   : > { %v3242_v0 = vpop.f32.mrf.mxu3  ;;  %v3280_v26 = vadd.f32 %v3279_v25, %v3267_v5 }
 0x3d5   : > { %v3268_v28 = vpop.f32.mrf.mxu1 }
 0x3d6   : > { %v3305_v31 = vpop.f32.mrf.mxu0 }
 0x3db   : > { %v3281_v32 = vpop.f32.mrf.mxu2 }
 0x3dc   : > { %v3292_v20 = vpop.f32.mrf.mxu3 }
 0x3dd   : > { %v3293_v35 = vadd.f32 %v3292_v20, %v3280_v26  ;;  %v3408_v16 = vpop.f32.mrf.mxu1 }
 0x3de   : > { %v3307_v23 = vpop.f32.mrf.mxu0 }
 0x3df   : > { %v3306_v12 = vadd.f32 %v3305_v31, %v3293_v35 }
 0x3e1   : > { %v3309_v36 = vadd.f32 %v3306_v12, %v3115_v47 }
 0x3e3   : > { %v3421_v33 = vpop.f32.mrf.mxu2 }
 0x3e4   : > { %v3294_v38 = vpop.f32.mrf.mxu3  ;;  %v3422_v37 = vadd.f32 %v3421_v33, %v3408_v16 }
 0x3e5   : > { %v3410_v61 = vpop.f32.mrf.mxu1 }
 0x3e6   : > { %v3447_v40 = vpop.f32.mrf.mxu0 }
 0x3eb   : > { %v3423_v59 = vpop.f32.mrf.mxu2 }
 0x3ec   : > { %v3434_v42 = vpop.f32.mrf.mxu3 }
 0x3ed   : > { %v3435_v46 = vadd.f32 %v3434_v42, %v3422_v37  ;;  %v3460_v19 = vpop.f32.mrf.mxu1  ;;  %v3892_v42 = vld [vmem:[%s6025_s7] sm:$0x1] }
 0x3ee   : > { %v3449_v49 = vpop.f32.mrf.mxu0 }
 0x3ef   : > { %v3448_v51 = vadd.f32 %v3447_v40, %v3435_v46 }
 0x3f1   : > { %v3461_v52 = vadd.f32 %v3460_v19, %v3448_v51 }
 0x3f3   : > { %v3473_v55 = vpop.f32.mrf.mxu2 }
 0x3f4   : > { %v3436_v53 = vpop.f32.mrf.mxu3  ;;  %v3474_v58 = vadd.f32 %v3473_v55, %v3461_v52  ;;  %v4723_v52 = vmov 16.0  }
 0x3f5   : > { %v3462_v56 = vpop.f32.mrf.mxu1  ;;  %4701 = vrcp.f32 %v4723_v52 }
 0x3f6   : > { %v3499_v60 = vpop.f32.mrf.mxu0 }
 0x3fb   : > { %v3475_v41 = vpop.f32.mrf.mxu2  ;;  %v4702_v53 = vpop.eup %4701 }
 0x3fc   : > { %v3486_v62 = vpop.f32.mrf.mxu3  ;;  %v3899_v55 = vmul.f32 16.0, %v4702_v53  ;;  %vm3903_vm14 = vweird.f32 %v4702_v53 }
 0x3fd   : > { %v3487_v39 = vadd.f32 %v3486_v62, %v3474_v58  ;;  %v3602_v34 = vpop.f32.mrf.mxu1 }
 0x3fe   : > { %v3501_v45 = vpop.f32.mrf.mxu0  ;;  %v3900_v58 = vsub.f32 1.0, %v3899_v55 }
 0x3ff   : > { %v3500_v43 = vadd.f32 %v3499_v60, %v3487_v39 }
 0x400   : > { %v3901_v56 = vmul.f32 %v4702_v53, %v3900_v58 }
 0x401   : > { %v3503_v63 = vadd.f32 %v3500_v43, %v3309_v36 }
 0x402   : > { %v3902_v60 = vadd.f32 %v4702_v53, %v3901_v56 }
 0x403   : > { %v3615_v2 = vpop.f32.mrf.mxu2 }
 0x404   : > { %v3488_v50 = vpop.f32.mrf.mxu3  ;;  %v3616_v57 = vadd.f32 %v3615_v2, %v3602_v34  ;;  %v3904_v41 = vsel %vm3903_vm14, %v4702_v53, %v3902_v60  ;;  %v3932_v2 = vld [vmem:[%s6029_s11 + $0x8] sm:$0x1f] }
 0x405   : > { %v3604_v27 = vpop.f32.mrf.mxu1  ;;  %v3929_v50 = vld [vmem:[%s6028_s10] sm:$0xff]  ;;  %4590 = vmatpush.msk.msra.mxu1 %vm675_vm0, %v3932_v2 }
 0x406   : > { %v3641_v3 = vpop.f32.mrf.mxu0  ;;  %v3931_v27 = vld [vmem:[%s6029_s11] sm:$0xff] }
 0x407   : > { %3955 = vmatpush.msra.mxu1 %v3931_v27 }
 0x40b   : > { %v3617_v4 = vpop.f32.mrf.mxu2 }
 0x40c   : > { %v3628_v6 = vpop.f32.mrf.mxu3  ;;  %v3994_v4 = vld [vmem:[%s6031_s13 + $0x38] sm:$0xff] }
 0x40d   : > { %v3654_v30 = vpop.f32.mrf.mxu1  ;;  %v3629_v48 = vadd.f32 %v3628_v6, %v3616_v57  ;;  %v3993_v6 = vld [vmem:[%s6031_s13 + $0x30] sm:$0xff]  ;;  %4008 = vmatpush.msra.mxu3 %v3994_v4  ;;  %v3926_v57 = vld [vmem:[%s6027_s9] sm:$0x1] }
 0x40e   : > { %v3643_v1 = vpop.f32.mrf.mxu0 }
 0x40f   : > { %v3642_v18 = vadd.f32 %v3641_v3, %v3629_v48  ;;  %v3928_v3 = vld [vmem:[%s555_s29] sm:$0x1]  ;;  %4009 = vmatpush.msra.mxu3 %v3993_v6 }
 0x410   : > { %4591 = vmatmul.msk.f32.vlgmr.msra.gmra.mxu1 %vm3933_vm15, %v3928_v3 }
 0x411   : > { %v3655_v25 = vadd.f32 %v3654_v30, %v3642_v18  ;;  %v3992_v30 = vld [vmem:[%s6031_s13 + $0x28] sm:$0xff]  ;;  %v4028_v18 = vld [vmem:[%s6033_s15 + $0x38] sm:$0xff] }
 0x412   : > { %4010 = vmatpush.msra.mxu3 %v3992_v30  ;;  %4041 = vmatpush.msrb.mxu0 %v4028_v18 }
 0x413   : > { %v3667_v21 = vpop.f32.mrf.mxu2 }
 0x414   : > { %v3630_v24 = vpop.f32.mrf.mxu3  ;;  %v3668_v31 = vadd.f32 %v3667_v21, %v3655_v25  ;;  %v3991_v21 = vld [vmem:[%s6031_s13 + $0x20] sm:$0xff]  ;;  %v4026_v25 = vld [vmem:[%s6033_s15 + $0x28] sm:$0xff] }
 0x415   : > { %v3656_v8 = vpop.f32.mrf.mxu1  ;;  %4011 = vmatpush.msra.mxu3 %v3991_v21 }
 0x416   : > { %v3693_v9 = vpop.f32.mrf.mxu0 }
 0x41b   : > { %v3669_v7 = vpop.f32.mrf.mxu2 }
 0x41c   : > { %v3680_v44 = vpop.f32.mrf.mxu3 }
 0x41d   : > { %v3796_v47 = vpop.f32.mrf.mxu1  ;;  %v3681_v23 = vadd.f32 %v3680_v44, %v3668_v31 }
 0x41e   : > { %v3695_v22 = vpop.f32.mrf.mxu0 }
 0x41f   : > { %v3694_v12 = vadd.f32 %v3693_v9, %v3681_v23 }
 0x421   : > { %v3697_v40 = vadd.f32 %v3694_v12, %v3503_v63  ;;  %v3930_v63 = vld [vmem:[%s6028_s10 + $0x8] sm:$0xff]  ;;  %v4023_v12 = vld [vmem:[%s6033_s15 + $0x10] sm:$0xff] }
 0x422   : > { %3978 = vmatpush.msra.mxu2 %v3930_v63 }
 0x423   : > { %v3809_v13 = vpop.f32.mrf.mxu2 }
 0x424   : > { %v3682_v11 = vpop.f32.mrf.mxu3  ;;  %v3810_v5 = vadd.f32 %v3809_v13, %v3796_v47  ;;  %3979 = vmatpush.msra.mxu2 %v3929_v50  ;;  %v3924_v13 = vld [vmem:[%s6026_s8] sm:$0x1] }
 0x425   : > { %v3798_v14 = vpop.f32.mrf.mxu1 }
 0x426   : > { %v3835_v15 = vpop.f32.mrf.mxu0 }
 0x42b   : > { %v3811_v29 = vpop.f32.mrf.mxu2 }
 0x42c   : > { %v3822_v54 = vpop.f32.mrf.mxu3 }
 0x42d   : > { %v3848_v10 = vpop.f32.mrf.mxu1  ;;  %v3823_v0 = vadd.f32 %v3822_v54, %v3810_v5  ;;  %v3990_v54 = vld [vmem:[%s6031_s13 + $0x18] sm:$0xff]  ;;  %v4027_v5 = vld [vmem:[%s6033_s15 + $0x30] sm:$0xff] }
 0x42e   : > { %v3837_v17 = vpop.f32.mrf.mxu0  ;;  %4012 = vmatpush.msra.mxu3 %v3990_v54  ;;  %4042 = vmatpush.msrb.mxu0 %v4027_v5 }
 0x42f   : > { %v3836_v32 = vadd.f32 %v3835_v15, %v3823_v0  ;;  %v3989_v17 = vld [vmem:[%s6031_s13 + $0x10] sm:$0xff]  ;;  %v3987_v0 = vld [vmem:[%s6031_s13] sm:$0xff] }
 0x430   : > { %4013 = vmatpush.msra.mxu3 %v3989_v17  ;;  %4043 = vmatpush.msrb.mxu0 %v4026_v25 }
 0x431   : > { %v3849_v16 = vadd.f32 %v3848_v10, %v3836_v32  ;;  %v3988_v10 = vld [vmem:[%s6031_s13 + $0x8] sm:$0xff] }
 0x432   : > { %4014 = vmatpush.msra.mxu3 %v3988_v10 }
 0x433   : > { %v3861_v28 = vpop.f32.mrf.mxu2 }
 0x434   : > { %v3824_v26 = vpop.f32.mrf.mxu3  ;;  %v3862_v36 = vadd.f32 %v3861_v28, %v3849_v16  ;;  %4015 = vmatpush.msra.mxu3 %v3987_v0  ;;  %v4024_v28 = vld [vmem:[%s6033_s15 + $0x18] sm:$0xff] }
 0x435   : > { %v3850_v20 = vpop.f32.mrf.mxu1  ;;  %v4025_v26 = vld [vmem:[%s6033_s15 + $0x20] sm:$0xff] }
 0x436   : > { %v3887_v35 = vpop.f32.mrf.mxu0  ;;  %4044 = vmatpush.msrb.mxu0 %v4025_v26  ;;  %v3984_v20 = vld [vmem:[%s6030_s12] sm:$0x1] }
 0x438   : > { %4045 = vmatpush.msrb.mxu0 %v4024_v28 }
 0x43a   : > { %4046 = vmatpush.msrb.mxu0 %v4023_v12 }
 0x43b   : > { %v3863_v38 = vpop.f32.mrf.mxu2 }
 0x43c   : > { %v3874_v33 = vpop.f32.mrf.mxu3  ;;  %v4021_v38 = vld [vmem:[%s6033_s15] sm:$0xff] }
 0x43d   : > { %v3875_v37 = vadd.f32 %v3874_v33, %v3862_v36  ;;  %v4022_v36 = vld [vmem:[%s6033_s15 + $0x8] sm:$0xff]  ;;  %v3995_v33 = vld [vmem:[%s6032_s14] sm:$0x1] }
 0x43e   : > { %v3889_v61 = vpop.f32.mrf.mxu0  ;;  %4047 = vmatpush.msrb.mxu0 %v4022_v36 }
 0x43f   : > { %v3888_v59 = vadd.f32 %v3887_v35, %v3875_v37 }
 0x440   : > { %4048 = vmatpush.msrb.mxu0 %v4021_v38 }
 0x441   : > { %v3891_v46 = vadd.f32 %v3888_v59, %v3697_v40  ;;  %v4029_v59 = vld [vmem:[%s6034_s16] sm:$0x1] }
 0x443   : > { %v3893_v49 = vadd.f32 %v3892_v42, %v3891_v46 }
 0x444   : > { %v3876_v19 = vpop.f32.mrf.mxu3 }
 0x445   : > { %v3895_v51 = vsel %vm3894_vm13, %v3893_v49, 0.0 }
 0x446   : > { %3896 = vadd.xlane.f32.xlu2 %v3895_v51 }
 0x48d   : > { %v3957_v31 = vpop.f32.mrf.mxu1 }
 0x4b9   : > { %v3897_v62 = vpop.xlane.xlu2 %3896 }
 0x4ba   : > { %v3905_v39 = vmul.f32 %v3904_v41, %v3897_v62 }
 0x4bc   : > { %v3906_v45 = vsub.f32 %v3893_v49, %v3905_v39 }
 0x4be   : > { %v3907_v34 = vmul.f32 %v3906_v45, %v3906_v45 }
 0x4c0   : > { %v3908_v43 = vsel %vm3894_vm13, %v3907_v34, 0.0 }
 0x4c1   : > { %3909 = vadd.xlane.f32.xlu0 %v3908_v43 }
 0x534   : > { %v3910_v1 = vpop.xlane.xlu0 %3909 }
 0x535   : > { %v3911_v24 = vmul.f32 %v3910_v1, %v3904_v41 }
 0x537   : > { %v3912_v8 = vadd.f32 1e-05, %v3911_v24 }
 0x539   : > { %4703 = vrsqrt.f32 %v3912_v8  ;;  %vm3919_vm1 = vweird.f32 %v3912_v8 }
 0x53f   : > { %v4704_v9 = vpop.eup %4703 }
 0x540   : > { %v3914_v7 = vmul.f32 %v4704_v9, %v3912_v8  ;;  %vm3920_vm0 = vweird.f32 %v4704_v9 }
 0x541   : > { %vm3921_vm2 = vmor %vm3919_vm1, %vm3920_vm0 }
 0x542   : > { %v3915_v44 = vmul.f32 %v4704_v9, %v3914_v7 }
 0x544   : > { %v3916_v22 = vmul.f32 0.5, %v3915_v44 }
 0x546   : > { %v3917_v47 = vsub.f32 1.5, %v3916_v22 }
 0x548   : > { %v3918_v11 = vmul.f32 %v4704_v9, %v3917_v47 }
 0x54a   : > { %v3922_v14 = vsel %vm3921_vm2, %v4704_v9, %v3918_v11 }
 0x54b   : > { %v3923_v15 = vmul.f32 %v3922_v14, %v3906_v45 }
 0x54d   : > { %v3925_v48 = vmul.f32 %v3924_v13, %v3923_v15 }
 0x54f   : > { %v3927_v29 = vadd.f32 %v3926_v57, %v3925_v48 }
 0x551   : > { %4592 = vmatmul.msk.f32.vlgmr.msra.gmra.mxu2 %vm3960_vm3, %v3927_v29 }
 0x5d4   : > { %v3981_v32 = vpop.f32.mrf.mxu2 }
 0x5d5   : > { %v3982_v35 = vadd.f32 %v3981_v32, %v3957_v31 }
 0x5d7   : > { %v3985_v23 = vadd.f32 %v3984_v20, %v3982_v35 }
 0x5d9   : > { %v3986_v16 = vmax.f32 %v3985_v23, 0.0 }
 0x5db   : > { %4593 = vmatmul.msk.f32.vlgmr.msra.gmra.mxu3 %vm2182_vm12, %v3986_v16 }
 0x65e   : > { %v4017_v37 = vpop.f32.mrf.mxu3 }
 0x65f   : > { %v4018_v61 = vadd.f32 %v4017_v37, %v3995_v33 }
 0x661   : > { %v4020_v40 = vmax.f32 %v4018_v61, 0.0 }
 0x663   : > { %4594 = vmatmul.msk.f32.vlgmr.msrb.gmra.mxu0 %vm2182_vm12, %v4020_v40 }
 0x6e0   : > { %v4050_v42 = vpop.f32.mrf.mxu0 }
 0x6e1   : > { %v4051_v46 = vadd.f32 %v4050_v42, %v4029_v59 }
 0x6e3   : > { %4054 = vst.msk [vmem:[%s558_s26] sm:$0x1] %vm4053_vm4, %v4051_v46 }
 0x6e4 PF: > { %s27_s24 = sadd.s32 1, %s4711_s24  }
 0x6e5   : > { %p24_p4 = scmp.ge.s32.totalorder %s27_s24, 4  }
 0x6e7   :  { %26 = sbr.rel (!%p24_p4) target bundleno = 3 (0x3), region = 136 }

</bundles_post_ra>
